<compile_context>
chip_gen: v6e
topology: v6e:2x2x1
jax: 0.10.0
libtpu: 0.0.40
codegen_flags: <defaults>
</compile_context>

<pallas_src>
import math
import functools

import jax
import jax.numpy as jnp
from jax import lax
from jax.experimental import pallas as pl
from jax.experimental.pallas import tpu as pltpu

# ----------------------------- sizes (small, consistent with module) ----------
HIDDEN = 32            # hidden_dim
HEAD = 8               # head
HEAD_SIZE = HIDDEN // 8
B = 2                  # batch
NX = 8                 # x sequence length
NY = 8                 # y sequence length

NEG_INF = -65504.0     # matches the PyTorch module's masked_fill value
_HI = lax.Precision.HIGHEST   # all kernel matmuls are tiny (<= [16,128]x[128,96]),
                              # so exact f32 passes cost nothing and keep parity tight.


# ----------------------------- packing helpers ---------------------------------

def _pack_rows(entries):
  """Stack 2-D arrays (width <= 128) into one [R, 128] f32 slab.

  Every entry starts at an 8-aligned row so static in-kernel slices are clean.
  Returns (slab, {name: (row_offset, (rows, cols))}) with Python-int offsets.
  """
  parts, offs, row = [], {}, 0
  for name, a in entries:
    a = jnp.asarray(a, jnp.float32)
    assert a.ndim == 2 and a.shape[1] <= 128, (name, a.shape)
    r, c = int(a.shape[0]), int(a.shape[1])
    offs[name] = (row, (r, c))
    parts.append(jnp.pad(a, ((0, 0), (0, 128 - c))))
    step = r + ((-r) % 8)
    if step != r:
      parts.append(jnp.zeros((step - r, 128), jnp.float32))
    row += step
  return jnp.concatenate(parts, axis=0), offs


def _attn_consts(tag, batch, nq, nk, mask):
  """Precomputed constants for one attention block (packed-column layout).

  Packed column c = (b, h, j): b slowest, j fastest.  Everything here depends
  only on static shapes plus the key-padding mask, so it is built once in the
  wrapper instead of via iota/compare/select chains inside the kernel.
  """
  ncols = batch * HEAD * nk
  assert ncols <= 128, "packed score columns must fit one lane tile"
  c = jnp.arange(ncols)
  # selection: packed column c reads source row b*nk + j of the K/V projections
  src = (c // (HEAD * nk)) * nk + (c % nk)
  psel = (src[:, None] == jnp.arange(batch * nk)[None, :]).astype(jnp.float32)
  # head-block mask: column c only matches hidden dims of its own head
  head_of_col = (c // nk) % HEAD
  d = jnp.arange(HIDDEN)
  blk = (head_of_col[:, None] == (d[None, :] // HEAD_SIZE)).astype(jnp.float32)
  # additive bias: 0 for (same batch, un-padded key) columns, NEG_INF otherwise
  key_masked = jnp.broadcast_to(mask, (batch, 1, 1, nk)).reshape(batch, nk)
  cols_masked = jnp.tile(key_masked, (1, HEAD)).reshape(ncols)
  row_b = jnp.arange(batch * nq) // nq
  col_b = c // (HEAD * nk)
  ok = (row_b[:, None] == col_b[None, :]) & jnp.logical_not(cols_masked)[None, :]
  bias = jnp.where(ok, 0.0, NEG_INF).astype(jnp.float32)
  return [("psel" + tag, psel), ("pselT" + tag, psel.T),
          ("blk" + tag, blk), ("blkT" + tag, blk.T),
          ("bias" + tag, bias)]


# ----------------------------- fused Pallas kernel -----------------------------

def _decoder_kernel(acts_ref, par_ref, con_ref, o_ref, *, batch, nx, ny, pofs, cofs):
  """Entire decoder forward in a single grid point; everything stays in VMEM."""
  f32 = jnp.float32
  scale = 1.0 / math.sqrt(HEAD_SIZE)

  def P(name):
    off, (r, c) = pofs[name]
    return par_ref[off:off + r, 0:c]

  def C(name):
    off, (r, c) = cofs[name]
    return con_ref[off:off + r, 0:c]

  def dot(a, b):
    return jnp.dot(a, b, preferred_element_type=f32, precision=_HI)

  def add_layernorm(h, g, be, eps=1e-5):
    mu = jnp.mean(h, axis=-1, keepdims=True)
    var = jnp.mean((h - mu) ** 2, axis=-1, keepdims=True)
    return (h - mu) * lax.rsqrt(var + eps) * g + be

  def attend(qp, kp, vp, tag, wm, bm):
    # qp [rq, H] (already 1/sqrt(d)-scaled); kp/vp [rk, H]
    pselT, psel = C("pselT" + tag), C("psel" + tag)
    blkT, blk = C("blkT" + tag), C("blk" + tag)
    bias = C("bias" + tag)

    # Keys, packed per (batch, head, key) column; off-head hidden rows zeroed
    # so the full-HIDDEN contraction below yields per-head dot products.
    kselT = dot(kp.T, pselT) * blkT                       # [H, ncols]
    s = dot(qp, kselT) + bias                             # [rq, ncols] lane-dense
    # Row-max subtraction is exact for the per-group softmax (constant shift).
    e = jnp.exp(s - jnp.max(s, axis=-1, keepdims=True))   # masked/off-batch -> 0

    # Values in packed layout + per-head softmax denominators; normalize after
    # the value matmul (identical to normalizing the probabilities first).
    vsel = dot(psel, vp) * blk                            # [ncols, H]
    att = dot(e, vsel)                                    # [rq, H] un-normalized
    den = dot(e, blk)                                     # [rq, H] group sums
    att = att / jnp.maximum(den, jnp.finfo(f32).tiny)
    return dot(att, wm) + bm

  rx = batch * nx
  ry = batch * ny
  x2 = acts_ref[0:rx, :]                                  # [rx, H]
  y2 = acts_ref[rx:rx + ry, :]                            # [ry, H]

  # ---- block 1: self-attention over x (fused Q|K|V projection) --------------
  qkv = dot(x2, P("wqkv1")) + P("bqkv1")                  # [rx, 3H]
  a1 = attend(qkv[:, 0:HIDDEN] * scale,
              qkv[:, HIDDEN:2 * HIDDEN],
              qkv[:, 2 * HIDDEN:3 * HIDDEN],
              "1", P("wm1"), P("bm1"))
  x2 = add_layernorm(x2 + a1, P("g1"), P("b1"))

  # ---- block 2: cross-attention (q from x, fused K|V from y) ----------------
  q2 = dot(x2, P("wq2")) + P("bq2")
  kv = dot(y2, P("wkv2")) + P("bkv2")                     # [ry, 2H]
  a2 = attend(q2 * scale, kv[:, 0:HIDDEN], kv[:, HIDDEN:2 * HIDDEN],
              "2", P("wm2"), P("bm2"))
  x2 = add_layernorm(x2 + a2, P("g2"), P("b2"))

  # ---- position-wise FFN -----------------------------------------------------
  h = jnp.maximum(dot(x2, P("wf1")) + P("bf1"), 0.0)
  h = dot(h, P("wf2")) + P("bf2")
  x2 = add_layernorm(x2 + h, P("g3"), P("b3"))

  o_ref[...] = x2.astype(o_ref.dtype)


# ----------------------------- wrapper ------------------------------------------

def decoder_forward(params, x, y, x_mask, y_mask):
  batch, nx, hidden = x.shape
  ny = y.shape[1]
  assert hidden == HIDDEN
  assert (batch * nx) % 8 == 0 and (batch * ny) % 8 == 0

  m1, m2 = params["mhatt1"], params["mhatt2"]

  # One contiguous parameter slab (single DMA); fused QKV / KV weights.
  params_slab, pofs = _pack_rows([
      ("wqkv1", jnp.concatenate([m1["wq"], m1["wk"], m1["wv"]], axis=1)),
      ("bqkv1", jnp.concatenate([m1["bq"], m1["bk"], m1["bv"]], axis=1)),
      ("wm1", m1["wm"]), ("bm1", m1["bm"]),
      ("wq2", m2["wq"]), ("bq2", m2["bq"]),
      ("wkv2", jnp.concatenate([m2["wk"], m2["wv"]], axis=1)),
      ("bkv2", jnp.concatenate([m2["bk"], m2["bv"]], axis=1)),
      ("wm2", m2["wm"]), ("bm2", m2["bm"]),
      ("wf1", params["w_ffn1"]), ("bf1", params["b_ffn1"]),
      ("wf2", params["w_ffn2"]), ("bf2", params["b_ffn2"]),
      ("g1", params["g1"]), ("b1", params["b1"]),
      ("g2", params["g2"]), ("b2", params["b2"]),
      ("g3", params["g3"]), ("b3", params["b3"]),
  ])

  # One constants slab: selection / head-block matrices + additive mask biases.
  consts_slab, cofs = _pack_rows(_attn_consts("1", batch, nx, nx, x_mask)
                                 + _attn_consts("2", batch, nx, ny, y_mask))

  acts = jnp.concatenate([x.reshape(batch * nx, hidden),
                          y.reshape(batch * ny, hidden)],
                         axis=0).astype(jnp.float32)

  kernel = functools.partial(_decoder_kernel, batch=batch, nx=nx, ny=ny,
                             pofs=pofs, cofs=cofs)
  # Single grid point: total footprint is <1 MiB, so the whole forward is one
  # launch with 3 input DMAs.  (On v7x a leading batch grid axis with
  # dimension_semantics=("parallel",) would shard across both TensorCores; at
  # B=2 that is a wash against per-step overhead, so it is not used here.)
  out = pl.pallas_call(
      kernel,
      out_shape=jax.ShapeDtypeStruct((batch * nx, hidden), jnp.float32),
      in_specs=[pl.BlockSpec(memory_space=pltpu.MemorySpace.VMEM)] * 3,
      out_specs=pl.BlockSpec(memory_space=pltpu.MemorySpace.VMEM),
  )(acts, params_slab, consts_slab)
  return out.reshape(batch, nx, hidden)


# ----------------------------- pure-JAX reference -------------------------------

def _rdot(a, b):
  return jnp.dot(a, b, precision=_HI)


def _ref_mhatt(p, v_in, k_in, q_in, mask):
  b, nq, h = q_in.shape
  nk = k_in.shape[1]

  def proj(z, w, bb, n):
    return (_rdot(z.reshape(-1, h), w) + bb).reshape(b, n, HEAD, HEAD_SIZE).transpose(0, 2, 1, 3)

  vp = proj(v_in, p["wv"], p["bv"], nk)
  kp = proj(k_in, p["wk"], p["bk"], nk)
  qp = proj(q_in, p["wq"], p["bq"], nq)
  sc = jnp.einsum("bhqd,bhkd->bhqk", qp, kp, precision=_HI) / math.sqrt(HEAD_SIZE)
  sc = jnp.where(jnp.broadcast_to(mask, sc.shape), NEG_INF, sc)
  pm = jax.nn.softmax(sc, axis=-1)
  att = jnp.einsum("bhqk,bhkd->bhqd", pm, vp, precision=_HI).transpose(0, 2, 1, 3).reshape(b * nq, h)
  return (_rdot(att, p["wm"]) + p["bm"]).reshape(b, nq, h)


def _ref_ln(x, g, b, eps=1e-5):
  mu = x.mean(-1, keepdims=True)
  var = ((x - mu) ** 2).mean(-1, keepdims=True)
  return (x - mu) * jax.lax.rsqrt(var + eps) * g + b


def ref_decoder(params, x, y, x_mask, y_mask):
  x = _ref_ln(x + _ref_mhatt(params["mhatt1"], x, x, x, x_mask), params["g1"], params["b1"])
  x = _ref_ln(x + _ref_mhatt(params["mhatt2"], y, y, x, y_mask), params["g2"], params["b2"])
  f = _rdot(jnp.maximum(_rdot(x, params["w_ffn1"]) + params["b_ffn1"], 0.0),
            params["w_ffn2"]) + params["b_ffn2"]
  return _ref_ln(x + f, params["g3"], params["b3"])


# ----------------------------- parameter init ----------------------------------

def init_params(key):
  def lin_p(k, fan_in, fan_out):
    k1, k2 = jax.random.split(k)
    s = 1.0 / math.sqrt(fan_in)
    return (jax.random.uniform(k1, (fan_in, fan_out), jnp.float32, -s, s),
            jax.random.uniform(k2, (1, fan_out), jnp.float32, -s, s))

  keys = jax.random.split(key, 16)

  def mh_p(ks):
    wv, bv = lin_p(ks[0], HIDDEN, HIDDEN)
    wk, bk = lin_p(ks[1], HIDDEN, HIDDEN)
    wq, bq = lin_p(ks[2], HIDDEN, HIDDEN)
    wm, bm = lin_p(ks[3], HIDDEN, HIDDEN)
    return dict(wv=wv, bv=bv, wk=wk, bk=bk, wq=wq, bq=bq, wm=wm, bm=bm)

  w1, b1 = lin_p(keys[8], HIDDEN, HIDDEN * 2)
  w2, b2 = lin_p(keys[9], HIDDEN * 2, HIDDEN)
  return dict(
      mhatt1=mh_p(keys[0:4]),
      mhatt2=mh_p(keys[4:8]),
      w_ffn1=w1, b_ffn1=b1, w_ffn2=w2, b_ffn2=b2,
      g1=jnp.ones((1, HIDDEN), jnp.float32), b1=jnp.zeros((1, HIDDEN), jnp.float32),
      g2=jnp.ones((1, HIDDEN), jnp.float32), b2=jnp.zeros((1, HIDDEN), jnp.float32),
      g3=jnp.ones((1, HIDDEN), jnp.float32), b3=jnp.zeros((1, HIDDEN), jnp.float32),
  )


# ----------------------------- main ---------------------------------------------

if __name__ == "__main__":
  key = jax.random.PRNGKey(0)
  k_params, kx, ky = jax.random.split(key, 3)
  params = init_params(k_params)

  x = jax.random.normal(kx, (B, NX, HIDDEN), jnp.float32)
  y = jax.random.normal(ky, (B, NY, HIDDEN), jnp.float32)

  # boolean key-padding masks, broadcastable to [b, head, nq, nk]; True == masked
  x_mask = jnp.zeros((B, 1, 1, NX), jnp.bool_).at[:, :, :, -2:].set(True)
  y_mask = jnp.zeros((B, 1, 1, NY), jnp.bool_).at[:, :, :, -1:].set(True)

  fwd = jax.jit(decoder_forward)
  out = jax.block_until_ready(fwd(params, x, y, x_mask, y_mask))

  ref = ref_decoder(params, x, y, x_mask, y_mask)
  assert out.shape == (B, NX, HIDDEN)
  assert jnp.allclose(out, ref, atol=1e-3, rtol=1e-3), "mismatch vs pure-JAX reference"

  print("KERNEL_OK")
</pallas_src>

<mosaic_0001>
module attributes {stable_mosaic.version = 11 : i64} {
  func.func @_decoder_kernel(%arg0: memref<32x32xf32, #tpu.memory_space<vmem>>, %arg1: memref<360x128xf32, #tpu.memory_space<vmem>>, %arg2: memref<640x128xf32, #tpu.memory_space<vmem>>, %arg3: memref<16x32xf32, #tpu.memory_space<vmem>>) attributes {dimension_semantics = [], scalar_prefetch = 0 : i64, scratch_operands = 0 : i64, tpu.core_type = #tpu.core_type<tc>} {
    %c0 = arith.constant 0 : index
    %c0_0 = arith.constant 0 : index
    %0 = vector.load %arg0[%c0, %c0_0] : memref<32x32xf32, #tpu.memory_space<vmem>>, vector<16x32xf32>
    %c16 = arith.constant 16 : index
    %c0_1 = arith.constant 0 : index
    %1 = vector.load %arg0[%c16, %c0_1] : memref<32x32xf32, #tpu.memory_space<vmem>>, vector<16x32xf32>
    %c0_2 = arith.constant 0 : index
    %c0_3 = arith.constant 0 : index
    %2 = vector.load %arg1[%c0_2, %c0_3] : memref<360x128xf32, #tpu.memory_space<vmem>>, vector<32x96xf32>
    %cst = arith.constant dense<0.000000e+00> : vector<16x96xf32>
    %3 = tpu.matmul %0, %2, %cst {dimension_numbers = #tpu.dot_dimension_numbers<[1], [0], [0], [1], [0, 0, 1, 1], [], []>, precision = #tpu.contract_precision<fp32>} : vector<16x32xf32>, vector<32x96xf32>, vector<16x96xf32> -> vector<16x96xf32>
    %c32 = arith.constant 32 : index
    %c0_4 = arith.constant 0 : index
    %4 = vector.load %arg1[%c32, %c0_4] : memref<360x128xf32, #tpu.memory_space<vmem>>, vector<1x96xf32>
    %5 = vector.broadcast %4 : vector<1x96xf32> to vector<16x96xf32>
    %6 = arith.addf %3, %5 : vector<16x96xf32>
    %7 = vector.extract_strided_slice %6 {offsets = [0, 0], sizes = [16, 32], strides = [1, 1]} : vector<16x96xf32> to vector<16x32xf32>
    %cst_5 = arith.constant 5.000000e-01 : f32
    %8 = vector.broadcast %cst_5 : f32 to vector<16x32xf32>
    %9 = arith.mulf %7, %8 : vector<16x32xf32>
    %10 = vector.extract_strided_slice %6 {offsets = [0, 32], sizes = [16, 32], strides = [1, 1]} : vector<16x96xf32> to vector<16x32xf32>
    %11 = vector.extract_strided_slice %6 {offsets = [0, 64], sizes = [16, 32], strides = [1, 1]} : vector<16x96xf32> to vector<16x32xf32>
    %c40 = arith.constant 40 : index
    %c0_6 = arith.constant 0 : index
    %12 = vector.load %arg1[%c40, %c0_6] : memref<360x128xf32, #tpu.memory_space<vmem>>, vector<32x32xf32>
    %c72 = arith.constant 72 : index
    %c0_7 = arith.constant 0 : index
    %13 = vector.load %arg1[%c72, %c0_7] : memref<360x128xf32, #tpu.memory_space<vmem>>, vector<1x32xf32>
    %c128 = arith.constant 128 : index
    %c0_8 = arith.constant 0 : index
    %14 = vector.load %arg2[%c128, %c0_8] : memref<640x128xf32, #tpu.memory_space<vmem>>, vector<16x128xf32>
    %c0_9 = arith.constant 0 : index
    %c0_10 = arith.constant 0 : index
    %15 = vector.load %arg2[%c0_9, %c0_10] : memref<640x128xf32, #tpu.memory_space<vmem>>, vector<128x16xf32>
    %c272 = arith.constant 272 : index
    %c0_11 = arith.constant 0 : index
    %16 = vector.load %arg2[%c272, %c0_11] : memref<640x128xf32, #tpu.memory_space<vmem>>, vector<32x128xf32>
    %c144 = arith.constant 144 : index
    %c0_12 = arith.constant 0 : index
    %17 = vector.load %arg2[%c144, %c0_12] : memref<640x128xf32, #tpu.memory_space<vmem>>, vector<128x32xf32>
    %c304 = arith.constant 304 : index
    %c0_13 = arith.constant 0 : index
    %18 = vector.load %arg2[%c304, %c0_13] : memref<640x128xf32, #tpu.memory_space<vmem>>, vector<16x128xf32>
    %19 = tpu.transpose %10, [1, 0] : vector<16x32xf32> -> vector<32x16xf32>
    %cst_14 = arith.constant dense<0.000000e+00> : vector<32x128xf32>
    %20 = tpu.matmul %19, %14, %cst_14 {dimension_numbers = #tpu.dot_dimension_numbers<[1], [0], [0], [1], [0, 0, 1, 1], [], []>, precision = #tpu.contract_precision<fp32>} : vector<32x16xf32>, vector<16x128xf32>, vector<32x128xf32> -> vector<32x128xf32>
    %21 = arith.mulf %20, %16 : vector<32x128xf32>
    %cst_15 = arith.constant dense<0.000000e+00> : vector<16x128xf32>
    %22 = tpu.matmul %9, %21, %cst_15 {dimension_numbers = #tpu.dot_dimension_numbers<[1], [0], [0], [1], [0, 0, 1, 1], [], []>, precision = #tpu.contract_precision<fp32>} : vector<16x32xf32>, vector<32x128xf32>, vector<16x128xf32> -> vector<16x128xf32>
    %23 = arith.addf %22, %18 : vector<16x128xf32>
    %cst_16 = arith.constant dense<0xFF800000> : vector<16xf32>
    %24 = vector.multi_reduction <maximumf>, %23, %cst_16 [1] : vector<16x128xf32> to vector<16xf32>
    %25 = vector.shape_cast %24 : vector<16xf32> to vector<16x1xf32>
    %26 = vector.broadcast %25 : vector<16x1xf32> to vector<16x128xf32>
    %27 = arith.subf %23, %26 : vector<16x128xf32>
    %28 = math.exp %27 : vector<16x128xf32>
    %cst_17 = arith.constant dense<0.000000e+00> : vector<128x32xf32>
    %29 = tpu.matmul %15, %11, %cst_17 {dimension_numbers = #tpu.dot_dimension_numbers<[1], [0], [0], [1], [0, 0, 1, 1], [], []>, precision = #tpu.contract_precision<fp32>} : vector<128x16xf32>, vector<16x32xf32>, vector<128x32xf32> -> vector<128x32xf32>
    %30 = arith.mulf %29, %17 : vector<128x32xf32>
    %cst_18 = arith.constant dense<0.000000e+00> : vector<16x32xf32>
    %31 = tpu.matmul %28, %30, %cst_18 {dimension_numbers = #tpu.dot_dimension_numbers<[1], [0], [0], [1], [0, 0, 1, 1], [], []>, precision = #tpu.contract_precision<fp32>} : vector<16x128xf32>, vector<128x32xf32>, vector<16x32xf32> -> vector<16x32xf32>
    %cst_19 = arith.constant dense<0.000000e+00> : vector<16x32xf32>
    %32 = tpu.matmul %28, %17, %cst_19 {dimension_numbers = #tpu.dot_dimension_numbers<[1], [0], [0], [1], [0, 0, 1, 1], [], []>, precision = #tpu.contract_precision<fp32>} : vector<16x128xf32>, vector<128x32xf32>, vector<16x32xf32> -> vector<16x32xf32>
    %cst_20 = arith.constant 1.17549435E-38 : f32
    %33 = vector.broadcast %cst_20 : f32 to vector<16x32xf32>
    %34 = arith.maximumf %32, %33 : vector<16x32xf32>
    %35 = arith.divf %31, %34 : vector<16x32xf32>
    %cst_21 = arith.constant dense<0.000000e+00> : vector<16x32xf32>
    %36 = tpu.matmul %35, %12, %cst_21 {dimension_numbers = #tpu.dot_dimension_numbers<[1], [0], [0], [1], [0, 0, 1, 1], [], []>, precision = #tpu.contract_precision<fp32>} : vector<16x32xf32>, vector<32x32xf32>, vector<16x32xf32> -> vector<16x32xf32>
    %37 = vector.broadcast %13 : vector<1x32xf32> to vector<16x32xf32>
    %38 = arith.addf %36, %37 : vector<16x32xf32>
    %39 = arith.addf %0, %38 : vector<16x32xf32>
    %c312 = arith.constant 312 : index
    %c0_22 = arith.constant 0 : index
    %40 = vector.load %arg1[%c312, %c0_22] : memref<360x128xf32, #tpu.memory_space<vmem>>, vector<1x32xf32>
    %c320 = arith.constant 320 : index
    %c0_23 = arith.constant 0 : index
    %41 = vector.load %arg1[%c320, %c0_23] : memref<360x128xf32, #tpu.memory_space<vmem>>, vector<1x32xf32>
    %cst_24 = arith.constant dense<0.000000e+00> : vector<16xf32>
    %42 = vector.multi_reduction <add>, %39, %cst_24 [1] : vector<16x32xf32> to vector<16xf32>
    %43 = vector.shape_cast %42 : vector<16xf32> to vector<16x1xf32>
    %cst_25 = arith.constant 3.200000e+01 : f32
    %44 = vector.broadcast %cst_25 : f32 to vector<16x1xf32>
    %45 = arith.divf %43, %44 : vector<16x1xf32>
    %46 = vector.broadcast %45 : vector<16x1xf32> to vector<16x32xf32>
    %47 = arith.subf %39, %46 : vector<16x32xf32>
    %48 = arith.mulf %47, %47 : vector<16x32xf32>
    %cst_26 = arith.constant dense<0.000000e+00> : vector<16xf32>
    %49 = vector.multi_reduction <add>, %48, %cst_26 [1] : vector<16x32xf32> to vector<16xf32>
    %50 = vector.shape_cast %49 : vector<16xf32> to vector<16x1xf32>
    %cst_27 = arith.constant 3.200000e+01 : f32
    %51 = vector.broadcast %cst_27 : f32 to vector<16x1xf32>
    %52 = arith.divf %50, %51 : vector<16x1xf32>
    %53 = vector.broadcast %45 : vector<16x1xf32> to vector<16x32xf32>
    %54 = arith.subf %39, %53 : vector<16x32xf32>
    %cst_28 = arith.constant 9.99999974E-6 : f32
    %55 = vector.broadcast %cst_28 : f32 to vector<16x1xf32>
    %56 = arith.addf %52, %55 : vector<16x1xf32>
    %57 = math.rsqrt %56 : vector<16x1xf32>
    %58 = vector.broadcast %57 : vector<16x1xf32> to vector<16x32xf32>
    %59 = arith.mulf %54, %58 : vector<16x32xf32>
    %60 = vector.broadcast %40 : vector<1x32xf32> to vector<16x32xf32>
    %61 = arith.mulf %59, %60 : vector<16x32xf32>
    %62 = vector.broadcast %41 : vector<1x32xf32> to vector<16x32xf32>
    %63 = arith.addf %61, %62 : vector<16x32xf32>
    %c80 = arith.constant 80 : index
    %c0_29 = arith.constant 0 : index
    %64 = vector.load %arg1[%c80, %c0_29] : memref<360x128xf32, #tpu.memory_space<vmem>>, vector<32x32xf32>
    %cst_30 = arith.constant dense<0.000000e+00> : vector<16x32xf32>
    %65 = tpu.matmul %63, %64, %cst_30 {dimension_numbers = #tpu.dot_dimension_numbers<[1], [0], [0], [1], [0, 0, 1, 1], [], []>, precision = #tpu.contract_precision<fp32>} : vector<16x32xf32>, vector<32x32xf32>, vector<16x32xf32> -> vector<16x32xf32>
    %c112 = arith.constant 112 : index
    %c0_31 = arith.constant 0 : index
    %66 = vector.load %arg1[%c112, %c0_31] : memref<360x128xf32, #tpu.memory_space<vmem>>, vector<1x32xf32>
    %67 = vector.broadcast %66 : vector<1x32xf32> to vector<16x32xf32>
    %68 = arith.addf %65, %67 : vector<16x32xf32>
    %c120 = arith.constant 120 : index
    %c0_32 = arith.constant 0 : index
    %69 = vector.load %arg1[%c120, %c0_32] : memref<360x128xf32, #tpu.memory_space<vmem>>, vector<32x64xf32>
    %cst_33 = arith.constant dense<0.000000e+00> : vector<16x64xf32>
    %70 = tpu.matmul %1, %69, %cst_33 {dimension_numbers = #tpu.dot_dimension_numbers<[1], [0], [0], [1], [0, 0, 1, 1], [], []>, precision = #tpu.contract_precision<fp32>} : vector<16x32xf32>, vector<32x64xf32>, vector<16x64xf32> -> vector<16x64xf32>
    %c152 = arith.constant 152 : index
    %c0_34 = arith.constant 0 : index
    %71 = vector.load %arg1[%c152, %c0_34] : memref<360x128xf32, #tpu.memory_space<vmem>>, vector<1x64xf32>
    %72 = vector.broadcast %71 : vector<1x64xf32> to vector<16x64xf32>
    %73 = arith.addf %70, %72 : vector<16x64xf32>
    %cst_35 = arith.constant 5.000000e-01 : f32
    %74 = vector.broadcast %cst_35 : f32 to vector<16x32xf32>
    %75 = arith.mulf %68, %74 : vector<16x32xf32>
    %76 = vector.extract_strided_slice %73 {offsets = [0, 0], sizes = [16, 32], strides = [1, 1]} : vector<16x64xf32> to vector<16x32xf32>
    %77 = vector.extract_strided_slice %73 {offsets = [0, 32], sizes = [16, 32], strides = [1, 1]} : vector<16x64xf32> to vector<16x32xf32>
    %c160 = arith.constant 160 : index
    %c0_36 = arith.constant 0 : index
    %78 = vector.load %arg1[%c160, %c0_36] : memref<360x128xf32, #tpu.memory_space<vmem>>, vector<32x32xf32>
    %c192 = arith.constant 192 : index
    %c0_37 = arith.constant 0 : index
    %79 = vector.load %arg1[%c192, %c0_37] : memref<360x128xf32, #tpu.memory_space<vmem>>, vector<1x32xf32>
    %c448 = arith.constant 448 : index
    %c0_38 = arith.constant 0 : index
    %80 = vector.load %arg2[%c448, %c0_38] : memref<640x128xf32, #tpu.memory_space<vmem>>, vector<16x128xf32>
    %c320_39 = arith.constant 320 : index
    %c0_40 = arith.constant 0 : index
    %81 = vector.load %arg2[%c320_39, %c0_40] : memref<640x128xf32, #tpu.memory_space<vmem>>, vector<128x16xf32>
    %c592 = arith.constant 592 : index
    %c0_41 = arith.constant 0 : index
    %82 = vector.load %arg2[%c592, %c0_41] : memref<640x128xf32, #tpu.memory_space<vmem>>, vector<32x128xf32>
    %c464 = arith.constant 464 : index
    %c0_42 = arith.constant 0 : index
    %83 = vector.load %arg2[%c464, %c0_42] : memref<640x128xf32, #tpu.memory_space<vmem>>, vector<128x32xf32>
    %c624 = arith.constant 624 : index
    %c0_43 = arith.constant 0 : index
    %84 = vector.load %arg2[%c624, %c0_43] : memref<640x128xf32, #tpu.memory_space<vmem>>, vector<16x128xf32>
    %85 = tpu.transpose %76, [1, 0] : vector<16x32xf32> -> vector<32x16xf32>
    %cst_44 = arith.constant dense<0.000000e+00> : vector<32x128xf32>
    %86 = tpu.matmul %85, %80, %cst_44 {dimension_numbers = #tpu.dot_dimension_numbers<[1], [0], [0], [1], [0, 0, 1, 1], [], []>, precision = #tpu.contract_precision<fp32>} : vector<32x16xf32>, vector<16x128xf32>, vector<32x128xf32> -> vector<32x128xf32>
    %87 = arith.mulf %86, %82 : vector<32x128xf32>
    %cst_45 = arith.constant dense<0.000000e+00> : vector<16x128xf32>
    %88 = tpu.matmul %75, %87, %cst_45 {dimension_numbers = #tpu.dot_dimension_numbers<[1], [0], [0], [1], [0, 0, 1, 1], [], []>, precision = #tpu.contract_precision<fp32>} : vector<16x32xf32>, vector<32x128xf32>, vector<16x128xf32> -> vector<16x128xf32>
    %89 = arith.addf %88, %84 : vector<16x128xf32>
    %cst_46 = arith.constant dense<0xFF800000> : vector<16xf32>
    %90 = vector.multi_reduction <maximumf>, %89, %cst_46 [1] : vector<16x128xf32> to vector<16xf32>
    %91 = vector.shape_cast %90 : vector<16xf32> to vector<16x1xf32>
    %92 = vector.broadcast %91 : vector<16x1xf32> to vector<16x128xf32>
    %93 = arith.subf %89, %92 : vector<16x128xf32>
    %94 = math.exp %93 : vector<16x128xf32>
    %cst_47 = arith.constant dense<0.000000e+00> : vector<128x32xf32>
    %95 = tpu.matmul %81, %77, %cst_47 {dimension_numbers = #tpu.dot_dimension_numbers<[1], [0], [0], [1], [0, 0, 1, 1], [], []>, precision = #tpu.contract_precision<fp32>} : vector<128x16xf32>, vector<16x32xf32>, vector<128x32xf32> -> vector<128x32xf32>
    %96 = arith.mulf %95, %83 : vector<128x32xf32>
    %cst_48 = arith.constant dense<0.000000e+00> : vector<16x32xf32>
    %97 = tpu.matmul %94, %96, %cst_48 {dimension_numbers = #tpu.dot_dimension_numbers<[1], [0], [0], [1], [0, 0, 1, 1], [], []>, precision = #tpu.contract_precision<fp32>} : vector<16x128xf32>, vector<128x32xf32>, vector<16x32xf32> -> vector<16x32xf32>
    %cst_49 = arith.constant dense<0.000000e+00> : vector<16x32xf32>
    %98 = tpu.matmul %94, %83, %cst_49 {dimension_numbers = #tpu.dot_dimension_numbers<[1], [0], [0], [1], [0, 0, 1, 1], [], []>, precision = #tpu.contract_precision<fp32>} : vector<16x128xf32>, vector<128x32xf32>, vector<16x32xf32> -> vector<16x32xf32>
    %cst_50 = arith.constant 1.17549435E-38 : f32
    %99 = vector.broadcast %cst_50 : f32 to vector<16x32xf32>
    %100 = arith.maximumf %98, %99 : vector<16x32xf32>
    %101 = arith.divf %97, %100 : vector<16x32xf32>
    %cst_51 = arith.constant dense<0.000000e+00> : vector<16x32xf32>
    %102 = tpu.matmul %101, %78, %cst_51 {dimension_numbers = #tpu.dot_dimension_numbers<[1], [0], [0], [1], [0, 0, 1, 1], [], []>, precision = #tpu.contract_precision<fp32>} : vector<16x32xf32>, vector<32x32xf32>, vector<16x32xf32> -> vector<16x32xf32>
    %103 = vector.broadcast %79 : vector<1x32xf32> to vector<16x32xf32>
    %104 = arith.addf %102, %103 : vector<16x32xf32>
    %105 = arith.addf %63, %104 : vector<16x32xf32>
    %c328 = arith.constant 328 : index
    %c0_52 = arith.constant 0 : index
    %106 = vector.load %arg1[%c328, %c0_52] : memref<360x128xf32, #tpu.memory_space<vmem>>, vector<1x32xf32>
    %c336 = arith.constant 336 : index
    %c0_53 = arith.constant 0 : index
    %107 = vector.load %arg1[%c336, %c0_53] : memref<360x128xf32, #tpu.memory_space<vmem>>, vector<1x32xf32>
    %cst_54 = arith.constant dense<0.000000e+00> : vector<16xf32>
    %108 = vector.multi_reduction <add>, %105, %cst_54 [1] : vector<16x32xf32> to vector<16xf32>
    %109 = vector.shape_cast %108 : vector<16xf32> to vector<16x1xf32>
    %cst_55 = arith.constant 3.200000e+01 : f32
    %110 = vector.broadcast %cst_55 : f32 to vector<16x1xf32>
    %111 = arith.divf %109, %110 : vector<16x1xf32>
    %112 = vector.broadcast %111 : vector<16x1xf32> to vector<16x32xf32>
    %113 = arith.subf %105, %112 : vector<16x32xf32>
    %114 = arith.mulf %113, %113 : vector<16x32xf32>
    %cst_56 = arith.constant dense<0.000000e+00> : vector<16xf32>
    %115 = vector.multi_reduction <add>, %114, %cst_56 [1] : vector<16x32xf32> to vector<16xf32>
    %116 = vector.shape_cast %115 : vector<16xf32> to vector<16x1xf32>
    %cst_57 = arith.constant 3.200000e+01 : f32
    %117 = vector.broadcast %cst_57 : f32 to vector<16x1xf32>
    %118 = arith.divf %116, %117 : vector<16x1xf32>
    %119 = vector.broadcast %111 : vector<16x1xf32> to vector<16x32xf32>
    %120 = arith.subf %105, %119 : vector<16x32xf32>
    %cst_58 = arith.constant 9.99999974E-6 : f32
    %121 = vector.broadcast %cst_58 : f32 to vector<16x1xf32>
    %122 = arith.addf %118, %121 : vector<16x1xf32>
    %123 = math.rsqrt %122 : vector<16x1xf32>
    %124 = vector.broadcast %123 : vector<16x1xf32> to vector<16x32xf32>
    %125 = arith.mulf %120, %124 : vector<16x32xf32>
    %126 = vector.broadcast %106 : vector<1x32xf32> to vector<16x32xf32>
    %127 = arith.mulf %125, %126 : vector<16x32xf32>
    %128 = vector.broadcast %107 : vector<1x32xf32> to vector<16x32xf32>
    %129 = arith.addf %127, %128 : vector<16x32xf32>
    %c200 = arith.constant 200 : index
    %c0_59 = arith.constant 0 : index
    %130 = vector.load %arg1[%c200, %c0_59] : memref<360x128xf32, #tpu.memory_space<vmem>>, vector<32x64xf32>
    %cst_60 = arith.constant dense<0.000000e+00> : vector<16x64xf32>
    %131 = tpu.matmul %129, %130, %cst_60 {dimension_numbers = #tpu.dot_dimension_numbers<[1], [0], [0], [1], [0, 0, 1, 1], [], []>, precision = #tpu.contract_precision<fp32>} : vector<16x32xf32>, vector<32x64xf32>, vector<16x64xf32> -> vector<16x64xf32>
    %c232 = arith.constant 232 : index
    %c0_61 = arith.constant 0 : index
    %132 = vector.load %arg1[%c232, %c0_61] : memref<360x128xf32, #tpu.memory_space<vmem>>, vector<1x64xf32>
    %133 = vector.broadcast %132 : vector<1x64xf32> to vector<16x64xf32>
    %134 = arith.addf %131, %133 : vector<16x64xf32>
    %cst_62 = arith.constant 0.000000e+00 : f32
    %135 = vector.broadcast %cst_62 : f32 to vector<16x64xf32>
    %136 = arith.maximumf %134, %135 : vector<16x64xf32>
    %c240 = arith.constant 240 : index
    %c0_63 = arith.constant 0 : index
    %137 = vector.load %arg1[%c240, %c0_63] : memref<360x128xf32, #tpu.memory_space<vmem>>, vector<64x32xf32>
    %cst_64 = arith.constant dense<0.000000e+00> : vector<16x32xf32>
    %138 = tpu.matmul %136, %137, %cst_64 {dimension_numbers = #tpu.dot_dimension_numbers<[1], [0], [0], [1], [0, 0, 1, 1], [], []>, precision = #tpu.contract_precision<fp32>} : vector<16x64xf32>, vector<64x32xf32>, vector<16x32xf32> -> vector<16x32xf32>
    %c304_65 = arith.constant 304 : index
    %c0_66 = arith.constant 0 : index
    %139 = vector.load %arg1[%c304_65, %c0_66] : memref<360x128xf32, #tpu.memory_space<vmem>>, vector<1x32xf32>
    %140 = vector.broadcast %139 : vector<1x32xf32> to vector<16x32xf32>
    %141 = arith.addf %138, %140 : vector<16x32xf32>
    %142 = arith.addf %129, %141 : vector<16x32xf32>
    %c344 = arith.constant 344 : index
    %c0_67 = arith.constant 0 : index
    %143 = vector.load %arg1[%c344, %c0_67] : memref<360x128xf32, #tpu.memory_space<vmem>>, vector<1x32xf32>
    %c352 = arith.constant 352 : index
    %c0_68 = arith.constant 0 : index
    %144 = vector.load %arg1[%c352, %c0_68] : memref<360x128xf32, #tpu.memory_space<vmem>>, vector<1x32xf32>
    %cst_69 = arith.constant dense<0.000000e+00> : vector<16xf32>
    %145 = vector.multi_reduction <add>, %142, %cst_69 [1] : vector<16x32xf32> to vector<16xf32>
    %146 = vector.shape_cast %145 : vector<16xf32> to vector<16x1xf32>
    %cst_70 = arith.constant 3.200000e+01 : f32
    %147 = vector.broadcast %cst_70 : f32 to vector<16x1xf32>
    %148 = arith.divf %146, %147 : vector<16x1xf32>
    %149 = vector.broadcast %148 : vector<16x1xf32> to vector<16x32xf32>
    %150 = arith.subf %142, %149 : vector<16x32xf32>
    %151 = arith.mulf %150, %150 : vector<16x32xf32>
    %cst_71 = arith.constant dense<0.000000e+00> : vector<16xf32>
    %152 = vector.multi_reduction <add>, %151, %cst_71 [1] : vector<16x32xf32> to vector<16xf32>
    %153 = vector.shape_cast %152 : vector<16xf32> to vector<16x1xf32>
    %cst_72 = arith.constant 3.200000e+01 : f32
    %154 = vector.broadcast %cst_72 : f32 to vector<16x1xf32>
    %155 = arith.divf %153, %154 : vector<16x1xf32>
    %156 = vector.broadcast %148 : vector<16x1xf32> to vector<16x32xf32>
    %157 = arith.subf %142, %156 : vector<16x32xf32>
    %cst_73 = arith.constant 9.99999974E-6 : f32
    %158 = vector.broadcast %cst_73 : f32 to vector<16x1xf32>
    %159 = arith.addf %155, %158 : vector<16x1xf32>
    %160 = math.rsqrt %159 : vector<16x1xf32>
    %161 = vector.broadcast %160 : vector<16x1xf32> to vector<16x32xf32>
    %162 = arith.mulf %157, %161 : vector<16x32xf32>
    %163 = vector.broadcast %143 : vector<1x32xf32> to vector<16x32xf32>
    %164 = arith.mulf %162, %163 : vector<16x32xf32>
    %165 = vector.broadcast %144 : vector<1x32xf32> to vector<16x32xf32>
    %166 = arith.addf %164, %165 : vector<16x32xf32>
    %c0_74 = arith.constant 0 : index
    %c0_75 = arith.constant 0 : index
    %167 = vector.load %arg3[%c0_74, %c0_75] : memref<16x32xf32, #tpu.memory_space<vmem>>, vector<16x32xf32>
    tpu.vector_store %arg3[%c0_74, %c0_75], %166 {strides = array<i32>} : memref<16x32xf32, #tpu.memory_space<vmem>>, vector<16x32xf32>,
    return
  }
}

</mosaic_0001>

<bundles_post_ra>
// kernel: decoder_forward.1
= control target key start
LH: loop header
LB: loop body
LE: loop exit
PB: predicated region body
PF: predicated region fallthrough
CT: control target
= control target key end

     0   :  { %vm28_vm0 = vcmask 261120   ;;  %s18462_s0 = inlined_call_operand.vmem [shape: f32[32,32], index: 0, kind: input, shape index: {}]   ;;  %s18463_s1 = inlined_call_operand.vmem [shape: f32[360,128], index: 1, kind: input, shape index: {}]   ;;  %s18464_s2 = inlined_call_operand.vmem [shape: f32[640,128], index: 2, kind: input, shape index: {}]   ;;  %s18465_s3 = inlined_call_operand.hbm [shape: f32[16,32], index: 3, kind: output, shape index: {}]  }
   0x1   :  { %v22_v0 = vld [vmem:[%s18463_s1 + $0x18] sm:$0xff]  ;;  %v21_v1 = vld [vmem:[%s18463_s1 + $0x10] sm:$0xff]  ;;  %v20_v2 = vld [vmem:[%s18463_s1 + $0x8] sm:$0xff] }
   0x2   :  { %v14687_v3 = vand.u32 4294901760, %v22_v0  ;;  %v14689_v4 = vand.u32 4294901760, %v21_v1  ;;  %v14691_v5 = vand.u32 4294901760, %v20_v2  ;;  %v19_v6 = vld [vmem:[%s18463_s1] sm:$0xff]  ;;  %v16_v8 = vld [vmem:[%s18462_s0 + $0x8] sm:$0xff] }
   0x3   :  { %v15_v7 = vld [vmem:[%s18462_s0] sm:$0xff]  ;;  %v14702_v9 = vand.u32 4294901760, %v19_v6  ;;  %v33_v11 = vsel %vm28_vm0, %v16_v8, 0 }
   0x4   :  { %v30_v10 = vsel %vm28_vm0, %v15_v7, 0 }
   0x5   :  { %8 = vsyncpa [#allocation3], 0  ;;  %12657 = vmatprep.subr.mxu0 %v14687_v3  ;;  %v150_v12 = vsub.f32 %v22_v0, %v14687_v3  ;;  %v14708_v13 = vand.u32 4294901760, %v30_v10  ;;  %v157_v14 = vsub.f32 %v21_v1, %v14689_v4  ;;  %v14711_v15 = vand.u32 4294901760, %v33_v11  ;;  %v11576_v39 = vld [vmem:[%s18463_s1 + $0x20] ss:$0 sm:$0xff] }
   0x6   :  { %12658 = vmatpush3.msra.mxu0 %v14687_v3  ;;  %v164_v16 = vsub.f32 %v20_v2, %v14691_v5  ;;  %v171_v17 = vsub.f32 %v19_v6, %v14702_v9  ;;  %s14653_s26 = smov 96   ;;  %s14654_s27 = smov 64   ;;  %v571_v63 = vld [vmem:[%s18464_s2 + $0x88] sm:$0xff]  ;;  %v570_v1 = vld [vmem:[%s18464_s2 + $0x80] sm:$0xff]  ;;  %vm650_vm1 = vcmask 130048   ;;  %vm10929_vm2 = vcmask 523264  }
   0x7   :  { %12659 = vmatprep.subr.mxu0 %v14689_v4  ;;  %v151_v18 = vand.u32 4294901760, %v150_v12  ;;  %v105_v19 = vsub.f32 %v30_v10, %v14708_v13  ;;  %v158_v20 = vand.u32 4294901760, %v157_v14  ;;  %v115_v21 = vsub.f32 %v33_v11, %v14711_v15  ;;  %12676 = vmatprep.mubr.f32.mxu1 %v14708_v13  ;;  %s14655_s30 = smov [#allocation2]  }
   0x8   :  { %12660 = vmatpush3.msra.mxu0 %v14689_v4  ;;  %v165_v22 = vand.u32 4294901760, %v164_v16  ;;  %v172_v23 = vand.u32 4294901760, %v171_v17  ;;  %v14761_v0 = vand.u32 4294901760, %v571_v63  ;;  %s11565_s4 = sshll.u32 %s14655_s30, 4  ;;  %s11566_s4 = int_to_ptr.vmem [resolvable:$true] %s11565_s4 }
   0x9   :  { %12661 = vmatprep.subr.mxu0 %v14691_v5  ;;  %v152_v24 = vsub.f32 %v150_v12, %v151_v18  ;;  %v106_v25 = vand.u32 4294901760, %v105_v19  ;;  %v159_v26 = vsub.f32 %v157_v14, %v158_v20  ;;  %v116_v27 = vand.u32 4294901760, %v115_v21  ;;  %s14631_s5 = scalar_lea.vmem %s11566_s4, 256  ;;  %p14636_p1 = scmp.lt.s32.totalorder %s11566_s4, %s11566_s4 }
   0xa   :  { %12662 = vmatpush3.msra.mxu0 %v14691_v5  ;;  %v166_v28 = vsub.f32 %v164_v16, %v165_v22  ;;  %v173_v29 = vsub.f32 %v171_v17, %v172_v23  ;;  %v800_v2 = vsub.f32 %v571_v63, %v14761_v0  ;;  %p14632_p0 = scmp.ne.s32.totalorder %s11566_s4, %s14631_s5  ;;  %p14637_p2 = scmp.lt.s32.totalorder %s14631_s5, %s14631_s5 }
   0xb   :  { %12663 = vmatprep.subr.mxu0 %v14702_v9  ;;  %v153_v30 = vand.u32 4294901760, %v152_v24  ;;  %v107_v31 = vsub.f32 %v105_v19, %v106_v25  ;;  %v160_v32 = vand.u32 4294901760, %v159_v26  ;;  %v117_v33 = vsub.f32 %v115_v21, %v116_v27 }
   0xc   :  { %12664 = vmatpush3.msra.mxu0 %v14702_v9  ;;  %v167_v36 = vand.u32 4294901760, %v166_v28  ;;  %v174_v37 = vand.u32 4294901760, %v173_v29  ;;  %p14638_p3 = por %p14637_p2, %p14636_p1 }
   0xd   :  { %12668 = vmatprep.subr.mxu1 %v153_v30  ;;  %v108_v34 = vand.u32 4294901760, %v107_v31  ;;  %12679 = vmatprep.subr.mxu0 %v150_v12  ;;  %v118_v35 = vand.u32 4294901760, %v117_v33 }
   0xe   :  { %12669 = vmatpush3.msra.mxu1 %v153_v30  ;;  %p14639_p4 = pnand %p14638_p3, %p14632_p0 }
   0xf   :  { %12665 = vmatprep.mubr.f32.mxu0 %v108_v34  ;;  %12670 = vmatprep.subr.mxu1 %v160_v32 }
  0x10   :  { %12666 = vmatmul.mubr.f32.vlgmr.msra.gmra.mxu0 %v118_v35  ;;  %12671 = vmatpush3.msra.mxu1 %v160_v32 }
  0x11   :  { %12680 = vmatpush3.msra.mxu0 %v150_v12  ;;  %12672 = vmatprep.subr.mxu1 %v167_v36 }
  0x12   :  { %12681 = vmatprep.subr.mxu0 %v157_v14  ;;  %12673 = vmatpush3.msra.mxu1 %v167_v36 }
  0x13   :  { %12682 = vmatpush3.msra.mxu0 %v157_v14  ;;  %12674 = vmatprep.subr.mxu1 %v174_v37 }
  0x14   :  { %12683 = vmatprep.subr.mxu0 %v164_v16  ;;  %12675 = vmatpush3.msra.mxu1 %v174_v37 }
  0x15   :  { %12684 = vmatpush3.msra.mxu0 %v164_v16  ;;  %12677 = vmatmul.mubr.f32.vlgmr.msra.gmra.mxu1 %v14711_v15 }
  0x16   :  { %12685 = vmatprep.subr.mxu0 %v171_v17  ;;  %12690 = vmatprep.subr.mxu1 %v14687_v3 }
  0x17   :  { %12686 = vmatpush3.msra.mxu0 %v171_v17  ;;  %12687 = vmatprep.mubr.f32.mxu0 %v105_v19 }
  0x18   :  { %12691 = vmatpush3.msra.mxu1 %v14687_v3  ;;  %12688 = vmatmul.mubr.f32.vlgmr.msra.gmra.mxu0 %v115_v21 }
  0x19   :  { %12692 = vmatprep.subr.mxu1 %v14689_v4  ;;  %12701 = vmatprep.subr.mxu0 %v151_v18 }
  0x1a   :  { %12693 = vmatpush3.msra.mxu1 %v14689_v4  ;;  %12702 = vmatpush3.msra.mxu0 %v151_v18 }
  0x1b   :  { %12694 = vmatprep.subr.mxu1 %v14691_v5  ;;  %12703 = vmatprep.subr.mxu0 %v158_v20 }
  0x1c   :  { %12695 = vmatpush3.msra.mxu1 %v14691_v5  ;;  %12704 = vmatpush3.msra.mxu0 %v158_v20 }
  0x1d   :  { %12696 = vmatprep.subr.mxu1 %v14702_v9  ;;  %12705 = vmatprep.subr.mxu0 %v165_v22 }
  0x1e   :  { %12697 = vmatpush3.msra.mxu1 %v14702_v9  ;;  %12698 = vmatprep.mubr.f32.mxu1 %v106_v25 }
  0x1f   :  { %12706 = vmatpush3.msra.mxu0 %v165_v22  ;;  %12699 = vmatmul.mubr.f32.vlgmr.msra.gmra.mxu1 %v116_v27 }
  0x20   :  { %12707 = vmatprep.subr.mxu0 %v172_v23  ;;  %12712 = vmatprep.subr.mxu1 %v14687_v3 }
  0x21   :  { %12708 = vmatpush3.msra.mxu0 %v172_v23  ;;  %12709 = vmatprep.mubr.f32.mxu0 %v14708_v13 }
  0x22   :  { %12713 = vmatpush3.msra.mxu1 %v14687_v3  ;;  %12710 = vmatmul.mubr.f32.vlgmr.msra.gmra.mxu0 %v14711_v15  ;;  %v14767_v3 = vand.u32 4294901760, %v570_v1 }
  0x23   :  { %12714 = vmatprep.subr.mxu1 %v14689_v4  ;;  %12720 = vmatprep.mubr.f32.mxu1 %v14708_v13 }
  0x24   :  { %12715 = vmatpush3.msra.mxu1 %v14689_v4  ;;  %12723 = vmatprep.subr.mxu0 %v14761_v0  ;;  %v14771_v4 = vand.u32 4294901760, %v800_v2 }
  0x25   :  { %12716 = vmatprep.subr.mxu1 %v14691_v5  ;;  %12724 = vmatpush3.msra.mxu0 %v14761_v0 }
  0x26   :  { %12717 = vmatpush3.msra.mxu1 %v14691_v5  ;;  %v807_v5 = vsub.f32 %v570_v1, %v14767_v3  ;;  %12725 = vmatprep.subr.mxu0 %v14767_v3  ;;  %v802_v6 = vsub.f32 %v800_v2, %v14771_v4 }
  0x27   :  { %12718 = vmatprep.subr.mxu1 %v14702_v9  ;;  %12726 = vmatpush3.msra.mxu0 %v14767_v3 }
  0x28   :  { %12719 = vmatpush3.msra.mxu1 %v14702_v9  ;;  %v14777_v7 = vand.u32 4294901760, %v807_v5  ;;  %12743 = vmatprep.subr.mxu0 %v800_v2  ;;  %v803_v8 = vand.u32 4294901760, %v802_v6 }
  0x29   :  { %12721 = vmatmul.mubr.f32.vlgmr.msra.gmra.mxu1 %v14711_v15 }
  0x2a   :  { %v809_v9 = vsub.f32 %v807_v5, %v14777_v7  ;;  %12733 = vmatprep.subr.mxu1 %v803_v8 }
  0x2b   :  { %12734 = vmatpush3.msra.mxu1 %v803_v8 }
  0x2c   :  { %v810_v11 = vand.u32 4294901760, %v809_v9 }
  0x2e   :  { %12735 = vmatprep.subr.mxu1 %v810_v11 }
  0x2f   :  { %12736 = vmatpush3.msra.mxu1 %v810_v11 }
  0x30   :  { %12753 = vmatprep.subr.mxu1 %v14761_v0 }
  0xd0   :  { %v12667_v38 = vpop.f32.mrf.mxu0 }
  0xd1   :  { %v121_v46 = vadd.f32 %v12667_v38, %v11576_v39 }
  0xd2   :  { %v110_v40 = vpop.f32.mrf.mxu0 }
  0xd3   :  { %v111_v42 = vadd.f32 %v11576_v39, %v110_v40 }
  0xd5   :  { %v12678_v41 = vpop.f32.mrf.mxu1 }
  0xd6   :  { %v218_v51 = vadd.f32 %v12678_v41, %v121_v46 }
  0xd7   :  { %v211_v43 = vpop.f32.mrf.mxu1 }
  0xd8   :  { %v12689_v44 = vpop.f32.mrf.mxu0  ;;  %v212_v47 = vadd.f32 %v211_v43, %v111_v42 }
  0xd9   :  { %v305_v55 = vadd.f32 %v12689_v44, %v218_v51 }
  0xda   :  { %v297_v48 = vpop.f32.mrf.mxu0 }
  0xdb   :  { %v298_v52 = vadd.f32 %v297_v48, %v212_v47 }
  0xdf   :  { %v12700_v45 = vpop.f32.mrf.mxu1 }
  0xe0   :  { %v390_v57 = vadd.f32 %v12700_v45, %v305_v55 }
  0xe1   :  { %v381_v49 = vpop.f32.mrf.mxu1 }
  0xe2   :  { %v12711_v50 = vpop.f32.mrf.mxu0  ;;  %v382_v53 = vadd.f32 %v381_v49, %v298_v52 }
  0xe3   :  { %v479_v61 = vadd.f32 %v12711_v50, %v390_v57 }
  0xe4   :  { %v472_v54 = vpop.f32.mrf.mxu0 }
  0xe5   :  { %v473_v58 = vadd.f32 %v472_v54, %v382_v53 }
  0xe9   :  { %v12722_v56 = vpop.f32.mrf.mxu1 }
  0xea   :  { %v14753_v62 = vadd.f32 %v12722_v56, %v479_v61 }
  0xeb   :  { %v553_v59 = vpop.f32.mrf.mxu1 }
  0xec   :  { %v14749_v60 = vadd.f32 %v553_v59, %v473_v58 }
  0xee   :  { %612 = vrot.lane.b32.xlu0 %v14749_v60, %s14653_s26  ;;  %v563_v35 = vmul.f32 0.5, %v14749_v60 }
  0xf0   :  { %v1256_v40 = vsel %vm28_vm0, %v563_v35, 0 }
  0xf1   :  { %v14800_v43 = vand.u32 4294901760, %v1256_v40 }
  0xf2   :  { %614 = vrot.lane.b32.xlu0 %v14753_v62, %s14653_s26 }
  0xf3   :  { %v14804_v44 = vsub.f32 %v1256_v40, %v14800_v43 }
  0xf5   :  { %v1332_v45 = vand.u32 4294901760, %v14804_v44 }
  0xf6   :  { %1801 = vrot.lane.b32.xlu0 %v14753_v62, %s14654_s27 }
  0xf7   :  { %v1333_v46 = vsub.f32 %v14804_v44, %v1332_v45 }
  0xf9   :  { %v1334_v47 = vand.u32 4294901760, %v1333_v46 }
 0x160   :  { %v613_v10 = vpop.permute.xlu0 %612 }
 0x161   :  { %618 = vxpose.xlu1.b32.start [1/2] (short) (narrow) %v613_v10, 32 }
 0x164   :  { %v615_v12 = vpop.permute.xlu0 %614 }
 0x165   :  { %619 = vxpose.xlu1.b32.end [2/2] (short) (narrow) %v615_v12, 32 }
 0x18b   :  { %1799 = vrot.lane.b32.xlu1 %v14749_v60, %s14654_s27 }
 0x1dd   :  { %v634_v13 = vpop.trf.xlu1 }
 0x1de   :  { %v652_v14 = vsel %vm650_vm1, %v634_v13, 0 }
 0x1df   :  { %v14783_v15 = vand.u32 4294901760, %v652_v14 }
 0x1e1   :  { %v731_v16 = vsub.f32 %v652_v14, %v14783_v15  ;;  %12737 = vmatprep.mubr.f32.mxu1 %v14783_v15  ;;  %v635_v17 = vpop.trf.xlu1 }
 0x1e2   :  { %v655_v18 = vsel %vm650_vm1, %v635_v17, 0  ;;  %v589_v17 = vld [vmem:[%s18464_s2 + $0x118] sm:$0xff] }
 0x1e3   :  { %v732_v19 = vand.u32 4294901760, %v731_v16  ;;  %v740_v20 = vand.u32 4294901760, %v655_v18 }
 0x1e5   :  { %v741_v21 = vsub.f32 %v655_v18, %v740_v20  ;;  %12738 = vmatmul.mubr.f32.vlgmr.msra.gmra.mxu1 %v740_v20  ;;  %v636_v22 = vpop.trf.xlu1  ;;  %v733_v23 = vsub.f32 %v731_v16, %v732_v19 }
 0x1e6   :  { %v658_v24 = vsel %vm650_vm1, %v636_v22, 0  ;;  %12754 = vmatpush3.msra.mxu1 %v14761_v0 }
 0x1e7   :  { %v742_v25 = vand.u32 4294901760, %v741_v21  ;;  %v750_v26 = vand.u32 4294901760, %v658_v24  ;;  %v734_v27 = vand.u32 4294901760, %v733_v23  ;;  %12755 = vmatprep.subr.mxu1 %v14767_v3  ;;  %v588_v23 = vld [vmem:[%s18464_s2 + $0x110] sm:$0xff] }
 0x1e8   :  { %12756 = vmatpush3.msra.mxu1 %v14767_v3 }
 0x1e9   :  { %v743_v28 = vsub.f32 %v741_v21, %v742_v25  ;;  %v751_v29 = vsub.f32 %v658_v24, %v750_v26  ;;  %12727 = vmatprep.mubr.f32.mxu0 %v734_v27  ;;  %12740 = vmatprep.mubr.f32.mxu1 %v750_v26  ;;  %v637_v30 = vpop.trf.xlu1 }
 0x1ea   :  { %v661_v31 = vsel %vm650_vm1, %v637_v30, 0  ;;  %12773 = vmatprep.subr.mxu1 %v14761_v0 }
 0x1eb   :  { %v744_v32 = vand.u32 4294901760, %v743_v28  ;;  %v752_v33 = vand.u32 4294901760, %v751_v29  ;;  %v760_v34 = vand.u32 4294901760, %v661_v31 }
 0x1ed   :  { %v761_v36 = vsub.f32 %v661_v31, %v760_v34  ;;  %12728 = vmatmul.mubr.f32.vlgmr.msra.gmra.mxu0 %v744_v32  ;;  %12741 = vmatmul.mubr.f32.gmra.mxu1 %v760_v34  ;;  %v753_v37 = vsub.f32 %v751_v29, %v752_v33 }
 0x1ee   :  { %12757 = vmatprep.mubr.f32.mxu1 %v732_v19  ;;  %12744 = vmatpush3.msra.mxu0 %v800_v2  ;;  %v564_v2 = vmul.f32 0.5, %v14753_v62 }
 0x1ef   :  { %v762_v38 = vand.u32 4294901760, %v761_v36  ;;  %v754_v39 = vand.u32 4294901760, %v753_v37  ;;  %12745 = vmatprep.subr.mxu0 %v807_v5  ;;  %v590_v37 = vld [vmem:[%s18464_s2 + $0x120] sm:$0xff] }
 0x1f0   :  { %12746 = vmatpush3.msra.mxu0 %v807_v5  ;;  %v1259_v11 = vsel %vm28_vm0, %v564_v2, 0 }
 0x1f1   :  { %12730 = vmatprep.mubr.f32.mxu0 %v754_v39  ;;  %12758 = vmatmul.mubr.f32.vlgmr.msra.gmra.mxu1 %v742_v25  ;;  %v763_v41 = vsub.f32 %v761_v36, %v762_v38  ;;  %v14820_v18 = vand.u32 4294901760, %v1259_v11 }
 0x1f2   :  { %12760 = vmatprep.mubr.f32.mxu1 %v752_v33  ;;  %12774 = vmatpush3.msra.mxu1 %v14761_v0 }
 0x1f3   :  { %v764_v42 = vand.u32 4294901760, %v763_v41  ;;  %12775 = vmatprep.subr.mxu1 %v14767_v3  ;;  %12763 = vmatprep.subr.mxu0 %v14771_v4  ;;  %v14829_v31 = vsub.f32 %v1259_v11, %v14820_v18 }
 0x1f4   :  { %12776 = vmatpush3.msra.mxu1 %v14767_v3 }
 0x1f5   :  { %12731 = vmatmul.mubr.f32.gmra.mxu0 %v764_v42  ;;  %12761 = vmatmul.mubr.f32.gmra.mxu1 %v762_v38  ;;  %v1342_v41 = vand.u32 4294901760, %v14829_v31 }
 0x1f6   :  { %12747 = vmatprep.mubr.f32.mxu0 %v731_v16  ;;  %12777 = vmatprep.mubr.f32.mxu1 %v14783_v15 }
 0x1f9   :  { %12748 = vmatmul.mubr.f32.vlgmr.msra.gmra.mxu0 %v741_v21  ;;  %12778 = vmatmul.mubr.f32.vlgmr.msra.gmra.mxu1 %v740_v20 }
 0x1fa   :  { %12764 = vmatpush3.msra.mxu0 %v14771_v4  ;;  %12750 = vmatprep.mubr.f32.mxu0 %v751_v29  ;;  %v591_v29 = vld [vmem:[%s18464_s2 + $0x128] sm:$0xff] }
 0x1fb   :  { %12780 = vmatprep.mubr.f32.mxu1 %v750_v26  ;;  %12765 = vmatprep.subr.mxu0 %v14777_v7 }
 0x1fc   :  { %12766 = vmatpush3.msra.mxu0 %v14777_v7 }
 0x1fd   :  { %12751 = vmatmul.mubr.f32.gmra.mxu0 %v761_v36  ;;  %12781 = vmatmul.mubr.f32.gmra.mxu1 %v760_v34 }
 0x1fe   :  { %12767 = vmatprep.mubr.f32.mxu0 %v14783_v15  ;;  %12802 = vmatprep.mubr.f32.mxu1 %v14800_v43 }
 0x201   :  { %12768 = vmatmul.mubr.f32.vlgmr.msra.gmra.mxu0 %v740_v20 }
 0x202   :  { %12770 = vmatprep.mubr.f32.mxu0 %v750_v26 }
 0x205   :  { %12771 = vmatmul.mubr.f32.gmra.mxu0 %v760_v34 }
 0x206   :  { %12791 = vmatprep.mubr.f32.mxu0 %v1334_v47 }
 0x2a5   :  { %v12739_v48 = vpop.f32.mrf.mxu1 }
 0x2a7   :  { %v847_v49 = vpop.f32.mrf.mxu1 }
 0x2ad   :  { %v12742_v50 = vpop.f32.mrf.mxu1  ;;  %v12729_v51 = vpop.f32.mrf.mxu0 }
 0x2ae   :  { %v854_v61 = vadd.f32 %v12739_v48, %v12729_v51 }
 0x2af   :  { %v859_v52 = vpop.f32.mrf.mxu1  ;;  %v736_v54 = vpop.f32.mrf.mxu0 }
 0x2b0   :  { %v848_v0 = vadd.f32 %v847_v49, %v736_v54 }
 0x2b1   :  { %v12759_v53 = vpop.f32.mrf.mxu1 }
 0x2b3   :  { %v1037_v55 = vpop.f32.mrf.mxu1 }
 0x2b5   :  { %v12732_v56 = vpop.f32.mrf.mxu0  ;;  %v12762_v57 = vpop.f32.mrf.mxu1 }
 0x2b6   :  { %v866_v5 = vadd.f32 %v12742_v50, %v12732_v56 }
 0x2b7   :  { %v756_v58 = vpop.f32.mrf.mxu0  ;;  %v1053_v59 = vpop.f32.mrf.mxu1 }
 0x2b8   :  { %v860_v8 = vadd.f32 %v859_v52, %v756_v58  ;;  %v1343_v52 = vsub.f32 %v14829_v31, %v1342_v41  ;;  %v572_v58 = vld [vmem:[%s18464_s2] sm:$0xff] }
 0x2b9   :  { %v12749_v60 = vpop.f32.mrf.mxu0  ;;  %v12779_v3 = vpop.f32.mrf.mxu1  ;;  %v1806_v2 = vsel %vm650_vm1, %v572_v58, 0 }
 0x2ba   :  { %v949_v1 = vadd.f32 %v12749_v60, %v854_v61 }
 0x2bb   :  { %v941_v63 = vpop.f32.mrf.mxu0  ;;  %v1229_v12 = vpop.f32.mrf.mxu1 }
 0x2bc   :  { %v942_v6 = vadd.f32 %v941_v63, %v848_v0  ;;  %v1046_v10 = vadd.f32 %v12759_v53, %v949_v1  ;;  %v573_v0 = vld [vmem:[%s18464_s2 + $0x8] sm:$0xff] }
 0x2bd   :  { %v12752_v4 = vpop.f32.mrf.mxu0  ;;  %v12782_v22 = vpop.f32.mrf.mxu1 }
 0x2be   :  { %v963_v9 = vadd.f32 %v12752_v4, %v866_v5  ;;  %v1038_v16 = vadd.f32 %v1037_v55, %v942_v6  ;;  %v1809_v4 = vsel %vm650_vm1, %v573_v0, 0  ;;  %v14879_v6 = vand.u32 4294901760, %v1806_v2 }
 0x2bf   :  { %v955_v7 = vpop.f32.mrf.mxu0  ;;  %v1241_v35 = vpop.f32.mrf.mxu1 }
 0x2c0   :  { %v956_v14 = vadd.f32 %v955_v7, %v860_v8  ;;  %v1062_v21 = vadd.f32 %v12762_v57, %v963_v9  ;;  %v574_v7 = vld [vmem:[%s18464_s2 + $0x10] sm:$0xff]  ;;  %v575_v8 = vld [vmem:[%s18464_s2 + $0x18] sm:$0xff] }
 0x2c1   :  { %v12769_v13 = vpop.f32.mrf.mxu0  ;;  %v1812_v11 = vsel %vm650_vm1, %v574_v7, 0 }
 0x2c2   :  { %v1145_v15 = vadd.f32 %v12769_v13, %v1046_v10  ;;  %v1054_v28 = vadd.f32 %v1053_v59, %v956_v14  ;;  %v1344_v59 = vand.u32 4294901760, %v1343_v52  ;;  %v14887_v10 = vand.u32 4294901760, %v1809_v4 }
 0x2c3   :  { %v1138_v62 = vpop.f32.mrf.mxu0  ;;  %v14894_v13 = vsub.f32 %v1806_v2, %v14879_v6  ;;  %v1815_v14 = vsel %vm650_vm1, %v575_v8, 0 }
 0x2c4   :  { %v1236_v19 = vadd.f32 %v12779_v3, %v1145_v15  ;;  %v1139_v20 = vadd.f32 %v1138_v62, %v1038_v16  ;;  %v1802_v15 = vpop.permute.xlu0 %1801  ;;  %v577_v16 = vld [vmem:[%s18464_s2 + $0x28] sm:$0xff]  ;;  %v14903_v62 = vsub.f32 %v1809_v4, %v14887_v10 }
 0x2c5   :  { %v12772_v24 = vpop.f32.mrf.mxu0 }
 0x2c6   :  { %v1252_v25 = vmul.f32 %v1236_v19, %v589_v17  ;;  %v1230_v26 = vadd.f32 %v1229_v12, %v1139_v20  ;;  %v1157_v27 = vadd.f32 %v12772_v24, %v1062_v21  ;;  %v576_v12 = vld [vmem:[%s18464_s2 + $0x20] sm:$0xff]  ;;  %v1800_v17 = vpop.permute.xlu1 %1799  ;;  %v14905_v19 = vand.u32 4294901760, %v1812_v11 }
 0x2c7   :  { %v1150_v30 = vpop.f32.mrf.mxu0  ;;  %v1818_v20 = vsel %vm650_vm1, %v576_v12, 0  ;;  %v14910_v21 = vand.u32 4294901760, %v1815_v14  ;;  %v1922_v24 = vand.u32 4294901760, %v14894_v13 }
 0x2c8   :  { %v1251_v32 = vmul.f32 %v1230_v26, %v588_v23  ;;  %v1248_v33 = vadd.f32 %v12782_v22, %v1157_v27  ;;  %v1151_v34 = vadd.f32 %v1150_v30, %v1054_v28  ;;  %v14831_v36 = vand.u32 4294901760, %v1252_v25  ;;  %v578_v22 = vld [vmem:[%s18464_s2 + $0x30] sm:$0xff]  ;;  %v579_v26 = vld [vmem:[%s18464_s2 + $0x38] sm:$0xff] }
 0x2c9   :  { %v14915_v23 = vand.u32 4294901760, %v1802_v15  ;;  %v14925_v27 = vand.u32 4294901760, %v1800_v17  ;;  %v14929_v28 = vand.u32 4294901760, %v1818_v20  ;;  %v14941_v30 = vsub.f32 %v1815_v14, %v14910_v21 }
 0x2ca   :  { %v1254_v38 = vmul.f32 %v1248_v33, %v591_v29  ;;  %v1242_v39 = vadd.f32 %v1241_v35, %v1151_v34  ;;  %v14836_v40 = vand.u32 4294901760, %v1251_v32  ;;  %v1390_v47 = vsub.f32 %v1252_v25, %v14831_v36  ;;  %v580_v34 = vld [vmem:[%s18464_s2 + $0x40] sm:$0xff] }
 0x2cb   :  { %v1821_v25 = vsel %vm650_vm1, %v577_v16, 0  ;;  %v1824_v29 = vsel %vm650_vm1, %v578_v22, 0  ;;  %v1827_v33 = vsel %vm650_vm1, %v579_v26, 0  ;;  %v14950_v35 = vsub.f32 %v1802_v15, %v14915_v23 }
 0x2cc   :  { %v14839_v42 = vand.u32 4294901760, %v1254_v38  ;;  %v1253_v46 = vmul.f32 %v1242_v39, %v590_v37  ;;  %v1397_v50 = vsub.f32 %v1251_v32, %v14836_v40  ;;  %v14856_v54 = vand.u32 4294901760, %v1390_v47 }
 0x2cd   :  { %v14943_v32 = vand.u32 4294901760, %v1821_v25  ;;  %v1923_v37 = vsub.f32 %v14894_v13, %v1922_v24  ;;  %v14963_v39 = vsub.f32 %v1818_v20, %v14929_v28  ;;  %v1830_v52 = vsel %vm650_vm1, %v580_v34, 0  ;;  %v586_v20 = vld [vmem:[%s18464_s2 + $0x70] sm:$0xff] }
 0x2ce   :  { %v1376_v48 = vsub.f32 %v1254_v38, %v14839_v42  ;;  %v14843_v49 = vand.u32 4294901760, %v1253_v46  ;;  %12783 = vmatprep.subr.mxu0 %v14839_v42  ;;  %v14863_v57 = vand.u32 4294901760, %v1397_v50  ;;  %v1392_v63 = vsub.f32 %v1390_v47, %v14856_v54 }
 0x2cf   :  { %12784 = vmatpush3.msra.mxu0 %v14839_v42  ;;  %v14958_v38 = vsub.f32 %v1800_v17, %v14925_v27  ;;  %v14992_v58 = vand.u32 4294901760, %v14950_v35 }
 0x2d0   :  { %v1383_v51 = vsub.f32 %v1253_v46, %v14843_v49  ;;  %12785 = vmatprep.subr.mxu0 %v14843_v49  ;;  %v14853_v53 = vand.u32 4294901760, %v1376_v48  ;;  %v1399_v3 = vsub.f32 %v1397_v50, %v14863_v57  ;;  %v1393_v5 = vand.u32 4294901760, %v1392_v63 }
 0x2d1   :  { %12786 = vmatpush3.msra.mxu0 %v14843_v49  ;;  %v14965_v46 = vand.u32 4294901760, %v1824_v29  ;;  %v2112_v15 = vsub.f32 %v14950_v35, %v14992_v58 }
 0x2d2   :  { %12787 = vmatprep.subr.mxu0 %v14831_v36  ;;  %v1378_v55 = vsub.f32 %v1376_v48, %v14853_v53  ;;  %v14860_v56 = vand.u32 4294901760, %v1383_v51  ;;  %v1400_v9 = vand.u32 4294901760, %v1399_v3  ;;  %v584_v3 = vld [vmem:[%s18464_s2 + $0x60] sm:$0xff] }
 0x2d3   :  { %12788 = vmatpush3.msra.mxu0 %v14831_v36  ;;  %v1842_v12 = vsel %vm650_vm1, %v584_v3, 0 }
 0x2d4   :  { %12789 = vmatprep.subr.mxu0 %v14836_v40  ;;  %v1379_v60 = vand.u32 4294901760, %v1378_v55  ;;  %v1385_v61 = vsub.f32 %v1383_v51, %v14860_v56  ;;  %v14986_v55 = vsub.f32 %v1821_v25, %v14943_v32  ;;  %v15070_v34 = vand.u32 4294901760, %v1842_v12 }
 0x2d5   :  { %12790 = vmatpush3.msra.mxu0 %v14836_v40 }
 0x2d6   :  { %12792 = vmatmul.mubr.f32.vlgmr.msra.gmra.mxu0 %v1344_v59  ;;  %12794 = vmatprep.subr.mxu1 %v1379_v60  ;;  %v1386_v1 = vand.u32 4294901760, %v1385_v61  ;;  %v15001_v61 = vand.u32 4294901760, %v1830_v52 }
 0x2d7   :  { %12805 = vmatprep.subr.mxu0 %v1376_v48  ;;  %12795 = vmatpush3.msra.mxu1 %v1379_v60  ;;  %v14999_v60 = vsub.f32 %v1824_v29, %v14965_v46 }
 0x2d8   :  { %12806 = vmatpush3.msra.mxu0 %v1376_v48  ;;  %12813 = vmatprep.mubr.f32.mxu0 %v14804_v44  ;;  %v1932_v44 = vand.u32 4294901760, %v14903_v62 }
 0x2d9   :  { %12796 = vmatprep.subr.mxu1 %v1386_v1  ;;  %12807 = vmatprep.subr.mxu0 %v1383_v51 }
 0x2da   :  { %12797 = vmatpush3.msra.mxu1 %v1386_v1  ;;  %12808 = vmatpush3.msra.mxu0 %v1383_v51  ;;  %v1933_v48 = vsub.f32 %v14903_v62, %v1932_v44  ;;  %v14976_v51 = vand.u32 4294901760, %v1827_v33  ;;  %v15013_v1 = vand.u32 4294901760, %v14958_v38 }
 0x2db   :  { %12798 = vmatprep.subr.mxu1 %v1393_v5  ;;  %12809 = vmatprep.subr.mxu0 %v1390_v47 }
 0x2dc   :  { %12799 = vmatpush3.msra.mxu1 %v1393_v5  ;;  %12810 = vmatpush3.msra.mxu0 %v1390_v47  ;;  %v581_v47 = vld [vmem:[%s18464_s2 + $0x48] sm:$0xff]  ;;  %v1934_v63 = vand.u32 4294901760, %v1933_v48  ;;  %v15016_v2 = vsub.f32 %v1827_v33, %v14976_v51  ;;  %v2119_v16 = vsub.f32 %v14958_v38, %v15013_v1  ;;  %v1848_v48 = vsel %vm650_vm1, %v586_v20, 0 }
 0x2dd   :  { %12800 = vmatprep.subr.mxu1 %v1400_v9  ;;  %12811 = vmatprep.subr.mxu0 %v1397_v50  ;;  %v1833_v59 = vsel %vm650_vm1, %v581_v47, 0  ;;  %v15099_v3 = vand.u32 4294901760, %v1848_v48 }
 0x2de   :  { %12801 = vmatpush3.msra.mxu1 %v1400_v9  ;;  %12812 = vmatpush3.msra.mxu0 %v1397_v50  ;;  %v15027_v4 = vand.u32 4294901760, %v1833_v59  ;;  %v1982_v9 = vand.u32 4294901760, %v14999_v60  ;;  %v1992_v17 = vand.u32 4294901760, %v15016_v2 }
 0x2df   :  { %12803 = vmatmul.mubr.f32.vlgmr.msra.gmra.mxu1 %v14820_v18  ;;  %12814 = vmatmul.mubr.f32.vlgmr.msra.gmra.mxu0 %v14829_v31 }
 0x2e0   :  { %12816 = vmatprep.subr.mxu1 %v14839_v42  ;;  %12827 = vmatprep.subr.mxu0 %v14853_v53  ;;  %v15061_v26 = vsub.f32 %v1833_v59, %v15027_v4  ;;  %v1983_v47 = vsub.f32 %v14999_v60, %v1982_v9 }
 0x2e1   :  { %12817 = vmatpush3.msra.mxu1 %v14839_v42  ;;  %12824 = vmatprep.mubr.f32.mxu1 %v1332_v45  ;;  %v14935_v45 = vsub.f32 %v1812_v11, %v14905_v19  ;;  %v15040_v11 = vsub.f32 %v1830_v52, %v15001_v61  ;;  %v587_v52 = vld [vmem:[%s18464_s2 + $0x78] sm:$0xff] }
 0x2e2   :  { %12828 = vmatpush3.msra.mxu0 %v14853_v53  ;;  %12835 = vmatprep.mubr.f32.mxu0 %v14800_v43  ;;  %v582_v53 = vld [vmem:[%s18464_s2 + $0x50] sm:$0xff] }
 0x2e3   :  { %12818 = vmatprep.subr.mxu1 %v14843_v49  ;;  %12829 = vmatprep.subr.mxu0 %v14860_v56  ;;  %v1942_v50 = vand.u32 4294901760, %v14935_v45  ;;  %v1836_v31 = vsel %vm650_vm1, %v582_v53, 0  ;;  %v2113_v53 = vand.u32 4294901760, %v2112_v15 }
 0x2e4   :  { %12819 = vmatpush3.msra.mxu1 %v14843_v49  ;;  %12830 = vmatpush3.msra.mxu0 %v14860_v56  ;;  %v1924_v56 = vand.u32 4294901760, %v1923_v37  ;;  %v15031_v5 = vand.u32 4294901760, %v1836_v31 }
 0x2e5   :  { %12820 = vmatprep.subr.mxu1 %v14831_v36  ;;  %12831 = vmatprep.subr.mxu0 %v14856_v54  ;;  %v1943_v0 = vsub.f32 %v14935_v45, %v1942_v50 }
 0x2e6   :  { %12821 = vmatpush3.msra.mxu1 %v14831_v36  ;;  %12832 = vmatpush3.msra.mxu0 %v14856_v54  ;;  %v1952_v54 = vand.u32 4294901760, %v14941_v30  ;;  %v15068_v33 = vsub.f32 %v1836_v31, %v15031_v5  ;;  %v2012_v31 = vand.u32 4294901760, %v15061_v26 }
 0x2e7   :  { %12822 = vmatprep.subr.mxu1 %v14836_v40  ;;  %12833 = vmatprep.subr.mxu0 %v14863_v57  ;;  %v1944_v14 = vand.u32 4294901760, %v1943_v0  ;;  %v15097_v0 = vsub.f32 %v1842_v12, %v15070_v34 }
 0x2e8   :  { %12823 = vmatpush3.msra.mxu1 %v14836_v40  ;;  %12834 = vmatpush3.msra.mxu0 %v14863_v57  ;;  %v1962_v57 = vand.u32 4294901760, %v14963_v39  ;;  %v2013_v12 = vsub.f32 %v15061_v26, %v2012_v31 }
 0x2e9   :  { %12825 = vmatmul.mubr.f32.vlgmr.msra.gmra.mxu1 %v1342_v41  ;;  %12836 = vmatmul.mubr.f32.vlgmr.msra.gmra.mxu0 %v14820_v18  ;;  %v583_v41 = vld [vmem:[%s18464_s2 + $0x58] sm:$0xff]  ;;  %v2042_v20 = vand.u32 4294901760, %v15097_v0 }
 0x2ea   :  { %12838 = vmatprep.subr.mxu1 %v14839_v42  ;;  %12849 = vmatprep.subr.mxu0 %v14915_v23  ;;  %v1839_v7 = vsel %vm650_vm1, %v583_v41, 0  ;;  %v1963_v8 = vsub.f32 %v14963_v39, %v1962_v57 }
 0x2eb   :  { %12839 = vmatpush3.msra.mxu1 %v14839_v42  ;;  %12846 = vmatprep.mubr.f32.mxu1 %v14800_v43  ;;  %v1953_v43 = vsub.f32 %v14941_v30, %v1952_v54  ;;  %v1972_v42 = vand.u32 4294901760, %v14986_v55  ;;  %v15063_v29 = vand.u32 4294901760, %v1839_v7 }
 0x2ec   :  { %12850 = vmatpush3.msra.mxu0 %v14915_v23  ;;  %12840 = vmatprep.subr.mxu1 %v14843_v49  ;;  %v1964_v37 = vand.u32 4294901760, %v1963_v8 }
 0x2ed   :  { %12851 = vmatprep.subr.mxu0 %v14925_v27  ;;  %12841 = vmatpush3.msra.mxu1 %v14843_v49  ;;  %v585_v49 = vld [vmem:[%s18464_s2 + $0x68] sm:$0xff]  ;;  %v1954_v22 = vand.u32 4294901760, %v1953_v43  ;;  %v1973_v25 = vsub.f32 %v14986_v55, %v1972_v42  ;;  %v15090_v41 = vsub.f32 %v1839_v7, %v15063_v29  ;;  %v1984_v43 = vand.u32 4294901760, %v1983_v47 }
 0x2ee   :  { %12852 = vmatpush3.msra.mxu0 %v14925_v27  ;;  %12853 = vmatprep.mubr.f32.mxu0 %v1924_v56  ;;  %v2120_v56 = vand.u32 4294901760, %v2119_v16 }
 0x2ef   :  { %12842 = vmatprep.subr.mxu1 %v14831_v36  ;;  %12854 = vmatmul.mubr.f32.vlgmr.msra.gmra.mxu0 %v1934_v63  ;;  %v1974_v59 = vand.u32 4294901760, %v1973_v25 }
 0x2f0   :  { %12905 = vmatprep.subr.mxu0 %v14950_v35  ;;  %12843 = vmatpush3.msra.mxu1 %v14831_v36  ;;  %v1845_v36 = vsel %vm650_vm1, %v585_v49, 0  ;;  %v2032_v49 = vand.u32 4294901760, %v15090_v41 }
 0x2f1   :  { %12906 = vmatpush3.msra.mxu0 %v14950_v35  ;;  %12844 = vmatprep.subr.mxu1 %v14836_v40  ;;  %v2002_v35 = vand.u32 4294901760, %v15040_v11  ;;  %v15092_v63 = vand.u32 4294901760, %v1845_v36 }
 0x2f2   :  { %12907 = vmatprep.subr.mxu0 %v14958_v38  ;;  %12845 = vmatpush3.msra.mxu1 %v14836_v40  ;;  %v1993_v40 = vsub.f32 %v15016_v2, %v1992_v17 }
 0x2f3   :  { %12856 = vmatprep.mubr.f32.mxu0 %v1944_v14  ;;  %12908 = vmatpush3.msra.mxu0 %v14958_v38  ;;  %v2022_v38 = vand.u32 4294901760, %v15068_v33  ;;  %v2003_v7 = vsub.f32 %v15040_v11, %v2002_v35  ;;  %v15111_v14 = vsub.f32 %v1845_v36, %v15092_v63  ;;  %v2014_v36 = vand.u32 4294901760, %v2013_v12 }
 0x2f4   :  { %12847 = vmatmul.mubr.f32.vlgmr.msra.gmra.mxu1 %v14820_v18  ;;  %12857 = vmatmul.mubr.f32.gmra.mxu0 %v1954_v22  ;;  %v1851_v18 = vsel %vm650_vm1, %v587_v52, 0  ;;  %v1994_v8 = vand.u32 4294901760, %v1993_v40  ;;  %v15122_v22 = vsub.f32 %v1848_v48, %v15099_v3 }
 0x2f5   :  { %12877 = vmatprep.subr.mxu1 %v2113_v53  ;;  %12961 = vmatprep.subr.mxu0 %v14992_v58  ;;  %v15113_v15 = vand.u32 4294901760, %v1851_v18  ;;  %v2023_v16 = vsub.f32 %v15068_v33, %v2022_v38  ;;  %v2004_v25 = vand.u32 4294901760, %v2003_v7  ;;  %v2052_v47 = vand.u32 4294901760, %v15111_v14 }
 0x2f6   :  { %12878 = vmatpush3.msra.mxu1 %v2113_v53  ;;  %12859 = vmatprep.mubr.f32.mxu0 %v1964_v37  ;;  %v2033_v37 = vsub.f32 %v15090_v41, %v2032_v49  ;;  %v2043_v53 = vsub.f32 %v15097_v0, %v2042_v20 }
 0x2f7   :  { %12879 = vmatprep.subr.mxu1 %v2120_v56  ;;  %12881 = vmatprep.mubr.f32.mxu1 %v14879_v6  ;;  %v15133_v48 = vsub.f32 %v1851_v18, %v15113_v15  ;;  %v2024_v52 = vand.u32 4294901760, %v2023_v16 }
 0x2f8   :  { %12880 = vmatpush3.msra.mxu1 %v2120_v56  ;;  %12860 = vmatmul.mubr.f32.gmra.mxu0 %v1974_v59  ;;  %v2062_v56 = vand.u32 4294901760, %v15122_v22  ;;  %v2034_v40 = vand.u32 4294901760, %v2033_v37  ;;  %v2053_v59 = vsub.f32 %v15111_v14, %v2052_v47 }
 0x2f9   :  { %12882 = vmatmul.mubr.f32.vlgmr.msra.gmra.mxu1 %v14887_v10  ;;  %12933 = vmatprep.subr.mxu1 %v14915_v23  ;;  %v2072_v18 = vand.u32 4294901760, %v15133_v48 }
 0x2fa   :  { %12934 = vmatpush3.msra.mxu1 %v14915_v23  ;;  %12862 = vmatprep.mubr.f32.mxu0 %v1984_v43  ;;  %v2044_v43 = vand.u32 4294901760, %v2043_v53  ;;  %v2063_v7 = vsub.f32 %v15122_v22, %v2062_v56 }
 0x2fb   :  { %12935 = vmatprep.subr.mxu1 %v14925_v27  ;;  %12884 = vmatprep.mubr.f32.mxu1 %v14905_v19  ;;  %v2073_v12 = vsub.f32 %v15133_v48, %v2072_v18 }
 0x2fc   :  { %12936 = vmatpush3.msra.mxu1 %v14925_v27  ;;  %12863 = vmatmul.mubr.f32.gmra.mxu0 %v1994_v8  ;;  %v2054_v8 = vand.u32 4294901760, %v2053_v59  ;;  %v2064_v16 = vand.u32 4294901760, %v2063_v7 }
 0x2fd   :  { %12885 = vmatmul.mubr.f32.gmra.mxu1 %v14910_v21  ;;  %12989 = vmatprep.subr.mxu1 %v14915_v23 }
 0x2fe   :  { %12865 = vmatprep.mubr.f32.mxu0 %v2004_v25  ;;  %12887 = vmatprep.mubr.f32.mxu1 %v14929_v28  ;;  %v2074_v25 = vand.u32 4294901760, %v2073_v12 }
 0x300   :  { %12866 = vmatmul.mubr.f32.gmra.mxu0 %v2014_v36 }
 0x301   :  { %12888 = vmatmul.mubr.f32.gmra.mxu1 %v14943_v32  ;;  %12868 = vmatprep.mubr.f32.mxu0 %v2024_v52 }
 0x302   :  { %12890 = vmatprep.mubr.f32.mxu1 %v14965_v46 }
 0x304   :  { %12869 = vmatmul.mubr.f32.gmra.mxu0 %v2034_v40 }
 0x305   :  { %12891 = vmatmul.mubr.f32.gmra.mxu1 %v14976_v51  ;;  %12871 = vmatprep.mubr.f32.mxu0 %v2044_v43 }
 0x306   :  { %12893 = vmatprep.mubr.f32.mxu1 %v15001_v61 }
 0x308   :  { %12872 = vmatmul.mubr.f32.gmra.mxu0 %v2054_v8 }
 0x309   :  { %12894 = vmatmul.mubr.f32.gmra.mxu1 %v15027_v4  ;;  %12874 = vmatprep.mubr.f32.mxu0 %v2064_v16 }
 0x30a   :  { %12896 = vmatprep.mubr.f32.mxu1 %v15031_v5 }
 0x30c   :  { %12875 = vmatmul.mubr.f32.gmra.mxu0 %v2074_v25 }
 0x30d   :  { %12897 = vmatmul.mubr.f32.gmra.mxu1 %v15063_v29  ;;  %12909 = vmatprep.mubr.f32.mxu0 %v14894_v13 }
 0x30e   :  { %12899 = vmatprep.mubr.f32.mxu1 %v15070_v34 }
 0x310   :  { %12910 = vmatmul.mubr.f32.vlgmr.msra.gmra.mxu0 %v14903_v62 }
 0x311   :  { %12900 = vmatmul.mubr.f32.gmra.mxu1 %v15092_v63  ;;  %12962 = vmatpush3.msra.mxu0 %v14992_v58 }
 0x312   :  { %12963 = vmatprep.subr.mxu0 %v15013_v1  ;;  %12902 = vmatprep.mubr.f32.mxu1 %v15099_v3 }
 0x313   :  { %12964 = vmatpush3.msra.mxu0 %v15013_v1  ;;  %12912 = vmatprep.mubr.f32.mxu0 %v14935_v45 }
 0x314   :  { %12913 = vmatmul.mubr.f32.gmra.mxu0 %v14941_v30 }
 0x315   :  { %12903 = vmatmul.mubr.f32.gmra.mxu1 %v15113_v15  ;;  %12915 = vmatprep.mubr.f32.mxu0 %v14963_v39 }
 0x316   :  { %12937 = vmatprep.mubr.f32.mxu1 %v1922_v24 }
 0x318   :  { %12916 = vmatmul.mubr.f32.gmra.mxu0 %v14986_v55 }
 0x319   :  { %12938 = vmatmul.mubr.f32.vlgmr.msra.gmra.mxu1 %v1932_v44  ;;  %12918 = vmatprep.mubr.f32.mxu0 %v14999_v60 }
 0x31a   :  { %12990 = vmatpush3.msra.mxu1 %v14915_v23  ;;  %12940 = vmatprep.mubr.f32.mxu1 %v1942_v50 }
 0x31b   :  { %12991 = vmatprep.subr.mxu1 %v14925_v27 }
 0x31c   :  { %12992 = vmatpush3.msra.mxu1 %v14925_v27  ;;  %12919 = vmatmul.mubr.f32.gmra.mxu0 %v15016_v2 }
 0x31d   :  { %12941 = vmatmul.mubr.f32.gmra.mxu1 %v1952_v54  ;;  %12921 = vmatprep.mubr.f32.mxu0 %v15040_v11 }
 0x31e   :  { %12943 = vmatprep.mubr.f32.mxu1 %v1962_v57 }
 0x320   :  { %12922 = vmatmul.mubr.f32.gmra.mxu0 %v15061_v26 }
 0x321   :  { %12944 = vmatmul.mubr.f32.gmra.mxu1 %v1972_v42  ;;  %12924 = vmatprep.mubr.f32.mxu0 %v15068_v33 }
 0x322   :  { %12946 = vmatprep.mubr.f32.mxu1 %v1982_v9 }
 0x324   :  { %12925 = vmatmul.mubr.f32.gmra.mxu0 %v15090_v41 }
 0x325   :  { %12947 = vmatmul.mubr.f32.gmra.mxu1 %v1992_v17  ;;  %12927 = vmatprep.mubr.f32.mxu0 %v15097_v0 }
 0x326   :  { %12949 = vmatprep.mubr.f32.mxu1 %v2002_v35 }
 0x328   :  { %12928 = vmatmul.mubr.f32.gmra.mxu0 %v15111_v14 }
 0x329   :  { %12950 = vmatmul.mubr.f32.gmra.mxu1 %v2012_v31  ;;  %12930 = vmatprep.mubr.f32.mxu0 %v15122_v22 }
 0x32a   :  { %12952 = vmatprep.mubr.f32.mxu1 %v2022_v38 }
 0x32c   :  { %12931 = vmatmul.mubr.f32.gmra.mxu0 %v15133_v48 }
 0x32d   :  { %12953 = vmatmul.mubr.f32.gmra.mxu1 %v2032_v49  ;;  %12965 = vmatprep.mubr.f32.mxu0 %v14879_v6 }
 0x32e   :  { %12955 = vmatprep.mubr.f32.mxu1 %v2042_v20 }
 0x330   :  { %12966 = vmatmul.mubr.f32.vlgmr.msra.gmra.mxu0 %v14887_v10 }
 0x331   :  { %12956 = vmatmul.mubr.f32.gmra.mxu1 %v2052_v47  ;;  %12968 = vmatprep.mubr.f32.mxu0 %v14905_v19 }
 0x332   :  { %12958 = vmatprep.mubr.f32.mxu1 %v2062_v56 }
 0x334   :  { %12969 = vmatmul.mubr.f32.gmra.mxu0 %v14910_v21 }
 0x335   :  { %12959 = vmatmul.mubr.f32.gmra.mxu1 %v2072_v18  ;;  %12971 = vmatprep.mubr.f32.mxu0 %v14929_v28 }
 0x336   :  { %12993 = vmatprep.mubr.f32.mxu1 %v14879_v6 }
 0x338   :  { %12972 = vmatmul.mubr.f32.gmra.mxu0 %v14943_v32 }
 0x339   :  { %12994 = vmatmul.mubr.f32.vlgmr.msra.gmra.mxu1 %v14887_v10  ;;  %12974 = vmatprep.mubr.f32.mxu0 %v14965_v46 }
 0x33a   :  { %12996 = vmatprep.mubr.f32.mxu1 %v14905_v19  ;;  %v608_v19 = vld [vmem:[%s18464_s2 + $0x130] sm:$0xff] }
 0x33c   :  { %12975 = vmatmul.mubr.f32.gmra.mxu0 %v14976_v51 }
 0x33d   :  { %12997 = vmatmul.mubr.f32.gmra.mxu1 %v14910_v21  ;;  %12977 = vmatprep.mubr.f32.mxu0 %v15001_v61 }
 0x33e   :  { %12999 = vmatprep.mubr.f32.mxu1 %v14929_v28  ;;  %v609_v28 = vld [vmem:[%s18464_s2 + $0x138] sm:$0xff] }
 0x340   :  { %12978 = vmatmul.mubr.f32.gmra.mxu0 %v15027_v4 }
 0x341   :  { %13000 = vmatmul.mubr.f32.gmra.mxu1 %v14943_v32  ;;  %12980 = vmatprep.mubr.f32.mxu0 %v15031_v5 }
 0x342   :  { %13002 = vmatprep.mubr.f32.mxu1 %v14965_v46 }
 0x344   :  { %12981 = vmatmul.mubr.f32.gmra.mxu0 %v15063_v29 }
 0x345   :  { %13003 = vmatmul.mubr.f32.gmra.mxu1 %v14976_v51  ;;  %12983 = vmatprep.mubr.f32.mxu0 %v15070_v34 }
 0x346   :  { %13005 = vmatprep.mubr.f32.mxu1 %v15001_v61 }
 0x348   :  { %12984 = vmatmul.mubr.f32.gmra.mxu0 %v15092_v63 }
 0x349   :  { %13006 = vmatmul.mubr.f32.gmra.mxu1 %v15027_v4  ;;  %12986 = vmatprep.mubr.f32.mxu0 %v15099_v3 }
 0x34a   :  { %13008 = vmatprep.mubr.f32.mxu1 %v15031_v5 }
 0x34c   :  { %12987 = vmatmul.mubr.f32.gmra.mxu0 %v15113_v15 }
 0x34d   :  { %13009 = vmatmul.mubr.f32.gmra.mxu1 %v15063_v29 }
 0x34e   :  { %13011 = vmatprep.mubr.f32.mxu1 %v15070_v34 }
 0x351   :  { %13012 = vmatmul.mubr.f32.gmra.mxu1 %v15092_v63 }
 0x352   :  { %13014 = vmatprep.mubr.f32.mxu1 %v15099_v3 }
 0x355   :  { %13015 = vmatmul.mubr.f32.gmra.mxu1 %v15113_v15 }
 0x396   :  { %v12793_v6 = vpop.f32.mrf.mxu0 }
 0x397   :  { %v1347_v32 = vadd.f32 %v12793_v6, %v609_v28 }
 0x398   :  { %v1336_v10 = vpop.f32.mrf.mxu0 }
 0x399   :  { %v1337_v24 = vadd.f32 %v1336_v10, %v608_v19 }
 0x39f   :  { %v12815_v13 = vpop.f32.mrf.mxu0  ;;  %v12804_v62 = vpop.f32.mrf.mxu1 }
 0x3a0   :  { %v1444_v46 = vadd.f32 %v12804_v62, %v1347_v32 }
 0x3a1   :  { %v1523_v21 = vpop.f32.mrf.mxu0  ;;  %v1437_v23 = vpop.f32.mrf.mxu1 }
 0x3a2   :  { %v1438_v45 = vadd.f32 %v1437_v23, %v1337_v24  ;;  %v1531_v58 = vadd.f32 %v12815_v13, %v1444_v46 }
 0x3a4   :  { %v1524_v50 = vadd.f32 %v1523_v21, %v1438_v45 }
 0x3a9   :  { %v12837_v27 = vpop.f32.mrf.mxu0  ;;  %v12826_v44 = vpop.f32.mrf.mxu1 }
 0x3aa   :  { %v1616_v61 = vadd.f32 %v12826_v44, %v1531_v58 }
 0x3ab   :  { %v1698_v30 = vpop.f32.mrf.mxu0  ;;  %v1607_v39 = vpop.f32.mrf.mxu1 }
 0x3ac   :  { %v1608_v54 = vadd.f32 %v1607_v39, %v1524_v50  ;;  %v1705_v9 = vadd.f32 %v12837_v27, %v1616_v61 }
 0x3ae   :  { %v1699_v1 = vadd.f32 %v1698_v30, %v1608_v54 }
 0x3af   :  { %v12855_v51 = vpop.f32.mrf.mxu0 }
 0x3b1   :  { %v15255_v55 = vpop.f32.mrf.mxu0 }
 0x3b4   :  { %v12848_v57 = vpop.f32.mrf.mxu1  ;;  %v12858_v60 = vpop.f32.mrf.mxu0 }
 0x3b5   :  { %v15264_v29 = vadd.f32 %v12848_v57, %v1705_v9 }
 0x3b6   :  { %v1779_v2 = vpop.f32.mrf.mxu1  ;;  %v15257_v42 = vpop.f32.mrf.mxu0 }
 0x3b7   :  { %v15259_v4 = vadd.f32 %v1779_v2, %v1699_v1  ;;  %18529 = vst [vmem:[#allocation6_spill] sm:$0xff] %v15264_v29 }
 0x3b8   :  { %v12861_v5 = vpop.f32.mrf.mxu0 }
 0x3b9   :  { %18528 = vst [vmem:[#allocation5_spill] sm:$0xff] %v15259_v4  ;;  %v12883_v11 = vpop.f32.mrf.mxu1  ;;  %1789 = vmax.xlane.f32.xlu0 %v15259_v4 }
 0x3ba   :  { %v2164_v17 = vadd.f32 %v12883_v11, %v12855_v51  ;;  %v15262_v26 = vpop.f32.mrf.mxu0 }
 0x3bb   :  { %v15266_v33 = vpop.f32.mrf.mxu1 }
 0x3bc   :  { %v12864_v34 = vpop.f32.mrf.mxu0 }
 0x3bd   :  { %v12886_v35 = vpop.f32.mrf.mxu1  ;;  %1791 = vmax.xlane.f32.xlu0 %v15264_v29 }
 0x3be   :  { %v2176_v31 = vadd.f32 %v12886_v35, %v12858_v60  ;;  %v15269_v41 = vpop.f32.mrf.mxu0 }
 0x3bf   :  { %v15271_v63 = vpop.f32.mrf.mxu1 }
 0x3c0   :  { %v12867_v38 = vpop.f32.mrf.mxu0 }
 0x3c1   :  { %v12889_v0 = vpop.f32.mrf.mxu1 }
 0x3c2   :  { %v2188_v3 = vadd.f32 %v12889_v0, %v12861_v5  ;;  %v15273_v49 = vpop.f32.mrf.mxu0 }
 0x3c3   :  { %v15275_v14 = vpop.f32.mrf.mxu1 }
 0x3c4   :  { %v12870_v15 = vpop.f32.mrf.mxu0 }
 0x3c5   :  { %v12892_v20 = vpop.f32.mrf.mxu1 }
 0x3c6   :  { %v15277_v22 = vadd.f32 %v12892_v20, %v12864_v34  ;;  %v15279_v36 = vpop.f32.mrf.mxu0 }
 0x3c7   :  { %v15281_v37 = vpop.f32.mrf.mxu1 }
 0x3c8   :  { %v12873_v47 = vpop.f32.mrf.mxu0 }
 0x3c9   :  { %v12895_v48 = vpop.f32.mrf.mxu1 }
 0x3ca   :  { %v15283_v52 = vadd.f32 %v12895_v48, %v12867_v38  ;;  %v15285_v53 = vpop.f32.mrf.mxu0 }
 0x3cb   :  { %v15287_v56 = vpop.f32.mrf.mxu1 }
 0x3cc   :  { %v15289_v40 = vpop.f32.mrf.mxu0 }
 0x3cd   :  { %v12898_v59 = vpop.f32.mrf.mxu1 }
 0x3ce   :  { %v15291_v18 = vadd.f32 %v12898_v59, %v12870_v15  ;;  %v15293_v43 = vpop.f32.mrf.mxu0 }
 0x3cf   :  { %v15295_v7 = vpop.f32.mrf.mxu1 }
 0x3d0   :  { %v12911_v8 = vpop.f32.mrf.mxu0 }
 0x3d1   :  { %v12901_v12 = vpop.f32.mrf.mxu1  ;;  %v2331_v16 = vadd.f32 %v12911_v8, %v2164_v17 }
 0x3d2   :  { %v15297_v25 = vadd.f32 %v12901_v12, %v12873_v47  ;;  %v15299_v6 = vpop.f32.mrf.mxu0 }
 0x3d3   :  { %v2229_v10 = vpop.f32.mrf.mxu1 }
 0x3d4   :  { %v12914_v13 = vpop.f32.mrf.mxu0 }
 0x3d5   :  { %v12904_v62 = vpop.f32.mrf.mxu1  ;;  %v2345_v19 = vadd.f32 %v12914_v13, %v2176_v31 }
 0x3d6   :  { %v15301_v21 = vpop.f32.mrf.mxu0 }
 0x3d7   :  { %v15303_v23 = vpop.f32.mrf.mxu1 }
 0x3d8   :  { %v12917_v24 = vpop.f32.mrf.mxu0 }
 0x3d9   :  { %v2359_v27 = vadd.f32 %v12917_v24, %v2188_v3  ;;  %v12939_v28 = vpop.f32.mrf.mxu1 }
 0x3da   :  { %v15305_v44 = vadd.f32 %v12939_v28, %v2331_v16  ;;  %v15307_v45 = vpop.f32.mrf.mxu0 }
 0x3db   :  { %v15309_v30 = vpop.f32.mrf.mxu1 }
 0x3dc   :  { %18530 = vst [vmem:[#allocation7_spill] sm:$0xff] %v15305_v44  ;;  %v15311_v32 = vpop.f32.mrf.mxu0 }
 0x3dd   :  { %v12942_v39 = vpop.f32.mrf.mxu1 }
 0x3de   :  { %v15313_v46 = vadd.f32 %v12942_v39, %v2345_v19  ;;  %v15315_v50 = vpop.f32.mrf.mxu0 }
 0x3df   :  { %v15317_v51 = vpop.f32.mrf.mxu1 }
 0x3e0   :  { %18531 = vst [vmem:[#allocation8_spill] sm:$0xff] %v15313_v46  ;;  %v12923_v54 = vpop.f32.mrf.mxu0 }
 0x3e1   :  { %v12945_v58 = vpop.f32.mrf.mxu1 }
 0x3e2   :  { %v15319_v57 = vadd.f32 %v12945_v58, %v2359_v27  ;;  %v15321_v60 = vpop.f32.mrf.mxu0 }
 0x3e3   :  { %v15323_v61 = vpop.f32.mrf.mxu1 }
 0x3e4   :  { %18532 = vst [vmem:[#allocation9_spill] sm:$0xff] %v15319_v57  ;;  %v12926_v1 = vpop.f32.mrf.mxu0 }
 0x3e5   :  { %v15325_v2 = vpop.f32.mrf.mxu1 }
 0x3e6   :  { %v2393_v5 = vpop.f32.mrf.mxu0 }
 0x3e7   :  { %v15327_v9 = vpop.f32.mrf.mxu1 }
 0x3e8   :  { %v12929_v11 = vpop.f32.mrf.mxu0 }
 0x3e9   :  { %v15329_v17 = vpop.f32.mrf.mxu1  ;;  %v2415_v46 = vadd.f32 %v12929_v11, %v15297_v25  ;;  %v2387_v25 = vadd.f32 %v12923_v54, %v15283_v52 }
 0x3ea   :  { %v2407_v34 = vpop.f32.mrf.mxu0 }
 0x3eb   :  { %v15331_v35 = vpop.f32.mrf.mxu1 }
 0x3ec   :  { %v12932_v31 = vpop.f32.mrf.mxu0 }
 0x3ed   :  { %v12954_v38 = vpop.f32.mrf.mxu1 }
 0x3ee   :  { %v2421_v0 = vpop.f32.mrf.mxu0 }
 0x3ef   :  { %v2583_v3 = vpop.f32.mrf.mxu1 }
 0x3f0   :  { %v15333_v15 = vpop.f32.mrf.mxu0 }
 0x3f1   :  { %18533 = vst [vmem:[#allocation10_spill] sm:$0xff] %v15333_v15  ;;  %v12957_v20 = vpop.f32.mrf.mxu1 }
 0x3f2   :  { %v15335_v47 = vpop.f32.mrf.mxu0 }
 0x3f3   :  { %18534 = vst [vmem:[#allocation11_spill] sm:$0xff] %v15335_v47  ;;  %v2599_v48 = vpop.f32.mrf.mxu1 }
 0x3f4   :  { %v15337_v59 = vpop.f32.mrf.mxu0 }
 0x3f5   :  { %18535 = vst [vmem:[#allocation12_spill] sm:$0xff] %v15337_v59  ;;  %v12960_v8 = vpop.f32.mrf.mxu1 }
 0x3f6   :  { %v15339_v12 = vpop.f32.mrf.mxu0 }
 0x3f7   :  { %18536 = vst [vmem:[#allocation13_spill] sm:$0xff] %v15339_v12  ;;  %v15341_v16 = vpop.f32.mrf.mxu1 }
 0x3f8   :  { %v15343_v13 = vpop.f32.mrf.mxu0 }
 0x3f9   :  { %18537 = vst [vmem:[#allocation14_spill] sm:$0xff] %v15343_v13  ;;  %v15345_v19 = vpop.f32.mrf.mxu1 }
 0x3fa   :  { %18538 = vst [vmem:[#allocation15_spill] sm:$0xff] %v15345_v19  ;;  %v15347_v24 = vpop.f32.mrf.mxu0 }
 0x3fb   :  { %18539 = vst [vmem:[#allocation16_spill] sm:$0xff] %v15347_v24  ;;  %v15349_v27 = vpop.f32.mrf.mxu1 }
 0x3fc   :  { %18540 = vst [vmem:[#allocation17_spill] sm:$0xff] %v15349_v27  ;;  %v15351_v28 = vpop.f32.mrf.mxu0  ;;  %v2218_v27 = vadd.f32 %v15295_v7, %v15279_v36  ;;  %v2182_v36 = vadd.f32 %v15275_v14, %v15262_v26  ;;  %v2608_v26 = vadd.f32 %v12957_v20, %v2415_v46 }
 0x3fd   :  { %v15353_v39 = vpop.f32.mrf.mxu1 }
 0x3fe   :  { %18541 = vst [vmem:[#allocation18_spill] sm:$0xff] %v15353_v39  ;;  %v15355_v58 = vpop.f32.mrf.mxu0  ;;  %v2230_v39 = vadd.f32 %v2229_v10, %v15285_v53  ;;  %v2206_v53 = vadd.f32 %v15287_v56, %v15273_v49  ;;  %v2352_v56 = vadd.f32 %v15307_v45, %v2182_v36 }
 0x3ff   :  { %v15357_v29 = vpop.f32.mrf.mxu1 }
 0x400   :  { %18542 = vst [vmem:[#allocation19_spill] sm:$0xff] %v15357_v29  ;;  %v12979_v4 = vpop.f32.mrf.mxu0  ;;  %v2158_v29 = vadd.f32 %v15266_v33, %v15255_v55  ;;  %v2242_v55 = vadd.f32 %v15303_v23, %v15293_v43  ;;  %v2408_v7 = vadd.f32 %v2407_v34, %v2230_v39  ;;  %v2380_v43 = vadd.f32 %v15321_v60, %v2206_v53 }
 0x401   :  { %v15359_v47 = vpop.f32.mrf.mxu1 }
 0x402   :  { %18543 = vst [vmem:[#allocation20_spill] sm:$0xff] %v15359_v47  ;;  %v2748_v15 = vpop.f32.mrf.mxu0  ;;  %v2248_v47 = vadd.f32 %v12904_v62, %v15289_v40  ;;  %v2394_v40 = vadd.f32 %v2393_v5, %v2218_v27  ;;  %v2422_v23 = vadd.f32 %v2421_v0, %v2242_v55  ;;  %v15441_v55 = vld [vmem:[%s18464_s2 + $0x100] sm:$0xff] }
 0x403   :  { %v15361_v44 = vpop.f32.mrf.mxu1 }
 0x404   :  { %18544 = vst [vmem:[#allocation21_spill] sm:$0xff] %v15361_v44  ;;  %v12982_v12 = vpop.f32.mrf.mxu0  ;;  %v2401_v44 = vadd.f32 %v12926_v1, %v15291_v18  ;;  %v2324_v18 = vadd.f32 %v15299_v6, %v2158_v29  ;;  %v2429_v10 = vadd.f32 %v12932_v31, %v2248_v47  ;;  %v2584_v5 = vadd.f32 %v2583_v3, %v2394_v40 }
 0x405   :  { %v15363_v19 = vpop.f32.mrf.mxu1  ;;  %v2600_v29 = vadd.f32 %v2599_v48, %v2408_v7  ;;  %v2568_v31 = vadd.f32 %v15331_v35, %v2380_v43  ;;  %v15446_v7 = vld [vmem:[%s18464_s2 + $0xd0] sm:$0xff] }
 0x406   :  { %18545 = vst [vmem:[#allocation22_spill] sm:$0xff] %v15363_v19  ;;  %v2760_v24 = vpop.f32.mrf.mxu0  ;;  %v15391_v54 = vadd.f32 %v15309_v30, %v2324_v18  ;;  %18547 = vst [vmem:[#allocation24_spill] sm:$0xff] %v15446_v7 }
 0x407   :  { %v15365_v13 = vpop.f32.mrf.mxu1  ;;  %v2761_v46 = vadd.f32 %v2760_v24, %v2584_v5  ;;  %v2749_v48 = vadd.f32 %v2748_v15, %v2568_v31 }
 0x408   :  { %18546 = vst [vmem:[#allocation23_spill] sm:$0xff] %v15365_v13  ;;  %v12985_v57 = vpop.f32.mrf.mxu0  ;;  %v2170_v13 = vadd.f32 %v15271_v63, %v15257_v42  ;;  %v2194_v42 = vadd.f32 %v15281_v37, %v15269_v41  ;;  %v2592_v63 = vadd.f32 %v12954_v38, %v2401_v44  ;;  %v2373_v41 = vadd.f32 %v15311_v32, %v15277_v22  ;;  %v15412_v38 = vld [vmem:[%s18464_s2 + $0xf0] sm:$0xff] }
 0x409   :  { %v13007_v59 = vpop.f32.mrf.mxu1  ;;  %v2779_v52 = vadd.f32 %v12985_v57, %v2608_v26  ;;  %v2576_v37 = vadd.f32 %v15329_v17, %v2387_v25  ;;  %v2624_v44 = vadd.f32 %v12960_v8, %v2429_v10  ;;  %v2616_v22 = vadd.f32 %v15341_v16, %v2422_v23  ;;  %v15407_v17 = vld [vmem:[%s18464_s2 + $0xe8] sm:$0xff]  ;;  %v18552_v23 = vld [vmem:[#allocation9_spill] sm:$0xff] }
 0x40a   :  { %v2772_v19 = vpop.f32.mrf.mxu0  ;;  %v2338_v49 = vadd.f32 %v15301_v21, %v2170_v13  ;;  %v2767_v6 = vadd.f32 %v12982_v12, %v2592_v63  ;;  %v15399_v21 = vld [vmem:[%s18464_s2 + $0xf8] sm:$0xff]  ;;  %v2366_v30 = vadd.f32 %v15315_v50, %v2194_v42  ;;  %v2560_v35 = vadd.f32 %v15325_v2, %v2373_v41  ;;  %v15419_v12 = vld [vmem:[%s18464_s2 + $0xe0] sm:$0xff]  ;;  %v15424_v16 = vld [vmem:[%s18464_s2 + $0x108] sm:$0xff] }
 0x40b   :  { %v2911_v33 = vpop.f32.mrf.mxu1  ;;  %v2773_v60 = vadd.f32 %v2772_v19, %v2600_v29  ;;  %v2755_v32 = vadd.f32 %v12979_v4, %v2576_v37  ;;  %v15429_v19 = vld [vmem:[%s18464_s2 + $0xd8] sm:$0xff]  ;;  %v15459_v63 = vld [vmem:[%s18464_s2 + $0xc8] sm:$0xff]  ;;  %v15478_v41 = vld [vmem:[%s18464_s2 + $0xc0] sm:$0xff] }
 0x40c   :  { %v12988_v14 = vpop.f32.mrf.mxu0  ;;  %v2520_v27 = vadd.f32 %v15317_v51, %v2338_v49  ;;  %v2552_v39 = vadd.f32 %v15327_v9, %v2366_v30  ;;  %v2743_v36 = vadd.f32 %v15351_v28, %v2560_v35  ;;  %v2912_v53 = vadd.f32 %v2911_v33, %v2749_v48  ;;  %v18560_v35 = vld [vmem:[#allocation21_spill] sm:$0xff] }
 0x40d   :  { %v13010_v62 = vpop.f32.mrf.mxu1  ;;  %v2791_v3 = vadd.f32 %v12988_v14, %v2624_v44  ;;  %v2918_v4 = vadd.f32 %v13007_v59, %v2755_v32  ;;  %v2536_v28 = vadd.f32 %v15323_v61, %v2352_v56  ;;  %v18548_v10 = vld [vmem:[#allocation22_spill] sm:$0xff]  ;;  %v18550_v56 = vld [vmem:[#allocation8_spill] sm:$0xff] }
 0x40e   :  { %v2930_v11 = vadd.f32 %v13010_v62, %v2767_v6  ;;  %v2784_v34 = vpop.f32.mrf.mxu0  ;;  %v2737_v33 = vadd.f32 %v15355_v58, %v2552_v39  ;;  %v2906_v62 = vadd.f32 %v18548_v10, %v2743_v36  ;;  %18549 = vst [vmem:[#allocation22_spill] sm:$0xff] %v15459_v63  ;;  %v18551_v58 = vld [vmem:[#allocation12_spill] sm:$0xff]  ;;  %18555 = vst [vmem:[#allocation8_spill] sm:$0xff] %v15478_v41  ;;  %v18562_v39 = vld [vmem:[#allocation18_spill] sm:$0xff] }
 0x40f   :  { %v2923_v1 = vpop.f32.mrf.mxu1  ;;  %v2785_v8 = vadd.f32 %v2784_v34, %v2616_v22  ;;  %v2966_v42 = vmul.f32 %v2918_v4, %v15429_v19  ;;  %v2719_v43 = vadd.f32 %v18551_v58, %v18550_v56  ;;  %v18554_v29 = vld [vmem:[#allocation23_spill] sm:$0xff]  ;;  %v18557_v34 = vld [vmem:[#allocation20_spill] sm:$0xff]  ;;  %v15500_v22 = vld [vmem:[%s18464_s2 + $0xb8] sm:$0xff] }
 0x410   :  { %v2924_v20 = vadd.f32 %v2923_v1, %v2761_v46  ;;  %v2968_v2 = vmul.f32 %v2930_v11, %v15407_v17  ;;  %v18553_v1 = vld [vmem:[#allocation14_spill] sm:$0xff]  ;;  %v2900_v6 = vadd.f32 %v18554_v29, %v2737_v33  ;;  %v2964_v30 = vmul.f32 %v2906_v62, %v15459_v63  ;;  %18558 = vst [vmem:[#allocation12_spill] sm:$0xff] %v15500_v22  ;;  %v18564_v62 = vld [vmem:[#allocation7_spill] sm:$0xff] }
 0x411   :  { %v13013_v45 = vpop.f32.mrf.mxu1  ;;  %v2731_v5 = vadd.f32 %v18553_v1, %v18552_v23  ;;  %v15494_v31 = vand.u32 4294901760, %v2966_v42  ;;  %v2882_v36 = vadd.f32 %v18562_v39, %v2719_v43  ;;  %v18566_v56 = vld [vmem:[#allocation19_spill] sm:$0xff] }
 0x412   :  { %v2942_v57 = vadd.f32 %v13013_v45, %v2779_v52  ;;  %v2967_v18 = vmul.f32 %v2924_v20, %v15419_v12  ;;  %v15461_v26 = vand.u32 4294901760, %v2968_v2  ;;  %v2965_v52 = vmul.f32 %v2912_v53, %v15446_v7  ;;  %v15569_v1 = vld [vmem:[%s18464_s2 + $0xa0] sm:$0xff] }
 0x413   :  { %v2935_v0 = vpop.f32.mrf.mxu1  ;;  %v2963_v4 = vmul.f32 %v2900_v6, %v15478_v41  ;;  %18567 = vst [vmem:[#allocation23_spill] sm:$0xff] %v15569_v1 }
 0x414   :  { %v2970_v50 = vmul.f32 %v2942_v57, %v15399_v21  ;;  %v2936_v47 = vadd.f32 %v2935_v0, %v2773_v60  ;;  %v15480_v37 = vand.u32 4294901760, %v2967_v18  ;;  %v18556_v60 = vld [vmem:[#allocation16_spill] sm:$0xff]  ;;  %v2894_v57 = vadd.f32 %v18557_v34, %v2731_v5 }
 0x415   :  { %v13016_v13 = vpop.f32.mrf.mxu1  ;;  %v2725_v11 = vadd.f32 %v18556_v60, %v2536_v28  ;;  %v15503_v32 = vsub.f32 %v2968_v2, %v15461_v26  ;;  %v15563_v23 = vand.u32 4294901760, %v2963_v4 }
 0x416   :  { %v15432_v15 = vand.u32 4294901760, %v2970_v50  ;;  %v2969_v59 = vmul.f32 %v2936_v47, %v15412_v38  ;;  %v2954_v24 = vadd.f32 %v13016_v13, %v2791_v3  ;;  %v15524_v13 = vld [vmem:[%s18464_s2 + $0xb0] sm:$0xff]  ;;  %v15527_v2 = vsub.f32 %v2967_v18, %v15480_v37 }
 0x417   :  { %v2947_v40 = vpop.f32.mrf.mxu1  ;;  %v2888_v48 = vadd.f32 %v18560_v35, %v2725_v11  ;;  %18561 = vst [vmem:[#allocation9_spill] sm:$0xff] %v15524_v13  ;;  %v2962_v53 = vmul.f32 %v2894_v57, %v15500_v22  ;;  %v15543_v18 = vsub.f32 %v2966_v42, %v15494_v31  ;;  %v15557_v10 = vand.u32 4294901760, %v15503_v32  ;;  %v18565_v42 = vld [vmem:[#allocation10_spill] sm:$0xff]  ;;  %v18568_v11 = vld [vmem:[#allocation11_spill] sm:$0xff] }
 0x418   :  { %v15449_v25 = vand.u32 4294901760, %v2969_v59  ;;  %v2972_v51 = vmul.f32 %v2954_v24, %v15424_v16  ;;  %v2948_v9 = vadd.f32 %v2947_v40, %v2785_v8  ;;  %v15464_v14 = vsub.f32 %v2970_v50, %v15432_v15  ;;  %v18559_v50 = vld [vmem:[#allocation13_spill] sm:$0xff]  ;;  %v18569_v57 = vld [vmem:[#allocation15_spill] sm:$0xff] }
 0x419   :  { %v2713_v47 = vadd.f32 %v18559_v50, %v2520_v27  ;;  %v15518_v8 = vand.u32 4294901760, %v2965_v52  ;;  %v15540_v40 = vand.u32 4294901760, %v2964_v30  ;;  %v2961_v43 = vmul.f32 %v2888_v48, %v15524_v13 }
 0x41a   :  { %v15466_v49 = vand.u32 4294901760, %v2972_v51  ;;  %v2971_v61 = vmul.f32 %v2948_v9, %v15441_v55  ;;  %v15483_v44 = vsub.f32 %v2969_v59, %v15449_v25  ;;  %v15513_v20 = vand.u32 4294901760, %v15464_v14 }
 0x41b   :  { %v2876_v58 = vadd.f32 %v18566_v56, %v2713_v47  ;;  %v15572_v5 = vsub.f32 %v2965_v52, %v15518_v8  ;;  %v15578_v60 = vand.u32 4294901760, %v15527_v2  ;;  %v2701_v34 = vadd.f32 %v18568_v11, %v15391_v54  ;;  %v15590_v52 = vld [vmem:[%s18464_s2 + $0x98] sm:$0xff] }
 0x41c   :  { %v15486_v45 = vsub.f32 %v2972_v51, %v15466_v49  ;;  %v15488_v46 = vand.u32 4294901760, %v2971_v61  ;;  %13017 = vmatprep.subr.mxu0 %v15466_v49  ;;  %v15536_v27 = vand.u32 4294901760, %v15483_v44  ;;  %v15549_v51 = vld [vmem:[%s18464_s2 + $0xa8] sm:$0xff]  ;;  %v3092_v33 = vsub.f32 %v15464_v14, %v15513_v20  ;;  %18570 = vst [vmem:[#allocation16_spill] sm:$0xff] %v15590_v52 }
 0x41d   :  { %13018 = vmatpush3.msra.mxu0 %v15466_v49  ;;  %18563 = vst [vmem:[#allocation14_spill] sm:$0xff] %v15549_v51  ;;  %v2960_v47 = vmul.f32 %v2882_v36, %v15549_v51  ;;  %v15584_v35 = vand.u32 4294901760, %v2962_v53  ;;  %v15593_v48 = vsub.f32 %v2964_v30, %v15540_v40  ;;  %v15599_v39 = vand.u32 4294901760, %v15543_v18  ;;  %v18571_v36 = vld [vmem:[#allocation17_spill] sm:$0xff] }
 0x41e   :  { %v15506_v0 = vsub.f32 %v2971_v61, %v15488_v46  ;;  %13019 = vmatprep.subr.mxu0 %v15488_v46  ;;  %v15510_v3 = vand.u32 4294901760, %v15486_v45  ;;  %v2707_v61 = vadd.f32 %v18565_v42, %v18564_v62  ;;  %v3099_v6 = vsub.f32 %v15483_v44, %v15536_v27  ;;  %v15609_v30 = vld [vmem:[%s18464_s2 + $0x90] sm:$0xff] }
 0x41f   :  { %13020 = vmatpush3.msra.mxu0 %v15488_v46  ;;  %v3093_v54 = vand.u32 4294901760, %v3092_v33  ;;  %v15603_v62 = vand.u32 4294901760, %v2961_v43  ;;  %18572 = vst [vmem:[#allocation20_spill] sm:$0xff] %v15609_v30  ;;  %v15612_v33 = vsub.f32 %v2963_v4, %v15563_v23  ;;  %v15618_v56 = vand.u32 4294901760, %v15572_v5 }
 0x420   :  { %13021 = vmatprep.subr.mxu0 %v15432_v15  ;;  %v3078_v59 = vsub.f32 %v15486_v45, %v15510_v3  ;;  %v15533_v24 = vand.u32 4294901760, %v15506_v0  ;;  %v2870_v50 = vadd.f32 %v18569_v57, %v2707_v61  ;;  %v3100_v42 = vand.u32 4294901760, %v3099_v6 }
 0x421   :  { %13022 = vmatpush3.msra.mxu0 %v15432_v15  ;;  %v3113_v61 = vsub.f32 %v15527_v2, %v15578_v60  ;;  %v15625_v4 = vsub.f32 %v2962_v53, %v15584_v35  ;;  %v3120_v11 = vsub.f32 %v15543_v18, %v15599_v39  ;;  %v15638_v53 = vsub.f32 %v2961_v43, %v15603_v62 }
 0x422   :  { %13023 = vmatprep.subr.mxu0 %v15449_v25  ;;  %v3079_v9 = vand.u32 4294901760, %v3078_v59  ;;  %v3085_v28 = vsub.f32 %v15506_v0, %v15533_v24  ;;  %v3106_v59 = vsub.f32 %v15503_v32, %v15557_v10 }
 0x423   :  { %13024 = vmatpush3.msra.mxu0 %v15449_v25  ;;  %v3121_v43 = vand.u32 4294901760, %v3120_v11 }
 0x424   :  { %13025 = vmatprep.subr.mxu0 %v15461_v26  ;;  %13052 = vmatprep.subr.mxu1 %v3079_v9  ;;  %v3086_v29 = vand.u32 4294901760, %v3085_v28  ;;  %v2959_v28 = vmul.f32 %v2876_v58, %v15569_v1  ;;  %v2958_v58 = vmul.f32 %v2870_v50, %v15590_v52  ;;  %v3107_v6 = vand.u32 4294901760, %v3106_v59 }
 0x425   :  { %13026 = vmatpush3.msra.mxu0 %v15461_v26  ;;  %13053 = vmatpush3.msra.mxu1 %v3079_v9  ;;  %v2864_v9 = vadd.f32 %v18571_v36, %v2701_v34  ;;  %v15631_v34 = vand.u32 4294901760, %v15593_v48  ;;  %v3127_v59 = vsub.f32 %v15572_v5, %v15618_v56  ;;  %v15644_v36 = vand.u32 4294901760, %v15612_v33 }
 0x426   :  { %13027 = vmatprep.subr.mxu0 %v15480_v37  ;;  %13054 = vmatprep.subr.mxu1 %v3086_v29  ;;  %v15634_v50 = vand.u32 4294901760, %v2959_v28  ;;  %v15646_v52 = vand.u32 4294901760, %v2958_v58  ;;  %v15668_v1 = vand.u32 4294901760, %v15638_v53 }
 0x427   :  { %13028 = vmatpush3.msra.mxu0 %v15480_v37  ;;  %13055 = vmatpush3.msra.mxu1 %v3086_v29  ;;  %v15621_v29 = vand.u32 4294901760, %v2960_v47  ;;  %v2957_v57 = vmul.f32 %v2864_v9, %v15609_v30  ;;  %v3141_v11 = vsub.f32 %v15612_v33, %v15644_v36 }
 0x428   :  { %13029 = vmatprep.subr.mxu0 %v15494_v31  ;;  %13056 = vmatprep.subr.mxu1 %v3093_v54  ;;  %18573 = vst [vmem:[#allocation13_spill] sm:$0xff] %v15668_v1  ;;  %v15672_v51 = vsub.f32 %v2958_v58, %v15646_v52 }
 0x429   :  { %13030 = vmatpush3.msra.mxu0 %v15494_v31  ;;  %13057 = vmatpush3.msra.mxu1 %v3093_v54  ;;  %v3114_v54 = vand.u32 4294901760, %v3113_v61  ;;  %v15650_v9 = vsub.f32 %v2960_v47, %v15621_v29  ;;  %v15656_v61 = vand.u32 4294901760, %v15625_v4  ;;  %v15658_v30 = vand.u32 4294901760, %v2957_v57 }
 0x42a   :  { %13031 = vmatprep.subr.mxu0 %v15518_v8  ;;  %13058 = vmatprep.subr.mxu1 %v3100_v42  ;;  %v3128_v47 = vand.u32 4294901760, %v3127_v59  ;;  %v3142_v58 = vand.u32 4294901760, %v3141_v11  ;;  %v15695_v22 = vand.u32 4294901760, %v15672_v51 }
 0x42b   :  { %13032 = vmatpush3.msra.mxu0 %v15518_v8  ;;  %13059 = vmatpush3.msra.mxu1 %v3100_v42  ;;  %v3134_v42 = vsub.f32 %v15593_v48, %v15631_v34  ;;  %v15678_v59 = vand.u32 4294901760, %v15650_v9  ;;  %v15682_v13 = vsub.f32 %v2957_v57, %v15658_v30 }
 0x42c   :  { %13033 = vmatprep.subr.mxu0 %v15540_v40  ;;  %13060 = vmatprep.subr.mxu1 %v3107_v6  ;;  %18576 = vst [vmem:[#allocation7_spill] sm:$0xff] %v15695_v22 }
 0x42d   :  { %13034 = vmatpush3.msra.mxu0 %v15540_v40  ;;  %13061 = vmatpush3.msra.mxu1 %v3107_v6  ;;  %v15662_v6 = vsub.f32 %v2959_v28, %v15634_v50  ;;  %v3135_v28 = vand.u32 4294901760, %v3134_v42  ;;  %18574 = vst [vmem:[#allocation21_spill] sm:$0xff] %v15678_v59  ;;  %v3162_v57 = vsub.f32 %v15650_v9, %v15678_v59  ;;  %v15702_v41 = vand.u32 4294901760, %v15682_v13 }
 0x42e   :  { %13035 = vmatprep.subr.mxu0 %v15563_v23  ;;  %13062 = vmatprep.subr.mxu1 %v3114_v54 }
 0x42f   :  { %13036 = vmatpush3.msra.mxu0 %v15563_v23  ;;  %13063 = vmatpush3.msra.mxu1 %v3114_v54  ;;  %v3148_v54 = vsub.f32 %v15625_v4, %v15656_v61  ;;  %v15688_v42 = vand.u32 4294901760, %v15662_v6  ;;  %18577 = vst [vmem:[#allocation10_spill] sm:$0xff] %v15702_v41 }
 0x430   :  { %13037 = vmatprep.subr.mxu0 %v15584_v35  ;;  %13064 = vmatprep.subr.mxu1 %v3121_v43 }
 0x431   :  { %13038 = vmatpush3.msra.mxu0 %v15584_v35  ;;  %13065 = vmatpush3.msra.mxu1 %v3121_v43  ;;  %v3155_v43 = vsub.f32 %v15638_v53, %v15668_v1  ;;  %18575 = vst [vmem:[#allocation18_spill] sm:$0xff] %v15688_v42 }
 0x432   :  { %13039 = vmatprep.subr.mxu0 %v15603_v62  ;;  %13066 = vmatprep.subr.mxu1 %v3128_v47 }
 0x433   :  { %13040 = vmatpush3.msra.mxu0 %v15603_v62  ;;  %13067 = vmatpush3.msra.mxu1 %v3128_v47  ;;  %v3149_v47 = vand.u32 4294901760, %v3148_v54  ;;  %v3156_v11 = vand.u32 4294901760, %v3155_v43  ;;  %v3163_v54 = vand.u32 4294901760, %v3162_v57 }
 0x434   :  { %13041 = vmatprep.subr.mxu0 %v15621_v29  ;;  %13068 = vmatprep.subr.mxu1 %v3135_v28 }
 0x435   :  { %13042 = vmatpush3.msra.mxu0 %v15621_v29  ;;  %13069 = vmatpush3.msra.mxu1 %v3135_v28  ;;  %v3169_v28 = vsub.f32 %v15662_v6, %v15688_v42  ;;  %v3183_v42 = vsub.f32 %v15682_v13, %v15702_v41 }
 0x436   :  { %13043 = vmatprep.subr.mxu0 %v15634_v50  ;;  %13070 = vmatprep.subr.mxu1 %v3142_v58 }
 0x437   :  { %13044 = vmatpush3.msra.mxu0 %v15634_v50  ;;  %13071 = vmatpush3.msra.mxu1 %v3142_v58  ;;  %v3176_v58 = vsub.f32 %v15672_v51, %v15695_v22  ;;  %v3170_v43 = vand.u32 4294901760, %v3169_v28  ;;  %v3184_v59 = vand.u32 4294901760, %v3183_v42  ;;  %v18578_v22 = vld [vmem:[#allocation5_spill] sm:$0xff]  ;;  %v18579_v28 = vld [vmem:[#allocation6_spill] sm:$0xff] }
 0x438   :  { %13045 = vmatprep.subr.mxu0 %v15646_v52  ;;  %13072 = vmatprep.subr.mxu1 %v3149_v47 }
 0x439   :  { %13046 = vmatpush3.msra.mxu0 %v15646_v52  ;;  %13073 = vmatpush3.msra.mxu1 %v3149_v47  ;;  %v3177_v47 = vand.u32 4294901760, %v3176_v58 }
 0x43a   :  { %13047 = vmatprep.subr.mxu0 %v15658_v30  ;;  %13074 = vmatprep.subr.mxu1 %v3156_v11 }
 0x43b   :  { %13048 = vmatpush3.msra.mxu0 %v15658_v30  ;;  %13075 = vmatpush3.msra.mxu1 %v3156_v11 }
 0x43c   :  { %13076 = vmatprep.subr.mxu1 %v3163_v54  ;;  %13087 = vmatprep.subr.mxu0 %v15486_v45 }
 0x43d   :  { %13077 = vmatpush3.msra.mxu1 %v3163_v54 }
 0x43e   :  { %13078 = vmatprep.subr.mxu1 %v3170_v43 }
 0x43f   :  { %13079 = vmatpush3.msra.mxu1 %v3170_v43 }
 0x440   :  { %13080 = vmatprep.subr.mxu1 %v3177_v47 }
 0x441   :  { %13081 = vmatpush3.msra.mxu1 %v3177_v47 }
 0x442   :  { %13082 = vmatprep.subr.mxu1 %v3184_v59  ;;  %v1790_v57 = vpop.xlane.xlu0 %1789 }
 0x443   :  { %13083 = vmatpush3.msra.mxu1 %v3184_v59  ;;  %v1793_v63 = vsub.f32 %v18578_v22, %v1790_v57 }
 0x444   :  { %13122 = vmatprep.subr.mxu1 %v15466_v49 }
 0x445   :  { %v1795_v11 = vmul.f32 1.442695, %v1793_v63 }
 0x446   :  { %v1792_v1 = vpop.xlane.xlu0 %1791 }
 0x447   :  { %14601 = vpow2.f32 %v1795_v11  ;;  %v1794_v7 = vsub.f32 %v18579_v28, %v1792_v1  ;;  %v18589_v11 = vld [vmem:[#allocation14_spill] sm:$0xff] }
 0x448   :  { %v15988_v28 = vand.u32 4294901760, %v18589_v11 }
 0x449   :  { %v1797_v41 = vmul.f32 1.442695, %v1794_v7 }
 0x44b   :  { %14603 = vpow2.f32 %v1797_v41 }
 0x454   :  { %v14602_v54 = vpop.eup %14601 }
 0x455   :  { %v15715_v58 = vand.u32 4294901760, %v14602_v54 }
 0x457   :  { %13084 = vmatprep.mubr.f32.mxu1 %v15715_v58  ;;  %v15719_v42 = vsub.f32 %v14602_v54, %v15715_v58 }
 0x458   :  { %v14604_v59 = vpop.eup %14603 }
 0x459   :  { %v15721_v43 = vand.u32 4294901760, %v14604_v59  ;;  %v15724_v22 = vand.u32 4294901760, %v15719_v42 }
 0x45b   :  { %v15727_v63 = vsub.f32 %v14604_v59, %v15721_v43  ;;  %13085 = vmatmul.mubr.f32.vlgmr.msra.gmra.mxu1 %v15721_v43  ;;  %v3057_v7 = vsub.f32 %v15719_v42, %v15724_v22  ;;  %v18590_v59 = vld [vmem:[#allocation10_spill] sm:$0xff] }
 0x45c   :  { %13123 = vmatpush3.msra.mxu1 %v15466_v49  ;;  %13154 = vmatprep.mubr.f32.mxu1 %v15724_v22 }
 0x45d   :  { %13124 = vmatprep.subr.mxu1 %v15488_v46  ;;  %v15735_v41 = vand.u32 4294901760, %v3057_v7  ;;  %v15738_v1 = vand.u32 4294901760, %v15727_v63 }
 0x45e   :  { %13125 = vmatpush3.msra.mxu1 %v15488_v46 }
 0x45f   :  { %13126 = vmatprep.subr.mxu1 %v15432_v15  ;;  %13049 = vmatprep.mubr.f32.mxu0 %v15735_v41  ;;  %v3067_v47 = vsub.f32 %v15727_v63, %v15738_v1 }
 0x460   :  { %13127 = vmatpush3.msra.mxu1 %v15432_v15 }
 0x461   :  { %13128 = vmatprep.subr.mxu1 %v15449_v25  ;;  %v15747_v57 = vand.u32 4294901760, %v3067_v47 }
 0x462   :  { %13129 = vmatpush3.msra.mxu1 %v15449_v25 }
 0x463   :  { %13130 = vmatprep.subr.mxu1 %v15461_v26  ;;  %13050 = vmatmul.mubr.f32.vlgmr.msra.gmra.mxu0 %v15747_v57 }
 0x464   :  { %13088 = vmatpush3.msra.mxu0 %v15486_v45  ;;  %13131 = vmatpush3.msra.mxu1 %v15461_v26 }
 0x465   :  { %13089 = vmatprep.subr.mxu0 %v15506_v0  ;;  %13119 = vmatprep.mubr.f32.mxu0 %v15719_v42 }
 0x466   :  { %13132 = vmatprep.subr.mxu1 %v15480_v37  ;;  %13090 = vmatpush3.msra.mxu0 %v15506_v0  ;;  %v15906_v0 = vand.u32 4294901760, %v15429_v19 }
 0x467   :  { %13133 = vmatpush3.msra.mxu1 %v15480_v37  ;;  %13091 = vmatprep.subr.mxu0 %v15464_v14 }
 0x468   :  { %13134 = vmatprep.subr.mxu1 %v15494_v31  ;;  %13092 = vmatpush3.msra.mxu0 %v15464_v14  ;;  %v15849_v14 = vand.u32 4294901760, %v15399_v21 }
 0x469   :  { %13135 = vmatpush3.msra.mxu1 %v15494_v31  ;;  %13093 = vmatprep.subr.mxu0 %v15483_v44 }
 0x46a   :  { %13136 = vmatprep.subr.mxu1 %v15518_v8  ;;  %13094 = vmatpush3.msra.mxu0 %v15483_v44  ;;  %v15870_v44 = vand.u32 4294901760, %v15407_v17  ;;  %v15874_v45 = vsub.f32 %v15399_v21, %v15849_v14  ;;  %v15890_v21 = vand.u32 4294901760, %v15419_v12 }
 0x46b   :  { %13137 = vmatpush3.msra.mxu1 %v15518_v8  ;;  %13095 = vmatprep.subr.mxu0 %v15503_v32 }
 0x46c   :  { %13138 = vmatprep.subr.mxu1 %v15540_v40  ;;  %13096 = vmatpush3.msra.mxu0 %v15503_v32  ;;  %v15903_v32 = vand.u32 4294901760, %v15874_v45 }
 0x46d   :  { %13139 = vmatpush3.msra.mxu1 %v15540_v40  ;;  %13097 = vmatprep.subr.mxu0 %v15527_v2 }
 0x46e   :  { %13140 = vmatprep.subr.mxu1 %v15563_v23  ;;  %13098 = vmatpush3.msra.mxu0 %v15527_v2 }
 0x46f   :  { %13141 = vmatpush3.msra.mxu1 %v15563_v23  ;;  %13099 = vmatprep.subr.mxu0 %v15543_v18 }
 0x470   :  { %13142 = vmatprep.subr.mxu1 %v15584_v35  ;;  %13100 = vmatpush3.msra.mxu0 %v15543_v18  ;;  %v18582_v18 = vld [vmem:[#allocation22_spill] sm:$0xff] }
 0x471   :  { %13143 = vmatpush3.msra.mxu1 %v15584_v35  ;;  %13101 = vmatprep.subr.mxu0 %v15572_v5 }
 0x472   :  { %13144 = vmatprep.subr.mxu1 %v15603_v62  ;;  %13102 = vmatpush3.msra.mxu0 %v15572_v5 }
 0x473   :  { %13145 = vmatpush3.msra.mxu1 %v15603_v62  ;;  %13103 = vmatprep.subr.mxu0 %v15593_v48 }
 0x474   :  { %13146 = vmatprep.subr.mxu1 %v15621_v29  ;;  %13104 = vmatpush3.msra.mxu0 %v15593_v48 }
 0x475   :  { %13147 = vmatpush3.msra.mxu1 %v15621_v29  ;;  %13105 = vmatprep.subr.mxu0 %v15612_v33 }
 0x476   :  { %13148 = vmatprep.subr.mxu1 %v15634_v50  ;;  %13106 = vmatpush3.msra.mxu0 %v15612_v33 }
 0x477   :  { %13149 = vmatpush3.msra.mxu1 %v15634_v50  ;;  %13107 = vmatprep.subr.mxu0 %v15625_v4 }
 0x478   :  { %13150 = vmatprep.subr.mxu1 %v15646_v52  ;;  %13108 = vmatpush3.msra.mxu0 %v15625_v4 }
 0x479   :  { %13151 = vmatpush3.msra.mxu1 %v15646_v52  ;;  %13109 = vmatprep.subr.mxu0 %v15638_v53 }
 0x47a   :  { %13152 = vmatprep.subr.mxu1 %v15658_v30  ;;  %13110 = vmatpush3.msra.mxu0 %v15638_v53 }
 0x47b   :  { %13153 = vmatpush3.msra.mxu1 %v15658_v30  ;;  %13111 = vmatprep.subr.mxu0 %v15650_v9 }
 0x47c   :  { %13155 = vmatmul.mubr.f32.vlgmr.msra.gmra.mxu1 %v15738_v1  ;;  %13192 = vmatprep.subr.mxu1 %v15466_v49 }
 0x47d   :  { %13112 = vmatpush3.msra.mxu0 %v15650_v9  ;;  %13193 = vmatpush3.msra.mxu1 %v15466_v49  ;;  %v15856_v49 = vand.u32 4294901760, %v15412_v38 }
 0x47e   :  { %13224 = vmatprep.mubr.f32.mxu1 %v15715_v58  ;;  %13113 = vmatprep.subr.mxu0 %v15662_v6 }
 0x47f   :  { %13194 = vmatprep.subr.mxu1 %v15488_v46  ;;  %13114 = vmatpush3.msra.mxu0 %v15662_v6 }
 0x480   :  { %13195 = vmatpush3.msra.mxu1 %v15488_v46  ;;  %13115 = vmatprep.subr.mxu0 %v15672_v51 }
 0x481   :  { %13196 = vmatprep.subr.mxu1 %v15432_v15  ;;  %13116 = vmatpush3.msra.mxu0 %v15672_v51  ;;  %v15934_v51 = vand.u32 4294901760, %v18582_v18 }
 0x482   :  { %13197 = vmatpush3.msra.mxu1 %v15432_v15  ;;  %13117 = vmatprep.subr.mxu0 %v15682_v13  ;;  %v15829_v15 = vand.u32 4294901760, %v15424_v16 }
 0x483   :  { %13198 = vmatprep.subr.mxu1 %v15449_v25  ;;  %13118 = vmatpush3.msra.mxu0 %v15682_v13  ;;  %v15922_v13 = vsub.f32 %v15419_v12, %v15890_v21  ;;  %v15938_v12 = vsub.f32 %v15429_v19, %v15906_v0  ;;  %v15965_v33 = vsub.f32 %v18582_v18, %v15934_v51  ;;  %v18592_v18 = vld [vmem:[#allocation16_spill] sm:$0xff] }
 0x484   :  { %13199 = vmatpush3.msra.mxu1 %v15449_v25  ;;  %13120 = vmatmul.mubr.f32.vlgmr.msra.gmra.mxu0 %v15727_v63  ;;  %v15838_v25 = vand.u32 4294901760, %v15441_v55 }
 0x485   :  { %13157 = vmatprep.subr.mxu0 %v15510_v3  ;;  %13200 = vmatprep.subr.mxu1 %v15461_v26  ;;  %v15955_v19 = vand.u32 4294901760, %v15922_v13  ;;  %v15998_v47 = vand.u32 4294901760, %v15965_v33 }
 0x486   :  { %13158 = vmatpush3.msra.mxu0 %v15510_v3  ;;  %13189 = vmatprep.mubr.f32.mxu0 %v15715_v58 }
 0x487   :  { %13201 = vmatpush3.msra.mxu1 %v15461_v26  ;;  %13159 = vmatprep.subr.mxu0 %v15533_v24  ;;  %v15844_v26 = vsub.f32 %v15424_v16, %v15829_v15  ;;  %v15860_v16 = vsub.f32 %v15441_v55, %v15838_v25  ;;  %v15882_v55 = vsub.f32 %v15412_v38, %v15856_v49 }
 0x488   :  { %13202 = vmatprep.subr.mxu1 %v15480_v37  ;;  %13160 = vmatpush3.msra.mxu0 %v15533_v24  ;;  %v15898_v38 = vsub.f32 %v15407_v17, %v15870_v44  ;;  %v18581_v24 = vld [vmem:[#allocation13_spill] sm:$0xff]  ;;  %v3797_v9 = vsub.f32 %v15922_v13, %v15955_v19 }
 0x489   :  { %13203 = vmatpush3.msra.mxu1 %v15480_v37  ;;  %13161 = vmatprep.subr.mxu0 %v15513_v20  ;;  %v15867_v37 = vand.u32 4294901760, %v15844_v26  ;;  %v15887_v46 = vand.u32 4294901760, %v15860_v16  ;;  %v15915_v3 = vand.u32 4294901760, %v15882_v55 }
 0x48a   :  { %13204 = vmatprep.subr.mxu1 %v15494_v31  ;;  %13162 = vmatpush3.msra.mxu0 %v15513_v20  ;;  %v18580_v20 = vld [vmem:[#allocation24_spill] sm:$0xff] }
 0x48b   :  { %13205 = vmatpush3.msra.mxu1 %v15494_v31  ;;  %13163 = vmatprep.subr.mxu0 %v15536_v27  ;;  %v3762_v31 = vsub.f32 %v15844_v26, %v15867_v37  ;;  %v3769_v17 = vsub.f32 %v15860_v16, %v15887_v46  ;;  %v3783_v5 = vsub.f32 %v15882_v55, %v15915_v3 }
 0x48c   :  { %13206 = vmatprep.subr.mxu1 %v15518_v8  ;;  %13164 = vmatpush3.msra.mxu0 %v15536_v27  ;;  %v3776_v27 = vsub.f32 %v15874_v45, %v15903_v32 }
 0x48d   :  { %13207 = vmatpush3.msra.mxu1 %v15518_v8  ;;  %13165 = vmatprep.subr.mxu0 %v15557_v10  ;;  %v15918_v8 = vand.u32 4294901760, %v18580_v20  ;;  %v3763_v2 = vand.u32 4294901760, %v3762_v31  ;;  %v3784_v4 = vand.u32 4294901760, %v3783_v5  ;;  %v18591_v31 = vld [vmem:[#allocation23_spill] sm:$0xff] }
 0x48e   :  { %13208 = vmatprep.subr.mxu1 %v15540_v40  ;;  %13166 = vmatpush3.msra.mxu0 %v15557_v10  ;;  %v18583_v10 = vld [vmem:[#allocation21_spill] sm:$0xff]  ;;  %v3777_v48 = vand.u32 4294901760, %v3776_v27 }
 0x48f   :  { %13209 = vmatpush3.msra.mxu1 %v15540_v40  ;;  %13167 = vmatprep.subr.mxu0 %v15578_v60  ;;  %v15931_v40 = vand.u32 4294901760, %v15898_v38 }
 0x490   :  { %13210 = vmatprep.subr.mxu1 %v15563_v23  ;;  %13168 = vmatpush3.msra.mxu0 %v15578_v60  ;;  %v18584_v60 = vld [vmem:[#allocation8_spill] sm:$0xff] }
 0x491   :  { %13211 = vmatpush3.msra.mxu1 %v15563_v23  ;;  %13169 = vmatprep.subr.mxu0 %v15599_v39  ;;  %v3770_v23 = vand.u32 4294901760, %v3769_v17  ;;  %v16001_v17 = vand.u32 4294901760, %v18591_v31 }
 0x492   :  { %13212 = vmatprep.subr.mxu1 %v15584_v35  ;;  %13170 = vmatpush3.msra.mxu0 %v15599_v39  ;;  %v3790_v39 = vsub.f32 %v15898_v38, %v15931_v40 }
 0x493   :  { %13213 = vmatpush3.msra.mxu1 %v15584_v35  ;;  %13171 = vmatprep.subr.mxu0 %v15618_v56  ;;  %v15947_v35 = vand.u32 4294901760, %v18584_v60 }
 0x494   :  { %13214 = vmatprep.subr.mxu1 %v15603_v62  ;;  %13172 = vmatpush3.msra.mxu0 %v15618_v56  ;;  %v18586_v56 = vld [vmem:[#allocation18_spill] sm:$0xff]  ;;  %v3791_v6 = vand.u32 4294901760, %v3790_v39  ;;  %v18593_v39 = vld [vmem:[#allocation20_spill] sm:$0xff] }
 0x495   :  { %13215 = vmatpush3.msra.mxu1 %v15603_v62  ;;  %13173 = vmatprep.subr.mxu0 %v15631_v34  ;;  %v18585_v62 = vld [vmem:[#allocation12_spill] sm:$0xff]  ;;  %v15978_v53 = vsub.f32 %v18584_v60, %v15947_v35  ;;  %v3818_v60 = vsub.f32 %v15965_v33, %v15998_v47 }
 0x496   :  { %13216 = vmatprep.subr.mxu1 %v15621_v29  ;;  %13174 = vmatpush3.msra.mxu0 %v15631_v34  ;;  %v18587_v34 = vld [vmem:[#allocation9_spill] sm:$0xff] }
 0x497   :  { %13217 = vmatpush3.msra.mxu1 %v15621_v29  ;;  %13175 = vmatprep.subr.mxu0 %v15644_v36  ;;  %v15970_v29 = vand.u32 4294901760, %v15938_v12  ;;  %v16012_v27 = vand.u32 4294901760, %v15978_v53 }
 0x498   :  { %13218 = vmatprep.subr.mxu1 %v15634_v50  ;;  %13176 = vmatpush3.msra.mxu0 %v15644_v36  ;;  %v18588_v36 = vld [vmem:[#allocation7_spill] sm:$0xff] }
 0x499   :  { %13219 = vmatpush3.msra.mxu1 %v15634_v50  ;;  %13177 = vmatprep.subr.mxu0 %v15656_v61  ;;  %v15974_v50 = vand.u32 4294901760, %v18587_v34  ;;  %v3804_v7 = vsub.f32 %v15938_v12, %v15970_v29 }
 0x49a   :  { %13220 = vmatprep.subr.mxu1 %v15646_v52  ;;  %13178 = vmatpush3.msra.mxu0 %v15656_v61 }
 0x49b   :  { %13221 = vmatpush3.msra.mxu1 %v15646_v52  ;;  %13179 = vmatprep.subr.mxu0 %v18581_v24  ;;  %v15951_v52 = vsub.f32 %v18580_v20, %v15918_v8  ;;  %v16006_v20 = vsub.f32 %v18587_v34, %v15974_v50  ;;  %v3805_v5 = vand.u32 4294901760, %v3804_v7 }
 0x49c   :  { %13222 = vmatprep.subr.mxu1 %v15658_v30  ;;  %13180 = vmatpush3.msra.mxu0 %v18581_v24 }
 0x49d   :  { %13223 = vmatpush3.msra.mxu1 %v15658_v30  ;;  %13181 = vmatprep.subr.mxu0 %v18583_v10  ;;  %v15961_v30 = vand.u32 4294901760, %v18585_v62  ;;  %v15984_v61 = vand.u32 4294901760, %v15951_v52  ;;  %v16041_v34 = vand.u32 4294901760, %v16006_v20 }
 0x49e   :  { %13225 = vmatmul.mubr.f32.vlgmr.msra.gmra.mxu1 %v15721_v43  ;;  %13262 = vmatprep.subr.mxu1 %v3763_v2 }
 0x49f   :  { %13182 = vmatpush3.msra.mxu0 %v18583_v10  ;;  %13263 = vmatpush3.msra.mxu1 %v3763_v2  ;;  %v15992_v54 = vsub.f32 %v18585_v62, %v15961_v30  ;;  %v3798_v2 = vand.u32 4294901760, %v3797_v9  ;;  %v3811_v24 = vsub.f32 %v15951_v52, %v15984_v61  ;;  %v16015_v10 = vand.u32 4294901760, %v18592_v18 }
 0x4a0   :  { %13294 = vmatprep.mubr.f32.mxu1 %v15715_v58  ;;  %13183 = vmatprep.subr.mxu0 %v18586_v56  ;;  %v16030_v62 = vand.u32 4294901760, %v18593_v39  ;;  %v3819_v9 = vand.u32 4294901760, %v3818_v60 }
 0x4a1   :  { %13264 = vmatprep.subr.mxu1 %v3770_v23  ;;  %13184 = vmatpush3.msra.mxu0 %v18586_v56  ;;  %v16035_v56 = vsub.f32 %v18591_v31, %v16001_v17  ;;  %v3839_v31 = vsub.f32 %v16006_v20, %v16041_v34 }
 0x4a2   :  { %13265 = vmatpush3.msra.mxu1 %v3770_v23  ;;  %13185 = vmatprep.subr.mxu0 %v18588_v36  ;;  %v16020_v23 = vsub.f32 %v18589_v11, %v15988_v28 }
 0x4a3   :  { %13266 = vmatprep.subr.mxu1 %v3777_v48  ;;  %13186 = vmatpush3.msra.mxu0 %v18588_v36  ;;  %v16046_v36 = vsub.f32 %v18592_v18, %v16015_v10  ;;  %v3840_v60 = vand.u32 4294901760, %v3839_v31 }
 0x4a4   :  { %13267 = vmatpush3.msra.mxu1 %v3777_v48  ;;  %13187 = vmatprep.subr.mxu0 %v18590_v59  ;;  %v16027_v48 = vand.u32 4294901760, %v15992_v54  ;;  %v16052_v11 = vand.u32 4294901760, %v16020_v23 }
 0x4a5   :  { %13268 = vmatprep.subr.mxu1 %v3784_v4  ;;  %13188 = vmatpush3.msra.mxu0 %v18590_v59  ;;  %v16057_v59 = vsub.f32 %v18593_v39, %v16030_v62 }
 0x4a6   :  { %13269 = vmatpush3.msra.mxu1 %v3784_v4  ;;  %13190 = vmatmul.mubr.f32.vlgmr.msra.gmra.mxu0 %v15721_v43  ;;  %v3825_v4 = vsub.f32 %v15978_v53, %v16012_v27  ;;  %v3846_v18 = vsub.f32 %v16020_v23, %v16052_v11 }
 0x4a7   :  { %13227 = vmatprep.subr.mxu0 %v15829_v15  ;;  %13270 = vmatprep.subr.mxu1 %v3791_v6 }
 0x4a8   :  { %13228 = vmatpush3.msra.mxu0 %v15829_v15  ;;  %13259 = vmatprep.mubr.f32.mxu0 %v15735_v41  ;;  %v3812_v41 = vand.u32 4294901760, %v3811_v24  ;;  %v3826_v7 = vand.u32 4294901760, %v3825_v4  ;;  %v3847_v4 = vand.u32 4294901760, %v3846_v18 }
 0x4a9   :  { %13271 = vmatpush3.msra.mxu1 %v3791_v6  ;;  %13229 = vmatprep.subr.mxu0 %v15838_v25  ;;  %v3832_v6 = vsub.f32 %v15992_v54, %v16027_v48 }
 0x4aa   :  { %13272 = vmatprep.subr.mxu1 %v3798_v2  ;;  %13230 = vmatpush3.msra.mxu0 %v15838_v25 }
 0x4ab   :  { %13273 = vmatpush3.msra.mxu1 %v3798_v2  ;;  %13231 = vmatprep.subr.mxu0 %v15849_v14  ;;  %v16063_v2 = vand.u32 4294901760, %v16035_v56  ;;  %v3833_v24 = vand.u32 4294901760, %v3832_v6 }
 0x4ac   :  { %13274 = vmatprep.subr.mxu1 %v3805_v5  ;;  %13232 = vmatpush3.msra.mxu0 %v15849_v14 }
 0x4ad   :  { %13275 = vmatpush3.msra.mxu1 %v3805_v5  ;;  %13233 = vmatprep.subr.mxu0 %v15856_v49  ;;  %v16070_v5 = vand.u32 4294901760, %v16046_v36  ;;  %v3853_v39 = vsub.f32 %v16035_v56, %v16063_v2 }
 0x4ae   :  { %13276 = vmatprep.subr.mxu1 %v3812_v41  ;;  %13234 = vmatpush3.msra.mxu0 %v15856_v49 }
 0x4af   :  { %13277 = vmatpush3.msra.mxu1 %v3812_v41  ;;  %13235 = vmatprep.subr.mxu0 %v15870_v44  ;;  %v16077_v41 = vand.u32 4294901760, %v16057_v59  ;;  %v3854_v6 = vand.u32 4294901760, %v3853_v39 }
 0x4b0   :  { %13278 = vmatprep.subr.mxu1 %v3819_v9  ;;  %13236 = vmatpush3.msra.mxu0 %v15870_v44 }
 0x4b1   :  { %13279 = vmatpush3.msra.mxu1 %v3819_v9  ;;  %13237 = vmatprep.subr.mxu0 %v15890_v21  ;;  %v3860_v9 = vsub.f32 %v16046_v36, %v16070_v5  ;;  %v3867_v31 = vsub.f32 %v16057_v59, %v16077_v41 }
 0x4b2   :  { %13280 = vmatprep.subr.mxu1 %v3826_v7  ;;  %13238 = vmatpush3.msra.mxu0 %v15890_v21 }
 0x4b3   :  { %13281 = vmatpush3.msra.mxu1 %v3826_v7  ;;  %13239 = vmatprep.subr.mxu0 %v15906_v0  ;;  %v3861_v7 = vand.u32 4294901760, %v3860_v9 }
 0x4b4   :  { %13282 = vmatprep.subr.mxu1 %v3833_v24  ;;  %13240 = vmatpush3.msra.mxu0 %v15906_v0 }
 0x4b5   :  { %13283 = vmatpush3.msra.mxu1 %v3833_v24  ;;  %13241 = vmatprep.subr.mxu0 %v15918_v8  ;;  %v3868_v24 = vand.u32 4294901760, %v3867_v31 }
 0x4b6   :  { %13284 = vmatprep.subr.mxu1 %v3840_v60  ;;  %13242 = vmatpush3.msra.mxu0 %v15918_v8 }
 0x4b7   :  { %13285 = vmatpush3.msra.mxu1 %v3840_v60  ;;  %13243 = vmatprep.subr.mxu0 %v15934_v51 }
 0x4b8   :  { %13286 = vmatprep.subr.mxu1 %v3847_v4  ;;  %13244 = vmatpush3.msra.mxu0 %v15934_v51 }
 0x4b9   :  { %13287 = vmatpush3.msra.mxu1 %v3847_v4  ;;  %13245 = vmatprep.subr.mxu0 %v15947_v35 }
 0x4ba   :  { %13288 = vmatprep.subr.mxu1 %v3854_v6  ;;  %13246 = vmatpush3.msra.mxu0 %v15947_v35 }
 0x4bb   :  { %13289 = vmatpush3.msra.mxu1 %v3854_v6  ;;  %13247 = vmatprep.subr.mxu0 %v15961_v30 }
 0x4bc   :  { %13290 = vmatprep.subr.mxu1 %v3861_v7  ;;  %13248 = vmatpush3.msra.mxu0 %v15961_v30 }
 0x4bd   :  { %13291 = vmatpush3.msra.mxu1 %v3861_v7  ;;  %13249 = vmatprep.subr.mxu0 %v15974_v50 }
 0x4be   :  { %13292 = vmatprep.subr.mxu1 %v3868_v24  ;;  %13250 = vmatpush3.msra.mxu0 %v15974_v50 }
 0x4bf   :  { %13293 = vmatpush3.msra.mxu1 %v3868_v24  ;;  %13251 = vmatprep.subr.mxu0 %v15988_v28 }
 0x4c0   :  { %13295 = vmatmul.mubr.f32.vlgmr.msra.gmra.mxu1 %v15721_v43  ;;  %13332 = vmatprep.subr.mxu1 %v15829_v15 }
 0x4c1   :  { %13252 = vmatpush3.msra.mxu0 %v15988_v28  ;;  %13333 = vmatpush3.msra.mxu1 %v15829_v15 }
 0x4c2   :  { %13364 = vmatprep.mubr.f32.mxu1 %v15724_v22  ;;  %13253 = vmatprep.subr.mxu0 %v16001_v17  ;;  %v566_v22 = vld [vmem:[%s18463_s1 + $0x30] sm:$0xff] }
 0x4c3   :  { %13334 = vmatprep.subr.mxu1 %v15838_v25  ;;  %13254 = vmatpush3.msra.mxu0 %v16001_v17 }
 0x4c4   :  { %13335 = vmatpush3.msra.mxu1 %v15838_v25  ;;  %13255 = vmatprep.subr.mxu0 %v16015_v10 }
 0x4c5   :  { %13336 = vmatprep.subr.mxu1 %v15849_v14  ;;  %13256 = vmatpush3.msra.mxu0 %v16015_v10 }
 0x4c6   :  { %13337 = vmatpush3.msra.mxu1 %v15849_v14  ;;  %13257 = vmatprep.subr.mxu0 %v16030_v62 }
 0x4c7   :  { %13338 = vmatprep.subr.mxu1 %v15856_v49  ;;  %13258 = vmatpush3.msra.mxu0 %v16030_v62 }
 0x4c8   :  { %13339 = vmatpush3.msra.mxu1 %v15856_v49  ;;  %13260 = vmatmul.mubr.f32.vlgmr.msra.gmra.mxu0 %v15747_v57  ;;  %v16254_v57 = vand.u32 4294901760, %v566_v22 }
 0x4c9   :  { %13297 = vmatprep.subr.mxu0 %v15844_v26  ;;  %13340 = vmatprep.subr.mxu1 %v15870_v44 }
 0x4ca   :  { %13298 = vmatpush3.msra.mxu0 %v15844_v26  ;;  %13329 = vmatprep.mubr.f32.mxu0 %v15719_v42  ;;  %v567_v42 = vld [vmem:[%s18463_s1 + $0x38] sm:$0xff] }
 0x4cb   :  { %13341 = vmatpush3.msra.mxu1 %v15870_v44  ;;  %13299 = vmatprep.subr.mxu0 %v15860_v16 }
 0x4cc   :  { %13342 = vmatprep.subr.mxu1 %v15890_v21  ;;  %13300 = vmatpush3.msra.mxu0 %v15860_v16 }
 0x4cd   :  { %13343 = vmatpush3.msra.mxu1 %v15890_v21  ;;  %13301 = vmatprep.subr.mxu0 %v15874_v45 }
 0x4ce   :  { %13344 = vmatprep.subr.mxu1 %v15906_v0  ;;  %13302 = vmatpush3.msra.mxu0 %v15874_v45 }
 0x4cf   :  { %13345 = vmatpush3.msra.mxu1 %v15906_v0  ;;  %13303 = vmatprep.subr.mxu0 %v15882_v55 }
 0x4d0   :  { %13346 = vmatprep.subr.mxu1 %v15918_v8  ;;  %13304 = vmatpush3.msra.mxu0 %v15882_v55 }
 0x4d1   :  { %13347 = vmatpush3.msra.mxu1 %v15918_v8  ;;  %13305 = vmatprep.subr.mxu0 %v15898_v38 }
 0x4d2   :  { %13348 = vmatprep.subr.mxu1 %v15934_v51  ;;  %13306 = vmatpush3.msra.mxu0 %v15898_v38 }
 0x4d3   :  { %13349 = vmatpush3.msra.mxu1 %v15934_v51  ;;  %13307 = vmatprep.subr.mxu0 %v15922_v13 }
 0x4d4   :  { %13350 = vmatprep.subr.mxu1 %v15947_v35  ;;  %13308 = vmatpush3.msra.mxu0 %v15922_v13 }
 0x4d5   :  { %13351 = vmatpush3.msra.mxu1 %v15947_v35  ;;  %13309 = vmatprep.subr.mxu0 %v15938_v12 }
 0x4d6   :  { %13352 = vmatprep.subr.mxu1 %v15961_v30  ;;  %13310 = vmatpush3.msra.mxu0 %v15938_v12 }
 0x4d7   :  { %13353 = vmatpush3.msra.mxu1 %v15961_v30  ;;  %13311 = vmatprep.subr.mxu0 %v15951_v52 }
 0x4d8   :  { %13354 = vmatprep.subr.mxu1 %v15974_v50  ;;  %13312 = vmatpush3.msra.mxu0 %v15951_v52 }
 0x4d9   :  { %13355 = vmatpush3.msra.mxu1 %v15974_v50  ;;  %13313 = vmatprep.subr.mxu0 %v15965_v33 }
 0x4da   :  { %13356 = vmatprep.subr.mxu1 %v15988_v28  ;;  %13314 = vmatpush3.msra.mxu0 %v15965_v33 }
 0x4db   :  { %13357 = vmatpush3.msra.mxu1 %v15988_v28  ;;  %13315 = vmatprep.subr.mxu0 %v15978_v53 }
 0x4dc   :  { %13358 = vmatprep.subr.mxu1 %v16001_v17  ;;  %13316 = vmatpush3.msra.mxu0 %v15978_v53 }
 0x4dd   :  { %13359 = vmatpush3.msra.mxu1 %v16001_v17  ;;  %13317 = vmatprep.subr.mxu0 %v15992_v54 }
 0x4de   :  { %13360 = vmatprep.subr.mxu1 %v16015_v10  ;;  %13318 = vmatpush3.msra.mxu0 %v15992_v54 }
 0x4df   :  { %13361 = vmatpush3.msra.mxu1 %v16015_v10  ;;  %13319 = vmatprep.subr.mxu0 %v16006_v20 }
 0x4e0   :  { %13362 = vmatprep.subr.mxu1 %v16030_v62  ;;  %13320 = vmatpush3.msra.mxu0 %v16006_v20 }
 0x4e1   :  { %13363 = vmatpush3.msra.mxu1 %v16030_v62  ;;  %13321 = vmatprep.subr.mxu0 %v16020_v23 }
 0x4e2   :  { %13365 = vmatmul.mubr.f32.vlgmr.msra.gmra.mxu1 %v15738_v1  ;;  %13402 = vmatprep.subr.mxu1 %v15829_v15  ;;  %v16252_v1 = vand.u32 4294901760, %v567_v42 }
 0x4e3   :  { %13322 = vmatpush3.msra.mxu0 %v16020_v23  ;;  %13403 = vmatpush3.msra.mxu1 %v15829_v15 }
 0x4e4   :  { %13434 = vmatprep.mubr.f32.mxu1 %v15715_v58  ;;  %13323 = vmatprep.subr.mxu0 %v16035_v56  ;;  %v16265_v26 = vsub.f32 %v567_v42, %v16252_v1 }
 0x4e5   :  { %13404 = vmatprep.subr.mxu1 %v15838_v25  ;;  %13324 = vmatpush3.msra.mxu0 %v16035_v56 }
 0x4e6   :  { %13405 = vmatpush3.msra.mxu1 %v15838_v25  ;;  %13325 = vmatprep.subr.mxu0 %v16046_v36 }
 0x4e7   :  { %13406 = vmatprep.subr.mxu1 %v15849_v14  ;;  %13326 = vmatpush3.msra.mxu0 %v16046_v36 }
 0x4e8   :  { %13407 = vmatpush3.msra.mxu1 %v15849_v14  ;;  %13327 = vmatprep.subr.mxu0 %v16057_v59  ;;  %v16268_v14 = vsub.f32 %v566_v22, %v16254_v57 }
 0x4e9   :  { %13408 = vmatprep.subr.mxu1 %v15856_v49  ;;  %13328 = vmatpush3.msra.mxu0 %v16057_v59 }
 0x4ea   :  { %13409 = vmatpush3.msra.mxu1 %v15856_v49  ;;  %13330 = vmatmul.mubr.f32.vlgmr.msra.gmra.mxu0 %v15727_v63 }
 0x4eb   :  { %13367 = vmatprep.subr.mxu0 %v15867_v37  ;;  %13410 = vmatprep.subr.mxu1 %v15870_v44 }
 0x4ec   :  { %13368 = vmatpush3.msra.mxu0 %v15867_v37  ;;  %13399 = vmatprep.mubr.f32.mxu0 %v15715_v58  ;;  %v568_v58 = vld [vmem:[%s18463_s1 + $0x40] sm:$0xff]  ;;  %v16279_v37 = vand.u32 4294901760, %v16265_v26 }
 0x4ed   :  { %13411 = vmatpush3.msra.mxu1 %v15870_v44  ;;  %13369 = vmatprep.subr.mxu0 %v15887_v46  ;;  %v16250_v63 = vand.u32 4294901760, %v568_v58  ;;  %v16282_v44 = vand.u32 4294901760, %v16268_v14 }
 0x4ee   :  { %13412 = vmatprep.subr.mxu1 %v15890_v21  ;;  %13370 = vmatpush3.msra.mxu0 %v15887_v46  ;;  %v4481_v46 = vsub.f32 %v16265_v26, %v16279_v37 }
 0x4ef   :  { %13413 = vmatpush3.msra.mxu1 %v15890_v21  ;;  %13371 = vmatprep.subr.mxu0 %v15903_v32  ;;  %v16262_v25 = vsub.f32 %v568_v58, %v16250_v63  ;;  %v4488_v21 = vsub.f32 %v16268_v14, %v16282_v44 }
 0x4f0   :  { %13414 = vmatprep.subr.mxu1 %v15906_v0  ;;  %13372 = vmatpush3.msra.mxu0 %v15903_v32  ;;  %v4482_v32 = vand.u32 4294901760, %v4481_v46 }
 0x4f1   :  { %13415 = vmatpush3.msra.mxu1 %v15906_v0  ;;  %13373 = vmatprep.subr.mxu0 %v15915_v3  ;;  %v16276_v16 = vand.u32 4294901760, %v16262_v25 }
 0x4f2   :  { %13416 = vmatprep.subr.mxu1 %v15918_v8  ;;  %13374 = vmatpush3.msra.mxu0 %v15915_v3  ;;  %v4489_v3 = vand.u32 4294901760, %v4488_v21 }
 0x4f3   :  { %13417 = vmatpush3.msra.mxu1 %v15918_v8  ;;  %13375 = vmatprep.subr.mxu0 %v15931_v40  ;;  %v4474_v55 = vsub.f32 %v16262_v25, %v16276_v16 }
 0x4f4   :  { %13418 = vmatprep.subr.mxu1 %v15934_v51  ;;  %13376 = vmatpush3.msra.mxu0 %v15931_v40 }
 0x4f5   :  { %13419 = vmatpush3.msra.mxu1 %v15934_v51  ;;  %13377 = vmatprep.subr.mxu0 %v15955_v19  ;;  %v4475_v38 = vand.u32 4294901760, %v4474_v55 }
 0x4f6   :  { %13420 = vmatprep.subr.mxu1 %v15947_v35  ;;  %13378 = vmatpush3.msra.mxu0 %v15955_v19 }
 0x4f7   :  { %13421 = vmatpush3.msra.mxu1 %v15947_v35  ;;  %13379 = vmatprep.subr.mxu0 %v15970_v29 }
 0x4f8   :  { %13422 = vmatprep.subr.mxu1 %v15961_v30  ;;  %13380 = vmatpush3.msra.mxu0 %v15970_v29 }
 0x4f9   :  { %13423 = vmatpush3.msra.mxu1 %v15961_v30  ;;  %13381 = vmatprep.subr.mxu0 %v15984_v61 }
 0x4fa   :  { %13424 = vmatprep.subr.mxu1 %v15974_v50  ;;  %13382 = vmatpush3.msra.mxu0 %v15984_v61 }
 0x4fb   :  { %13425 = vmatpush3.msra.mxu1 %v15974_v50  ;;  %13383 = vmatprep.subr.mxu0 %v15998_v47 }
 0x4fc   :  { %13426 = vmatprep.subr.mxu1 %v15988_v28  ;;  %13384 = vmatpush3.msra.mxu0 %v15998_v47 }
 0x4fd   :  { %13427 = vmatpush3.msra.mxu1 %v15988_v28  ;;  %13385 = vmatprep.subr.mxu0 %v16012_v27 }
 0x4fe   :  { %13428 = vmatprep.subr.mxu1 %v16001_v17  ;;  %13386 = vmatpush3.msra.mxu0 %v16012_v27 }
 0x4ff   :  { %13429 = vmatpush3.msra.mxu1 %v16001_v17  ;;  %13387 = vmatprep.subr.mxu0 %v16027_v48 }
 0x500   :  { %13430 = vmatprep.subr.mxu1 %v16015_v10  ;;  %13388 = vmatpush3.msra.mxu0 %v16027_v48 }
 0x501   :  { %13431 = vmatpush3.msra.mxu1 %v16015_v10  ;;  %13389 = vmatprep.subr.mxu0 %v16041_v34 }
 0x502   :  { %13432 = vmatprep.subr.mxu1 %v16030_v62  ;;  %13390 = vmatpush3.msra.mxu0 %v16041_v34 }
 0x503   :  { %13433 = vmatpush3.msra.mxu1 %v16030_v62  ;;  %13391 = vmatprep.subr.mxu0 %v16052_v11 }
 0x504   :  { %13435 = vmatmul.mubr.f32.vlgmr.msra.gmra.mxu1 %v15721_v43  ;;  %13392 = vmatpush3.msra.mxu0 %v16052_v11 }
 0x505   :  { %13393 = vmatprep.subr.mxu0 %v16063_v2  ;;  %13448 = vmatprep.subr.mxu1 %v4475_v38 }
 0x506   :  { %13394 = vmatpush3.msra.mxu0 %v16063_v2  ;;  %13449 = vmatpush3.msra.mxu1 %v4475_v38 }
 0x507   :  { %13395 = vmatprep.subr.mxu0 %v16070_v5  ;;  %13450 = vmatprep.subr.mxu1 %v4482_v32 }
 0x508   :  { %13396 = vmatpush3.msra.mxu0 %v16070_v5  ;;  %13451 = vmatpush3.msra.mxu1 %v4482_v32 }
 0x509   :  { %13397 = vmatprep.subr.mxu0 %v16077_v41  ;;  %13452 = vmatprep.subr.mxu1 %v4489_v3 }
 0x50a   :  { %13398 = vmatpush3.msra.mxu0 %v16077_v41  ;;  %13453 = vmatpush3.msra.mxu1 %v4489_v3 }
 0x50b   :  { %13400 = vmatmul.mubr.f32.vlgmr.msra.gmra.mxu0 %v15721_v43  ;;  %v565_v43 = vld [vmem:[%s18463_s1 + $0x28] sm:$0xff]  ;;  %13437 = vmatprep.subr.mxu0 %v16250_v63 }
 0x50c   :  { %v16259_v15 = vand.u32 4294901760, %v565_v43  ;;  %13438 = vmatpush3.msra.mxu0 %v16250_v63 }
 0x50d   :  { %13439 = vmatprep.subr.mxu0 %v16252_v1 }
 0x50e   :  { %v16272_v49 = vsub.f32 %v565_v43, %v16259_v15  ;;  %13440 = vmatpush3.msra.mxu0 %v16252_v1 }
 0x50f   :  { %13441 = vmatprep.subr.mxu0 %v16254_v57 }
 0x510   :  { %v16286_v45 = vand.u32 4294901760, %v16272_v49  ;;  %13442 = vmatpush3.msra.mxu0 %v16254_v57 }
 0x511   :  { %13443 = vmatprep.subr.mxu0 %v16259_v15 }
 0x512   :  { %v4495_v0 = vsub.f32 %v16272_v49, %v16286_v45  ;;  %13444 = vmatpush3.msra.mxu0 %v16259_v15 }
 0x513   :  { %13459 = vmatprep.subr.mxu0 %v16262_v25 }
 0x514   :  { %v4496_v8 = vand.u32 4294901760, %v4495_v0 }
 0x516   :  { %13454 = vmatprep.subr.mxu1 %v4496_v8 }
 0x517   :  { %13455 = vmatpush3.msra.mxu1 %v4496_v8 }
 0x518   :  { %13470 = vmatprep.subr.mxu1 %v16250_v63 }
 0x51b   :  { %v13086_v40 = vpop.f32.mrf.mxu1 }
 0x51d   :  { %v3221_v35 = vpop.f32.mrf.mxu1 }
 0x523   :  { %v13051_v13 = vpop.f32.mrf.mxu0 }
 0x524   :  { %v3228_v9 = vadd.f32 %v13086_v40, %v13051_v13 }
 0x525   :  { %v3060_v51 = vpop.f32.mrf.mxu0 }
 0x526   :  { %v3222_v31 = vadd.f32 %v3221_v35, %v3060_v51 }
 0x53c   :  { %v13156_v52 = vpop.f32.mrf.mxu1 }
 0x53e   :  { %v3427_v33 = vpop.f32.mrf.mxu1 }
 0x544   :  { %v13121_v12 = vpop.f32.mrf.mxu0 }
 0x545   :  { %v3339_v7 = vadd.f32 %v13121_v12, %v3228_v9 }
 0x546   :  { %v3331_v19 = vpop.f32.mrf.mxu0 }
 0x547   :  { %v3332_v24 = vadd.f32 %v3331_v19, %v3222_v31  ;;  %v3436_v58 = vadd.f32 %v13156_v52, %v3339_v7 }
 0x549   :  { %v3428_v22 = vadd.f32 %v3427_v33, %v3332_v24  ;;  %v4931_v24 = vld [vmem:[%s18463_s1 + $0x68] sm:$0xff] }
 0x55e   :  { %v13226_v29 = vpop.f32.mrf.mxu1 }
 0x560   :  { %v3647_v61 = vpop.f32.mrf.mxu1 }
 0x566   :  { %v13191_v30 = vpop.f32.mrf.mxu0 }
 0x567   :  { %v3561_v42 = vadd.f32 %v13191_v30, %v3436_v58  ;;  %v4930_v58 = vld [vmem:[%s18463_s1 + $0x60] sm:$0xff] }
 0x568   :  { %v3554_v50 = vpop.f32.mrf.mxu0 }
 0x569   :  { %v3555_v43 = vadd.f32 %v3554_v50, %v3428_v22  ;;  %v3654_v55 = vadd.f32 %v13226_v29, %v3561_v42  ;;  %v4929_v42 = vld [vmem:[%s18463_s1 + $0x58] sm:$0xff]  ;;  %v16361_v22 = vand.u32 4294901760, %v4931_v24 }
 0x56b   :  { %v3648_v21 = vadd.f32 %v3647_v61, %v3555_v43  ;;  %v16363_v43 = vand.u32 4294901760, %v4930_v58 }
 0x580   :  { %v13296_v28 = vpop.f32.mrf.mxu1 }
 0x582   :  { %v3905_v17 = vpop.f32.mrf.mxu1 }
 0x588   :  { %v13261_v53 = vpop.f32.mrf.mxu0 }
 0x589   :  { %v3912_v20 = vadd.f32 %v13296_v28, %v13261_v53 }
 0x58a   :  { %v3744_v54 = vpop.f32.mrf.mxu0 }
 0x58b   :  { %v3906_v23 = vadd.f32 %v3905_v17, %v3744_v54 }
 0x5a2   :  { %v13366_v27 = vpop.f32.mrf.mxu1 }
 0x5a4   :  { %v4111_v56 = vpop.f32.mrf.mxu1 }
 0x5aa   :  { %v13331_v47 = vpop.f32.mrf.mxu0 }
 0x5ab   :  { %v4023_v48 = vadd.f32 %v13331_v47, %v3912_v20 }
 0x5ac   :  { %v4015_v10 = vpop.f32.mrf.mxu0 }
 0x5ad   :  { %v4016_v62 = vadd.f32 %v4015_v10, %v3906_v23  ;;  %v4120_v34 = vadd.f32 %v13366_v27, %v4023_v48 }
 0x5af   :  { %v4112_v2 = vadd.f32 %v4111_v56, %v4016_v62  ;;  %v14629_v56 = vld [vmem:[%s18462_s0 + $0x8] sm:$0xff] }
 0x5c4   :  { %v13436_v36 = vpop.f32.mrf.mxu1 }
 0x5c6   :  { %v4331_v39 = vpop.f32.mrf.mxu1 }
 0x5cb   :  { %v13401_v11 = vpop.f32.mrf.mxu0 }
 0x5cc   :  { %v4245_v59 = vadd.f32 %v13401_v11, %v4120_v34  ;;  %v14630_v11 = vld [vmem:[%s18462_s0] sm:$0xff] }
 0x5cd   :  { %v4238_v18 = vpop.f32.mrf.mxu0 }
 0x5ce   :  { %v4338_v5 = vadd.f32 %v13436_v36, %v4245_v59  ;;  %v4239_v60 = vadd.f32 %v4238_v18, %v4112_v2 }
 0x5d0   :  { %v4342_v41 = vmax.f32 %v4338_v5, 1.1754944e-38  ;;  %v4332_v4 = vadd.f32 %v4331_v39, %v4239_v60 }
 0x5d2   :  { %14605 = vrcp.f32 %v4342_v41  ;;  %v4341_v6 = vmax.f32 %v4332_v4, 1.1754944e-38 }
 0x5d4   :  { %14607 = vrcp.f32 %v4341_v6 }
 0x5df   :  { %v14606_v46 = vpop.eup %14605 }
 0x5e0   :  { %v4346_v38 = vmul.f32 %v14606_v46, %v3654_v55  ;;  %v16365_v55 = vand.u32 4294901760, %v4929_v42  ;;  %v16368_v46 = vsub.f32 %v4931_v24, %v16361_v22 }
 0x5e1   :  { %v14608_v32 = vpop.eup %14607 }
 0x5e2   :  { %v4344_v0 = vmul.f32 %v14608_v32, %v3648_v21  ;;  %v4355_v3 = vsel %vm28_vm0, %v4346_v38, 0  ;;  %v16371_v21 = vsub.f32 %v4930_v58, %v16363_v43  ;;  %v16374_v38 = vsub.f32 %v4929_v42, %v16365_v55 }
 0x5e3   :  { %v4436_v8 = vand.u32 4294901760, %v4355_v3  ;;  %v16379_v32 = vand.u32 4294901760, %v16368_v46 }
 0x5e4   :  { %v4352_v13 = vsel %vm28_vm0, %v4344_v0, 0  ;;  %v16382_v0 = vand.u32 4294901760, %v16371_v21 }
 0x5e5   :  { %v4426_v40 = vand.u32 4294901760, %v4352_v13  ;;  %v4437_v51 = vsub.f32 %v4355_v3, %v4436_v8  ;;  %v16385_v3 = vand.u32 4294901760, %v16374_v38 }
 0x5e7   :  { %13456 = vmatprep.mubr.f32.mxu1 %v4426_v40  ;;  %v4427_v12 = vsub.f32 %v4352_v13, %v4426_v40  ;;  %v4438_v35 = vand.u32 4294901760, %v4437_v51  ;;  %v5067_v13 = vsub.f32 %v16371_v21, %v16382_v0 }
 0x5e8   :  { %13457 = vmatmul.mubr.f32.vlgmr.msra.gmra.mxu1 %v4436_v8 }
 0x5e9   :  { %13471 = vmatpush3.msra.mxu1 %v16250_v63  ;;  %v4428_v52 = vand.u32 4294901760, %v4427_v12  ;;  %v4439_v30 = vsub.f32 %v4437_v51, %v4438_v35 }
 0x5ea   :  { %13472 = vmatprep.subr.mxu1 %v16252_v1 }
 0x5eb   :  { %13473 = vmatpush3.msra.mxu1 %v16252_v1  ;;  %13478 = vmatprep.mubr.f32.mxu1 %v4428_v52  ;;  %v4429_v19 = vsub.f32 %v4427_v12, %v4428_v52  ;;  %v4440_v29 = vand.u32 4294901760, %v4439_v30 }
 0x5ec   :  { %13474 = vmatprep.subr.mxu1 %v16254_v57 }
 0x5ed   :  { %13475 = vmatpush3.msra.mxu1 %v16254_v57  ;;  %v4430_v33 = vand.u32 4294901760, %v4429_v19 }
 0x5ee   :  { %13476 = vmatprep.subr.mxu1 %v16259_v15 }
 0x5ef   :  { %13477 = vmatpush3.msra.mxu1 %v16259_v15  ;;  %13445 = vmatprep.mubr.f32.mxu0 %v4430_v33 }
 0x5f0   :  { %13479 = vmatmul.mubr.f32.vlgmr.msra.gmra.mxu1 %v4438_v35  ;;  %13492 = vmatprep.subr.mxu1 %v16250_v63  ;;  %v4928_v35 = vld [vmem:[%s18463_s1 + $0x50] sm:$0xff] }
 0x5f1   :  { %13446 = vmatmul.mubr.f32.vlgmr.msra.gmra.mxu0 %v4440_v29  ;;  %13493 = vmatpush3.msra.mxu1 %v16250_v63  ;;  %v16400_v52 = vand.u32 4294901760, %v4928_v35 }
 0x5f2   :  { %13460 = vmatpush3.msra.mxu0 %v16262_v25  ;;  %13500 = vmatprep.mubr.f32.mxu1 %v4426_v40 }
 0x5f3   :  { %13461 = vmatprep.subr.mxu0 %v16265_v26  ;;  %13467 = vmatprep.mubr.f32.mxu0 %v4427_v12  ;;  %v5068_v12 = vand.u32 4294901760, %v5067_v13  ;;  %v16403_v30 = vsub.f32 %v4928_v35, %v16400_v52 }
 0x5f4   :  { %13494 = vmatprep.subr.mxu1 %v16252_v1  ;;  %13462 = vmatpush3.msra.mxu0 %v16265_v26 }
 0x5f5   :  { %13495 = vmatpush3.msra.mxu1 %v16252_v1  ;;  %13463 = vmatprep.subr.mxu0 %v16268_v14  ;;  %v11577_v1 = vld [vmem:[%s18463_s1 + $0x48] ss:$0 sm:$0xff]  ;;  %v16408_v33 = vand.u32 4294901760, %v16403_v30 }
 0x5f6   :  { %13496 = vmatprep.subr.mxu1 %v16254_v57  ;;  %13464 = vmatpush3.msra.mxu0 %v16268_v14 }
 0x5f7   :  { %13497 = vmatpush3.msra.mxu1 %v16254_v57  ;;  %13465 = vmatprep.subr.mxu0 %v16272_v49  ;;  %v5081_v29 = vsub.f32 %v16403_v30, %v16408_v33 }
 0x5f8   :  { %13498 = vmatprep.subr.mxu1 %v16259_v15  ;;  %13466 = vmatpush3.msra.mxu0 %v16272_v49 }
 0x5f9   :  { %13499 = vmatpush3.msra.mxu1 %v16259_v15  ;;  %13468 = vmatmul.mubr.f32.vlgmr.msra.gmra.mxu0 %v4437_v51 }
 0x5fa   :  { %13481 = vmatprep.subr.mxu0 %v16276_v16  ;;  %13501 = vmatmul.mubr.f32.vlgmr.msra.gmra.mxu1 %v4436_v8 }
 0x5fb   :  { %13482 = vmatpush3.msra.mxu0 %v16276_v16  ;;  %13489 = vmatprep.mubr.f32.mxu0 %v4426_v40  ;;  %v5074_v40 = vsub.f32 %v16374_v38, %v16385_v3 }
 0x5fc   :  { %13483 = vmatprep.subr.mxu0 %v16279_v37 }
 0x5fd   :  { %13484 = vmatpush3.msra.mxu0 %v16279_v37  ;;  %v5075_v19 = vand.u32 4294901760, %v5074_v40 }
 0x5fe   :  { %13485 = vmatprep.subr.mxu0 %v16282_v44 }
 0x5ff   :  { %13486 = vmatpush3.msra.mxu0 %v16282_v44 }
 0x600   :  { %13487 = vmatprep.subr.mxu0 %v16286_v45 }
 0x601   :  { %13488 = vmatpush3.msra.mxu0 %v16286_v45 }
 0x602   :  { %13490 = vmatmul.mubr.f32.vlgmr.msra.gmra.mxu0 %v4436_v8  ;;  %13503 = vmatprep.subr.mxu0 %v16361_v22  ;;  %v5060_v8 = vsub.f32 %v16368_v46, %v16379_v32 }
 0x603   :  { %13504 = vmatpush3.msra.mxu0 %v16361_v22 }
 0x604   :  { %13505 = vmatprep.subr.mxu0 %v16363_v43  ;;  %v5061_v51 = vand.u32 4294901760, %v5060_v8  ;;  %v18_v8 = vld [vmem:[%s18462_s0 + $0x18] sm:$0xff] }
 0x605   :  { %13506 = vmatpush3.msra.mxu0 %v16363_v43 }
 0x606   :  { %13507 = vmatprep.subr.mxu0 %v16365_v55  ;;  %13514 = vmatprep.subr.mxu1 %v5061_v51 }
 0x607   :  { %13508 = vmatpush3.msra.mxu0 %v16365_v55  ;;  %13515 = vmatpush3.msra.mxu1 %v5061_v51  ;;  %v5484_v51 = vsel %vm28_vm0, %v18_v8, 0  ;;  %v6022_v8 = vld [vmem:[%s18464_s2 + $0x1c8] sm:$0xff] }
 0x608   :  { %13509 = vmatprep.subr.mxu0 %v16400_v52  ;;  %13516 = vmatprep.subr.mxu1 %v5068_v12  ;;  %v16513_v35 = vand.u32 4294901760, %v5484_v51 }
 0x609   :  { %13510 = vmatpush3.msra.mxu0 %v16400_v52  ;;  %13517 = vmatpush3.msra.mxu1 %v5068_v12 }
 0x60a   :  { %13525 = vmatprep.subr.mxu0 %v16368_v46  ;;  %13518 = vmatprep.subr.mxu1 %v5075_v19 }
 0x60b   :  { %13519 = vmatpush3.msra.mxu1 %v5075_v19 }
 0x6a8   :  { %v13458_v57 = vpop.f32.mrf.mxu1 }
 0x6aa   :  { %v4533_v49 = vpop.f32.mrf.mxu1 }
 0x6b0   :  { %v13480_v37 = vpop.f32.mrf.mxu1 }
 0x6b1   :  { %v13447_v63 = vpop.f32.mrf.mxu0 }
 0x6b2   :  { %v4443_v25 = vadd.f32 %v13447_v63, %v11577_v1  ;;  %v4703_v28 = vpop.f32.mrf.mxu1  ;;  %v5082_v63 = vand.u32 4294901760, %v5081_v29 }
 0x6b3   :  { %v4432_v15 = vpop.f32.mrf.mxu0 }
 0x6b4   :  { %v4433_v26 = vadd.f32 %v11577_v1, %v4432_v15  ;;  %v4540_v16 = vadd.f32 %v13458_v57, %v4443_v25  ;;  %13520 = vmatprep.subr.mxu1 %v5082_v63 }
 0x6b5   :  { %13521 = vmatpush3.msra.mxu1 %v5082_v63  ;;  %v5566_v63 = vsub.f32 %v5484_v51, %v16513_v35 }
 0x6b6   :  { %v4534_v53 = vadd.f32 %v4533_v49, %v4433_v26  ;;  %13536 = vmatprep.subr.mxu1 %v16361_v22 }
 0x6b9   :  { %v13469_v14 = vpop.f32.mrf.mxu0 }
 0x6ba   :  { %v4627_v44 = vadd.f32 %v13469_v14, %v4540_v16  ;;  %v13502_v54 = vpop.f32.mrf.mxu1  ;;  %v11578_v16 = vld [vmem:[%s18463_s1 + $0x138] ss:$0 sm:$0xff] }
 0x6bb   :  { %v4619_v50 = vpop.f32.mrf.mxu0 }
 0x6bc   :  { %v4620_v61 = vadd.f32 %v4619_v50, %v4534_v53  ;;  %v4712_v45 = vadd.f32 %v13480_v37, %v4627_v44  ;;  %v4875_v48 = vpop.f32.mrf.mxu1  ;;  %v11579_v50 = vld [vmem:[%s18463_s1 + $0x140] ss:$0 sm:$0xff] }
 0x6be   :  { %v4704_v20 = vadd.f32 %v4703_v28, %v4620_v61 }
 0x6c2   :  { %v13491_v47 = vpop.f32.mrf.mxu0 }
 0x6c3   :  { %v4801_v17 = vadd.f32 %v13491_v47, %v4712_v45 }
 0x6c4   :  { %v4794_v27 = vpop.f32.mrf.mxu0 }
 0x6c5   :  { %v4882_v10 = vadd.f32 %v13502_v54, %v4801_v17  ;;  %v4795_v23 = vadd.f32 %v4794_v27, %v4704_v20 }
 0x6c7   :  { %v4876_v62 = vadd.f32 %v4875_v48, %v4795_v23  ;;  %v4886_v34 = vadd.f32 %v14629_v56, %v4882_v10  ;;  %v5474_v10 = vld [vmem:[%s18463_s1 + $0x90] sm:$0xff] }
 0x6c9   :  { %v4892_v36 = vsel %vm28_vm0, %v4886_v34, 0.0  ;;  %v4885_v59 = vadd.f32 %v14630_v11, %v4876_v62  ;;  %v5473_v62 = vld [vmem:[%s18463_s1 + $0x88] sm:$0xff]  ;;  %v5472_v11 = vld [vmem:[%s18463_s1 + $0x80] sm:$0xff] }
 0x6ca   :  { %4893 = vadd.xlane.f32.xlu0 %v4892_v36  ;;  %v16443_v36 = vand.u32 4294901760, %v5474_v10 }
 0x6cb   :  { %v4889_v2 = vsel %vm28_vm0, %v4885_v59, 0.0 }
 0x6cc   :  { %4890 = vadd.xlane.f32.xlu1 %v4889_v2 }
 0x753   :  { %v4894_v18 = vpop.xlane.xlu0 %4893 }
 0x754   :  { %v4897_v5 = vmul.f32 0.03125, %v4894_v18  ;;  %v16450_v18 = vand.u32 4294901760, %v5473_v62 }
 0x755   :  { %v4891_v60 = vpop.xlane.xlu1 %4890 }
 0x756   :  { %v4896_v39 = vmul.f32 0.03125, %v4891_v60  ;;  %v16346_v41 = vsub.f32 %v4886_v34, %v4897_v5  ;;  %v17_v5 = vld [vmem:[%s18462_s0 + $0x10] sm:$0xff] }
 0x758   :  { %v4898_v4 = vsub.f32 %v4885_v59, %v4896_v39  ;;  %v4901_v31 = vmul.f32 %v16346_v41, %v16346_v41  ;;  %v16458_v39 = vsub.f32 %v5474_v10, %v16443_v36 }
 0x75a   :  { %v4900_v9 = vmul.f32 %v4898_v4, %v4898_v4  ;;  %v4905_v7 = vsel %vm28_vm0, %v4901_v31, 0.0  ;;  %v16469_v31 = vsub.f32 %v5473_v62, %v16450_v18  ;;  %v16476_v24 = vand.u32 4294901760, %v16458_v39 }
 0x75c   :  { %v4902_v6 = vsel %vm28_vm0, %v4900_v9, 0.0  ;;  %v5481_v9 = vsel %vm28_vm0, %v17_v5, 0  ;;  %v16490_v13 = vand.u32 4294901760, %v16469_v31 }
 0x75d   :  { %4903 = vadd.xlane.f32.xlu0 %v4902_v6  ;;  %v16481_v42 = vand.u32 4294901760, %v5481_v9 }
 0x75f   :  { %v16505_v12 = vsub.f32 %v5481_v9, %v16481_v42 }
 0x761   :  { %4906 = vadd.xlane.f32.xlu0 %v4905_v7  ;;  %v5557_v29 = vand.u32 4294901760, %v16505_v12 }
 0x7e6   :  { %v4904_v1 = vpop.xlane.xlu0 %4903 }
 0x7e7   :  { %v4908_v57 = vmul.f32 0.03125, %v4904_v1 }
 0x7e9   :  { %v4910_v15 = vadd.f32 1e-05, %v4908_v57  ;;  %v5567_v57 = vand.u32 4294901760, %v5566_v63 }
 0x7ea   :  { %v4907_v25 = vpop.xlane.xlu0 %4906 }
 0x7eb   :  { %14609 = vrsqrt.f32 %v4910_v15  ;;  %v4909_v26 = vmul.f32 0.03125, %v4907_v25 }
 0x7ed   :  { %v4911_v14 = vadd.f32 1e-05, %v4909_v26 }
 0x7ef   :  { %14611 = vrsqrt.f32 %v4911_v14 }
 0x7f8   :  { %v14610_v49 = vpop.eup %14609 }
 0x7f9   :  { %v4914_v37 = vmul.f32 %v14610_v49, %v4898_v4  ;;  %v5471_v4 = vld [vmem:[%s18463_s1 + $0x78] sm:$0xff] }
 0x7fa   :  { %v16472_v7 = vand.u32 4294901760, %v5471_v4 }
 0x7fb   :  { %v4920_v44 = vmul.f32 %v11578_v16, %v4914_v37 }
 0x7fc   :  { %v14612_v53 = vpop.eup %14611  ;;  %v16494_v40 = vsub.f32 %v5471_v4, %v16472_v7 }
 0x7fd   :  { %v16420_v61 = vadd.f32 %v11579_v50, %v4920_v44  ;;  %v4915_v28 = vmul.f32 %v14612_v53, %v16346_v41  ;;  %v16460_v41 = vand.u32 4294901760, %v5472_v11 }
 0x7fe   :  { %v16518_v19 = vand.u32 4294901760, %v16494_v40 }
 0x7ff   :  { %18594 = vst [vmem:[#allocation19_spill] sm:$0xff] %v16420_v61  ;;  %v4938_v45 = vsel %vm28_vm0, %v16420_v61, 0  ;;  %v4921_v54 = vmul.f32 %v11578_v16, %v4915_v28  ;;  %v16479_v58 = vsub.f32 %v5472_v11, %v16460_v41 }
 0x800   :  { %v16425_v47 = vand.u32 4294901760, %v4938_v45 }
 0x801   :  { %v16427_v17 = vadd.f32 %v11579_v50, %v4921_v54 }
 0x802   :  { %13522 = vmatprep.mubr.f32.mxu1 %v16425_v47  ;;  %v5013_v20 = vsub.f32 %v4938_v45, %v16425_v47 }
 0x803   :  { %18595 = vst [vmem:[#allocation11_spill] sm:$0xff] %v16427_v17  ;;  %v4941_v27 = vsel %vm28_vm0, %v16427_v17, 0 }
 0x804   :  { %v16436_v23 = vand.u32 4294901760, %v4941_v27  ;;  %v5014_v48 = vand.u32 4294901760, %v5013_v20 }
 0x806   :  { %v5023_v56 = vsub.f32 %v4941_v27, %v16436_v23  ;;  %13523 = vmatmul.mubr.f32.vlgmr.msra.gmra.mxu1 %v16436_v23  ;;  %v5015_v34 = vsub.f32 %v5013_v20, %v5014_v48 }
 0x807   :  { %13537 = vmatpush3.msra.mxu1 %v16361_v22  ;;  %13544 = vmatprep.mubr.f32.mxu1 %v5014_v48 }
 0x808   :  { %13538 = vmatprep.subr.mxu1 %v16363_v43  ;;  %v5016_v59 = vand.u32 4294901760, %v5015_v34  ;;  %v5024_v2 = vand.u32 4294901760, %v5023_v56 }
 0x809   :  { %13539 = vmatpush3.msra.mxu1 %v16363_v43 }
 0x80a   :  { %13540 = vmatprep.subr.mxu1 %v16365_v55  ;;  %13511 = vmatprep.mubr.f32.mxu0 %v5016_v59  ;;  %v5025_v60 = vsub.f32 %v5023_v56, %v5024_v2 }
 0x80b   :  { %13541 = vmatpush3.msra.mxu1 %v16365_v55 }
 0x80c   :  { %13542 = vmatprep.subr.mxu1 %v16400_v52  ;;  %v5026_v6 = vand.u32 4294901760, %v5025_v60 }
 0x80d   :  { %13543 = vmatpush3.msra.mxu1 %v16400_v52 }
 0x80e   :  { %13545 = vmatmul.mubr.f32.vlgmr.msra.gmra.mxu1 %v5024_v2  ;;  %13558 = vmatprep.subr.mxu1 %v16361_v22 }
 0x80f   :  { %13512 = vmatmul.mubr.f32.vlgmr.msra.gmra.mxu0 %v5026_v6  ;;  %13559 = vmatpush3.msra.mxu1 %v16361_v22  ;;  %v5603_v22 = vsub.f32 %v16458_v39, %v16476_v24 }
 0x810   :  { %13526 = vmatpush3.msra.mxu0 %v16368_v46  ;;  %13566 = vmatprep.mubr.f32.mxu1 %v16425_v47  ;;  %v16502_v46 = vand.u32 4294901760, %v16479_v58 }
 0x811   :  { %13527 = vmatprep.subr.mxu0 %v16371_v21  ;;  %13533 = vmatprep.mubr.f32.mxu0 %v5013_v20 }
 0x812   :  { %13560 = vmatprep.subr.mxu1 %v16363_v43  ;;  %13528 = vmatpush3.msra.mxu0 %v16371_v21  ;;  %v5610_v21 = vsub.f32 %v16469_v31, %v16490_v13 }
 0x813   :  { %13561 = vmatpush3.msra.mxu1 %v16363_v43  ;;  %13529 = vmatprep.subr.mxu0 %v16374_v38  ;;  %v5604_v43 = vand.u32 4294901760, %v5603_v22  ;;  %v6021_v22 = vld [vmem:[%s18464_s2 + $0x1c0] sm:$0xff] }
 0x814   :  { %13562 = vmatprep.subr.mxu1 %v16365_v55  ;;  %13530 = vmatpush3.msra.mxu0 %v16374_v38  ;;  %v5617_v38 = vsub.f32 %v16479_v58, %v16502_v46 }
 0x815   :  { %13563 = vmatpush3.msra.mxu1 %v16365_v55  ;;  %13531 = vmatprep.subr.mxu0 %v16403_v30  ;;  %v5611_v55 = vand.u32 4294901760, %v5610_v21  ;;  %v16609_v21 = vand.u32 4294901760, %v6021_v22 }
 0x816   :  { %13564 = vmatprep.subr.mxu1 %v16400_v52  ;;  %13532 = vmatpush3.msra.mxu0 %v16403_v30  ;;  %v5624_v30 = vsub.f32 %v16494_v40, %v16518_v19  ;;  %v5618_v1 = vand.u32 4294901760, %v5617_v38 }
 0x817   :  { %13565 = vmatpush3.msra.mxu1 %v16400_v52  ;;  %13534 = vmatmul.mubr.f32.vlgmr.msra.gmra.mxu0 %v5023_v56  ;;  %v5558_v52 = vsub.f32 %v16505_v12, %v5557_v29 }
 0x818   :  { %13547 = vmatprep.subr.mxu0 %v16379_v32  ;;  %13567 = vmatmul.mubr.f32.vlgmr.msra.gmra.mxu1 %v16436_v23 }
 0x819   :  { %13548 = vmatpush3.msra.mxu0 %v16379_v32  ;;  %13555 = vmatprep.mubr.f32.mxu0 %v16425_v47  ;;  %v5625_v32 = vand.u32 4294901760, %v5624_v30  ;;  %v5559_v15 = vand.u32 4294901760, %v5558_v52 }
 0x81a   :  { %13549 = vmatprep.subr.mxu0 %v16382_v0  ;;  %13580 = vmatprep.subr.mxu1 %v5604_v43 }
 0x81b   :  { %13550 = vmatpush3.msra.mxu0 %v16382_v0  ;;  %13581 = vmatpush3.msra.mxu1 %v5604_v43  ;;  %v5568_v0 = vsub.f32 %v5566_v63, %v5567_v57 }
 0x81c   :  { %13551 = vmatprep.subr.mxu0 %v16385_v3  ;;  %13582 = vmatprep.subr.mxu1 %v5611_v55 }
 0x81d   :  { %13552 = vmatpush3.msra.mxu0 %v16385_v3  ;;  %13583 = vmatpush3.msra.mxu1 %v5611_v55  ;;  %v5569_v3 = vand.u32 4294901760, %v5568_v0  ;;  %v6249_v55 = vsub.f32 %v6021_v22, %v16609_v21 }
 0x81e   :  { %13553 = vmatprep.subr.mxu0 %v16408_v33  ;;  %13584 = vmatprep.subr.mxu1 %v5618_v1 }
 0x81f   :  { %13554 = vmatpush3.msra.mxu0 %v16408_v33  ;;  %13585 = vmatpush3.msra.mxu1 %v5618_v1  ;;  %v11580_v33 = vld [vmem:[%s18463_s1 + $0x70] ss:$0 sm:$0xff] }
 0x820   :  { %13556 = vmatmul.mubr.f32.vlgmr.msra.gmra.mxu0 %v16436_v23  ;;  %13569 = vmatprep.subr.mxu0 %v16443_v36 }
 0x821   :  { %13570 = vmatpush3.msra.mxu0 %v16443_v36  ;;  %13586 = vmatprep.subr.mxu1 %v5625_v32 }
 0x822   :  { %13571 = vmatprep.subr.mxu0 %v16450_v18  ;;  %13577 = vmatprep.mubr.f32.mxu0 %v5559_v15 }
 0x823   :  { %13572 = vmatpush3.msra.mxu0 %v16450_v18  ;;  %13587 = vmatpush3.msra.mxu1 %v5625_v32 }
 0x824   :  { %13573 = vmatprep.subr.mxu0 %v16460_v41  ;;  %13588 = vmatprep.mubr.f32.mxu1 %v16481_v42 }
 0x825   :  { %13574 = vmatpush3.msra.mxu0 %v16460_v41  ;;  %13602 = vmatprep.subr.mxu1 %v16443_v36 }
 0x826   :  { %13575 = vmatprep.subr.mxu0 %v16472_v7  ;;  %13589 = vmatmul.mubr.f32.vlgmr.msra.gmra.mxu1 %v16513_v35 }
 0x827   :  { %13576 = vmatpush3.msra.mxu0 %v16472_v7  ;;  %13603 = vmatpush3.msra.mxu1 %v16443_v36 }
 0x828   :  { %13578 = vmatmul.mubr.f32.vlgmr.msra.gmra.mxu0 %v5569_v3  ;;  %13591 = vmatprep.subr.mxu0 %v16458_v39 }
 0x829   :  { %13592 = vmatpush3.msra.mxu0 %v16458_v39  ;;  %13604 = vmatprep.subr.mxu1 %v16450_v18 }
 0x82a   :  { %13593 = vmatprep.subr.mxu0 %v16469_v31  ;;  %13605 = vmatpush3.msra.mxu1 %v16450_v18 }
 0x82b   :  { %13594 = vmatpush3.msra.mxu0 %v16469_v31  ;;  %13606 = vmatprep.subr.mxu1 %v16460_v41 }
 0x82c   :  { %13595 = vmatprep.subr.mxu0 %v16479_v58  ;;  %13607 = vmatpush3.msra.mxu1 %v16460_v41 }
 0x82d   :  { %13596 = vmatpush3.msra.mxu0 %v16479_v58  ;;  %13608 = vmatprep.subr.mxu1 %v16472_v7 }
 0x82e   :  { %13597 = vmatprep.subr.mxu0 %v16494_v40  ;;  %13599 = vmatprep.mubr.f32.mxu0 %v16505_v12 }
 0x82f   :  { %13598 = vmatpush3.msra.mxu0 %v16494_v40  ;;  %13609 = vmatpush3.msra.mxu1 %v16472_v7  ;;  %v16601_v40 = vand.u32 4294901760, %v6022_v8 }
 0x830   :  { %13600 = vmatmul.mubr.f32.vlgmr.msra.gmra.mxu0 %v5566_v63  ;;  %13610 = vmatprep.mubr.f32.mxu1 %v5557_v29 }
 0x831   :  { %13613 = vmatprep.subr.mxu0 %v16476_v24  ;;  %13624 = vmatprep.subr.mxu1 %v16443_v36  ;;  %v16607_v12 = vsub.f32 %v6022_v8, %v16601_v40 }
 0x832   :  { %13611 = vmatmul.mubr.f32.vlgmr.msra.gmra.mxu1 %v5567_v57  ;;  %13614 = vmatpush3.msra.mxu0 %v16476_v24  ;;  %v16621_v57 = vand.u32 4294901760, %v6249_v55 }
 0x833   :  { %13625 = vmatpush3.msra.mxu1 %v16443_v36  ;;  %13615 = vmatprep.subr.mxu0 %v16490_v13  ;;  %v16614_v29 = vand.u32 4294901760, %v16607_v12 }
 0x834   :  { %13626 = vmatprep.subr.mxu1 %v16450_v18  ;;  %13616 = vmatpush3.msra.mxu0 %v16490_v13  ;;  %v6251_v0 = vsub.f32 %v6249_v55, %v16621_v57 }
 0x835   :  { %13627 = vmatpush3.msra.mxu1 %v16450_v18  ;;  %13617 = vmatprep.subr.mxu0 %v16502_v46  ;;  %v11581_v18 = vld [vmem:[%s18463_s1 + $0x98] ss:$0 sm:$0xff]  ;;  %v6244_v52 = vsub.f32 %v16607_v12, %v16614_v29 }
 0x836   :  { %13628 = vmatprep.subr.mxu1 %v16460_v41  ;;  %13618 = vmatpush3.msra.mxu0 %v16502_v46  ;;  %v6252_v3 = vand.u32 4294901760, %v6251_v0 }
 0x837   :  { %13629 = vmatpush3.msra.mxu1 %v16460_v41  ;;  %13619 = vmatprep.subr.mxu0 %v16518_v19  ;;  %v6245_v15 = vand.u32 4294901760, %v6244_v52 }
 0x838   :  { %13630 = vmatprep.subr.mxu1 %v16472_v7  ;;  %13620 = vmatpush3.msra.mxu0 %v16518_v19 }
 0x839   :  { %13621 = vmatprep.mubr.f32.mxu0 %v16481_v42  ;;  %13631 = vmatpush3.msra.mxu1 %v16472_v7 }
 0x83a   :  { %13632 = vmatprep.mubr.f32.mxu1 %v16481_v42  ;;  %13622 = vmatmul.mubr.f32.vlgmr.msra.gmra.mxu0 %v16513_v35 }
 0x83b   :  { %13633 = vmatmul.mubr.f32.vlgmr.msra.gmra.mxu1 %v16513_v35  ;;  %13635 = vmatprep.subr.mxu0 %v16601_v40 }
 0x83c   :  { %13636 = vmatpush3.msra.mxu0 %v16601_v40  ;;  %13645 = vmatprep.subr.mxu1 %v6245_v15 }
 0x83d   :  { %13637 = vmatprep.subr.mxu0 %v16609_v21  ;;  %13646 = vmatpush3.msra.mxu1 %v6245_v15 }
 0x83e   :  { %13638 = vmatpush3.msra.mxu0 %v16609_v21  ;;  %13647 = vmatprep.subr.mxu1 %v6252_v3 }
 0x83f   :  { %13655 = vmatprep.subr.mxu0 %v16607_v12  ;;  %13648 = vmatpush3.msra.mxu1 %v6252_v3 }
 0x840   :  { %13665 = vmatprep.subr.mxu1 %v16601_v40 }
 0x8c6   :  { %v13524_v25 = vpop.f32.mrf.mxu1 }
 0x8c8   :  { %v5119_v50 = vpop.f32.mrf.mxu1 }
 0x8ce   :  { %v13546_v53 = vpop.f32.mrf.mxu1 }
 0x8cf   :  { %v13513_v26 = vpop.f32.mrf.mxu0 }
 0x8d0   :  { %v5029_v14 = vadd.f32 %v13513_v26, %v11580_v33  ;;  %v5289_v27 = vpop.f32.mrf.mxu1 }
 0x8d1   :  { %v5018_v49 = vpop.f32.mrf.mxu0 }
 0x8d2   :  { %v5019_v16 = vadd.f32 %v11580_v33, %v5018_v49  ;;  %v5126_v37 = vadd.f32 %v13524_v25, %v5029_v14 }
 0x8d4   :  { %v5120_v44 = vadd.f32 %v5119_v50, %v5019_v16 }
 0x8d7   :  { %v13535_v28 = vpop.f32.mrf.mxu0 }
 0x8d8   :  { %v5213_v45 = vadd.f32 %v13535_v28, %v5126_v37  ;;  %v13568_v23 = vpop.f32.mrf.mxu1 }
 0x8d9   :  { %v5205_v54 = vpop.f32.mrf.mxu0 }
 0x8da   :  { %v5206_v47 = vadd.f32 %v5205_v54, %v5120_v44  ;;  %v5298_v20 = vadd.f32 %v13546_v53, %v5213_v45  ;;  %v5461_v11 = vpop.f32.mrf.mxu1 }
 0x8dc   :  { %v5290_v10 = vadd.f32 %v5289_v27, %v5206_v47 }
 0x8e0   :  { %v13557_v48 = vpop.f32.mrf.mxu0 }
 0x8e1   :  { %v5387_v62 = vadd.f32 %v13557_v48, %v5298_v20 }
 0x8e2   :  { %v5380_v56 = vpop.f32.mrf.mxu0 }
 0x8e3   :  { %v16591_v34 = vadd.f32 %v13568_v23, %v5387_v62  ;;  %v5381_v36 = vadd.f32 %v5380_v56, %v5290_v10 }
 0x8e5   :  { %v16593_v59 = vadd.f32 %v5461_v11, %v5381_v36 }
 0x8e6   :  { %v13590_v5 = vpop.f32.mrf.mxu1 }
 0x8e7   :  { %v6014_v11 = vmul.f32 0.5, %v16593_v59 }
 0x8e8   :  { %v13579_v2 = vpop.f32.mrf.mxu0  ;;  %v5662_v9 = vpop.f32.mrf.mxu1 }
 0x8e9   :  { %v5572_v39 = vadd.f32 %v13579_v2, %v11581_v18 }
 0x8ea   :  { %v5561_v60 = vpop.f32.mrf.mxu0 }
 0x8eb   :  { %v5562_v4 = vadd.f32 %v11581_v18, %v5561_v60  ;;  %v5669_v6 = vadd.f32 %v13590_v5, %v5572_v39  ;;  %v6698_v39 = vsel %vm28_vm0, %v6014_v11, 0 }
 0x8ed   :  { %v5663_v24 = vadd.f32 %v5662_v9, %v5562_v4  ;;  %v16646_v4 = vand.u32 4294901760, %v6698_v39 }
 0x8ef   :  { %v16651_v9 = vsub.f32 %v6698_v39, %v16646_v4 }
 0x8f0   :  { %v13601_v41 = vpop.f32.mrf.mxu0 }
 0x8f1   :  { %v5756_v58 = vadd.f32 %v13601_v41, %v5669_v6  ;;  %v6774_v6 = vand.u32 4294901760, %v16651_v9 }
 0x8f2   :  { %v13612_v31 = vpop.f32.mrf.mxu1  ;;  %v5748_v7 = vpop.f32.mrf.mxu0 }
 0x8f3   :  { %v5749_v42 = vadd.f32 %v5748_v7, %v5663_v24  ;;  %v5841_v51 = vadd.f32 %v13612_v31, %v5756_v58  ;;  %v6775_v31 = vsub.f32 %v16651_v9, %v6774_v6 }
 0x8f4   :  { %v5832_v13 = vpop.f32.mrf.mxu1 }
 0x8f5   :  { %v5833_v35 = vadd.f32 %v5832_v13, %v5749_v42  ;;  %v6776_v7 = vand.u32 4294901760, %v6775_v31 }
 0x8fa   :  { %v13623_v46 = vpop.f32.mrf.mxu0 }
 0x8fb   :  { %v5930_v19 = vadd.f32 %v13623_v46, %v5841_v51  ;;  %v13634_v43 = vpop.f32.mrf.mxu1 }
 0x8fc   :  { %v5923_v38 = vpop.f32.mrf.mxu0 }
 0x8fd   :  { %v6011_v63 = vadd.f32 %v13634_v43, %v5930_v19  ;;  %v5924_v30 = vadd.f32 %v5923_v38, %v5833_v35  ;;  %v6004_v1 = vpop.f32.mrf.mxu1 }
 0x8ff   :  { %v6005_v32 = vadd.f32 %v6004_v1, %v5924_v30  ;;  %7245 = vrot.lane.b32.xlu1 %v6011_v63, %s14653_s26 }
 0x901   :  { %6061 = vxpose.xlu0.b32.start [1/2] (short) (narrow) %v6005_v32, 32 }
 0x903   :  { %7243 = vrot.lane.b32.xlu1 %v6005_v32, %s14653_s26 }
 0x905   :  { %6062 = vxpose.xlu0.b32.end [2/2] (short) (narrow) %v6011_v63, 32  ;;  %v6015_v63 = vmul.f32 0.5, %v16591_v34 }
 0x97d   :  { %v6077_v33 = vpop.trf.xlu0 }
 0x97e   :  { %v6094_v25 = vsel %vm650_vm1, %v6077_v33, 0  ;;  %v6701_v33 = vsel %vm28_vm0, %v6015_v63, 0  ;;  %v6024_v63 = vld [vmem:[%s18464_s2 + $0x148] sm:$0xff] }
 0x97f   :  { %v16629_v26 = vand.u32 4294901760, %v6094_v25 }
 0x981   :  { %v6173_v14 = vsub.f32 %v6094_v25, %v16629_v26  ;;  %13649 = vmatprep.mubr.f32.mxu1 %v16629_v26  ;;  %v6078_v49 = vpop.trf.xlu0 }
 0x982   :  { %v6097_v16 = vsel %vm650_vm1, %v6078_v49, 0 }
 0x983   :  { %v6174_v37 = vand.u32 4294901760, %v6173_v14  ;;  %v6182_v50 = vand.u32 4294901760, %v6097_v16 }
 0x985   :  { %v6183_v44 = vsub.f32 %v6097_v16, %v6182_v50  ;;  %13650 = vmatmul.mubr.f32.vlgmr.msra.gmra.mxu1 %v6182_v50  ;;  %v6079_v53 = vpop.trf.xlu0  ;;  %v6175_v28 = vsub.f32 %v6173_v14, %v6174_v37 }
 0x986   :  { %v6100_v45 = vsel %vm650_vm1, %v6079_v53, 0  ;;  %13666 = vmatpush3.msra.mxu1 %v16601_v40 }
 0x987   :  { %v6184_v54 = vand.u32 4294901760, %v6183_v44  ;;  %v6192_v47 = vand.u32 4294901760, %v6100_v45  ;;  %v6176_v20 = vand.u32 4294901760, %v6175_v28  ;;  %13667 = vmatprep.subr.mxu1 %v16609_v21 }
 0x988   :  { %13668 = vmatpush3.msra.mxu1 %v16609_v21 }
 0x989   :  { %v6185_v27 = vsub.f32 %v6183_v44, %v6184_v54  ;;  %v6193_v10 = vsub.f32 %v6100_v45, %v6192_v47  ;;  %13639 = vmatprep.mubr.f32.mxu0 %v6176_v20  ;;  %13652 = vmatprep.mubr.f32.mxu1 %v6192_v47  ;;  %v6080_v23 = vpop.trf.xlu0 }
 0x98a   :  { %v6103_v48 = vsel %vm650_vm1, %v6080_v23, 0  ;;  %13685 = vmatprep.subr.mxu1 %v16601_v40 }
 0x98b   :  { %v6186_v62 = vand.u32 4294901760, %v6185_v27  ;;  %v6194_v56 = vand.u32 4294901760, %v6193_v10  ;;  %v6202_v36 = vand.u32 4294901760, %v6103_v48 }
 0x98d   :  { %v6203_v2 = vsub.f32 %v6103_v48, %v6202_v36  ;;  %13640 = vmatmul.mubr.f32.vlgmr.msra.gmra.mxu0 %v6186_v62  ;;  %13653 = vmatmul.mubr.f32.gmra.mxu1 %v6202_v36  ;;  %v6195_v18 = vsub.f32 %v6193_v10, %v6194_v56  ;;  %v6042_v48 = vld [vmem:[%s18464_s2 + $0x268] sm:$0xff] }
 0x98e   :  { %13669 = vmatprep.mubr.f32.mxu1 %v6174_v37  ;;  %13656 = vmatpush3.msra.mxu0 %v16607_v12  ;;  %v6040_v37 = vld [vmem:[%s18464_s2 + $0x258] sm:$0xff] }
 0x98f   :  { %v6204_v5 = vand.u32 4294901760, %v6203_v2  ;;  %v6196_v60 = vand.u32 4294901760, %v6195_v18  ;;  %13657 = vmatprep.subr.mxu0 %v6249_v55 }
 0x990   :  { %13658 = vmatpush3.msra.mxu0 %v6249_v55 }
 0x991   :  { %13642 = vmatprep.mubr.f32.mxu0 %v6196_v60  ;;  %13670 = vmatmul.mubr.f32.vlgmr.msra.gmra.mxu1 %v6184_v54  ;;  %v6205_v41 = vsub.f32 %v6203_v2, %v6204_v5  ;;  %v6039_v54 = vld [vmem:[%s18464_s2 + $0x250] sm:$0xff]  ;;  %v6041_v60 = vld [vmem:[%s18464_s2 + $0x260] sm:$0xff] }
 0x992   :  { %13672 = vmatprep.mubr.f32.mxu1 %v6194_v56  ;;  %13686 = vmatpush3.msra.mxu1 %v16601_v40 }
 0x993   :  { %v6206_v59 = vand.u32 4294901760, %v6205_v41  ;;  %13687 = vmatprep.subr.mxu1 %v16609_v21  ;;  %13675 = vmatprep.subr.mxu0 %v16614_v29 }
 0x994   :  { %13688 = vmatpush3.msra.mxu1 %v16609_v21 }
 0x995   :  { %13643 = vmatmul.mubr.f32.gmra.mxu0 %v6206_v59  ;;  %13673 = vmatmul.mubr.f32.gmra.mxu1 %v6204_v5 }
 0x996   :  { %13659 = vmatprep.mubr.f32.mxu0 %v6173_v14  ;;  %13689 = vmatprep.mubr.f32.mxu1 %v16629_v26 }
 0x999   :  { %13660 = vmatmul.mubr.f32.vlgmr.msra.gmra.mxu0 %v6183_v44  ;;  %13690 = vmatmul.mubr.f32.vlgmr.msra.gmra.mxu1 %v6182_v50 }
 0x99a   :  { %13676 = vmatpush3.msra.mxu0 %v16614_v29  ;;  %13662 = vmatprep.mubr.f32.mxu0 %v6193_v10 }
 0x99b   :  { %13692 = vmatprep.mubr.f32.mxu1 %v6192_v47  ;;  %13677 = vmatprep.subr.mxu0 %v16621_v57 }
 0x99c   :  { %13678 = vmatpush3.msra.mxu0 %v16621_v57 }
 0x99d   :  { %13663 = vmatmul.mubr.f32.gmra.mxu0 %v6203_v2  ;;  %13693 = vmatmul.mubr.f32.gmra.mxu1 %v6202_v36 }
 0x99e   :  { %13679 = vmatprep.mubr.f32.mxu0 %v16629_v26  ;;  %13714 = vmatprep.mubr.f32.mxu1 %v16646_v4 }
 0x9a1   :  { %13680 = vmatmul.mubr.f32.vlgmr.msra.gmra.mxu0 %v6182_v50  ;;  %v16667_v50 = vand.u32 4294901760, %v6701_v33 }
 0x9a2   :  { %13682 = vmatprep.mubr.f32.mxu0 %v6192_v47 }
 0x9a3   :  { %v16676_v56 = vsub.f32 %v6701_v33, %v16667_v50  ;;  %v6026_v33 = vld [vmem:[%s18464_s2 + $0x158] sm:$0xff] }
 0x9a5   :  { %13683 = vmatmul.mubr.f32.gmra.mxu0 %v6202_v36  ;;  %v6784_v31 = vand.u32 4294901760, %v16676_v56 }
 0x9a6   :  { %13703 = vmatprep.mubr.f32.mxu0 %v6776_v7 }
 0xa45   :  { %v13651_v24 = vpop.f32.mrf.mxu1 }
 0xa47   :  { %v6289_v58 = vpop.f32.mrf.mxu1 }
 0xa4d   :  { %v13654_v42 = vpop.f32.mrf.mxu1  ;;  %v13641_v8 = vpop.f32.mrf.mxu0 }
 0xa4e   :  { %v6296_v43 = vadd.f32 %v13651_v24, %v13641_v8 }
 0xa4f   :  { %v6301_v13 = vpop.f32.mrf.mxu1  ;;  %v6178_v51 = vpop.f32.mrf.mxu0 }
 0xa50   :  { %v6290_v29 = vadd.f32 %v6289_v58, %v6178_v51 }
 0xa51   :  { %v13671_v40 = vpop.f32.mrf.mxu1 }
 0xa53   :  { %v6479_v22 = vpop.f32.mrf.mxu1 }
 0xa55   :  { %v13644_v46 = vpop.f32.mrf.mxu0  ;;  %v13674_v12 = vpop.f32.mrf.mxu1 }
 0xa56   :  { %v6308_v52 = vadd.f32 %v13654_v42, %v13644_v46 }
 0xa57   :  { %v6198_v21 = vpop.f32.mrf.mxu0  ;;  %v6495_v35 = vpop.f32.mrf.mxu1 }
 0xa58   :  { %v6302_v15 = vadd.f32 %v6301_v13, %v6198_v21 }
 0xa59   :  { %v13661_v19 = vpop.f32.mrf.mxu0  ;;  %v13691_v30 = vpop.f32.mrf.mxu1 }
 0xa5a   :  { %v6391_v55 = vadd.f32 %v13661_v19, %v6296_v43  ;;  %v6023_v19 = vld [vmem:[%s18464_s2 + $0x140] sm:$0xff] }
 0xa5b   :  { %v6383_v38 = vpop.f32.mrf.mxu0  ;;  %v6671_v25 = vpop.f32.mrf.mxu1 }
 0xa5c   :  { %v6384_v57 = vadd.f32 %v6383_v38, %v6290_v29  ;;  %v6488_v3 = vadd.f32 %v13671_v40, %v6391_v55  ;;  %v6785_v40 = vsub.f32 %v16676_v56, %v6784_v31 }
 0xa5d   :  { %v13664_v1 = vpop.f32.mrf.mxu0  ;;  %v13694_v45 = vpop.f32.mrf.mxu1 }
 0xa5e   :  { %v6405_v0 = vadd.f32 %v13664_v1, %v6308_v52  ;;  %v6480_v16 = vadd.f32 %v6479_v22, %v6384_v57  ;;  %v6786_v43 = vand.u32 4294901760, %v6785_v40  ;;  %v7250_v1 = vsel %vm650_vm1, %v6023_v19, 0 }
 0xa5f   :  { %v6397_v32 = vpop.f32.mrf.mxu0  ;;  %v6683_v18 = vpop.f32.mrf.mxu1  ;;  %v7253_v57 = vsel %vm650_vm1, %v6024_v63, 0 }
 0xa60   :  { %v6398_v14 = vadd.f32 %v6397_v32, %v6302_v15  ;;  %v6504_v28 = vadd.f32 %v13674_v12, %v6405_v0  ;;  %v7246_v32 = vpop.permute.xlu1 %7245  ;;  %v16726_v0 = vand.u32 4294901760, %v7250_v1 }
 0xa61   :  { %v13681_v26 = vpop.f32.mrf.mxu0 }
 0xa62   :  { %v6587_v49 = vadd.f32 %v13681_v26, %v6488_v3  ;;  %v6496_v23 = vadd.f32 %v6495_v35, %v6398_v14  ;;  %v6025_v3 = vld [vmem:[%s18464_s2 + $0x150] sm:$0xff]  ;;  %v16734_v26 = vand.u32 4294901760, %v7253_v57 }
 0xa63   :  { %v6580_v34 = vpop.f32.mrf.mxu0  ;;  %v7256_v14 = vsel %vm650_vm1, %v6025_v3, 0 }
 0xa64   :  { %v6678_v44 = vadd.f32 %v13691_v30, %v6587_v49  ;;  %v6581_v53 = vadd.f32 %v6580_v34, %v6480_v16  ;;  %v6027_v49 = vld [vmem:[%s18464_s2 + $0x160] sm:$0xff]  ;;  %v16741_v16 = vsub.f32 %v7250_v1, %v16726_v0  ;;  %v6028_v34 = vld [vmem:[%s18464_s2 + $0x168] sm:$0xff] }
 0xa65   :  { %v13684_v47 = vpop.f32.mrf.mxu0 }
 0xa66   :  { %v6694_v20 = vmul.f32 %v6678_v44, %v6040_v37  ;;  %v6672_v27 = vadd.f32 %v6671_v25, %v6581_v53  ;;  %v6599_v10 = vadd.f32 %v13684_v47, %v6504_v28  ;;  %v7259_v37 = vsel %vm650_vm1, %v6026_v33, 0  ;;  %v7244_v44 = vpop.permute.xlu1 %7243  ;;  %v6029_v47 = vld [vmem:[%s18464_s2 + $0x170] sm:$0xff] }
 0xa67   :  { %v6592_v62 = vpop.f32.mrf.mxu0  ;;  %v16750_v53 = vsub.f32 %v7253_v57, %v16734_v26  ;;  %v16752_v28 = vand.u32 4294901760, %v7256_v14 }
 0xa68   :  { %v6693_v36 = vmul.f32 %v6672_v27, %v6039_v54  ;;  %v6690_v11 = vadd.f32 %v13694_v45, %v6599_v10  ;;  %v6593_v2 = vadd.f32 %v6592_v62, %v6496_v23  ;;  %v16678_v5 = vand.u32 4294901760, %v6694_v20  ;;  %v6030_v23 = vld [vmem:[%s18464_s2 + $0x178] sm:$0xff] }
 0xa69   :  { %v7262_v45 = vsel %vm650_vm1, %v6027_v49, 0  ;;  %v16757_v54 = vand.u32 4294901760, %v7259_v37  ;;  %v7366_v27 = vand.u32 4294901760, %v16741_v16  ;;  %v7265_v10 = vsel %vm650_vm1, %v6028_v34, 0 }
 0xa6a   :  { %v6696_v39 = vmul.f32 %v6690_v11, %v6042_v48  ;;  %v6684_v41 = vadd.f32 %v6683_v18, %v6593_v2  ;;  %v16683_v59 = vand.u32 4294901760, %v6693_v36  ;;  %v6832_v58 = vsub.f32 %v6694_v20, %v16678_v5 }
 0xa6b   :  { %v16762_v20 = vand.u32 4294901760, %v7246_v32  ;;  %v16772_v48 = vand.u32 4294901760, %v7244_v44  ;;  %v16776_v62 = vand.u32 4294901760, %v7262_v45  ;;  %v16788_v11 = vsub.f32 %v7259_v37, %v16757_v54 }
 0xa6c   :  { %v16686_v7 = vand.u32 4294901760, %v6696_v39  ;;  %v6695_v24 = vmul.f32 %v6684_v41, %v6041_v60  ;;  %v6839_v13 = vsub.f32 %v6693_v36, %v16683_v59  ;;  %v16703_v46 = vand.u32 4294901760, %v6832_v58  ;;  %v6031_v60 = vld [vmem:[%s18464_s2 + $0x180] sm:$0xff] }
 0xa6d   :  { %v7268_v36 = vsel %vm650_vm1, %v6029_v47, 0  ;;  %v16790_v2 = vand.u32 4294901760, %v7265_v10  ;;  %v7271_v18 = vsel %vm650_vm1, %v6030_v23, 0  ;;  %v7367_v41 = vsub.f32 %v16741_v16, %v7366_v27 }
 0xa6e   :  { %v6818_v42 = vsub.f32 %v6696_v39, %v16686_v7  ;;  %v16690_v8 = vand.u32 4294901760, %v6695_v24  ;;  %13695 = vmatprep.subr.mxu0 %v16686_v7  ;;  %v16710_v35 = vand.u32 4294901760, %v6839_v13  ;;  %v6834_v55 = vsub.f32 %v6832_v58, %v16703_v46 }
 0xa6f   :  { %13696 = vmatpush3.msra.mxu0 %v16686_v7  ;;  %v16797_v39 = vsub.f32 %v7246_v32, %v16762_v20  ;;  %v16833_v19 = vsub.f32 %v7265_v10, %v16790_v2  ;;  %v6035_v32 = vld [vmem:[%s18464_s2 + $0x1a0] sm:$0xff]  ;;  %v6037_v10 = vld [vmem:[%s18464_s2 + $0x1b0] sm:$0xff] }
 0xa70   :  { %v6825_v51 = vsub.f32 %v6695_v24, %v16690_v8  ;;  %13697 = vmatprep.subr.mxu0 %v16690_v8  ;;  %v16700_v22 = vand.u32 4294901760, %v6818_v42  ;;  %v6841_v52 = vsub.f32 %v6839_v13, %v16710_v35  ;;  %v6835_v15 = vand.u32 4294901760, %v6834_v55 }
 0xa71   :  { %13698 = vmatpush3.msra.mxu0 %v16690_v8  ;;  %v16805_v24 = vsub.f32 %v7244_v44, %v16772_v48  ;;  %v7286_v37 = vsel %vm650_vm1, %v6035_v32, 0 }
 0xa72   :  { %13699 = vmatprep.subr.mxu0 %v16678_v5  ;;  %v6820_v12 = vsub.f32 %v6818_v42, %v16700_v22  ;;  %v16707_v21 = vand.u32 4294901760, %v6825_v51  ;;  %v6842_v25 = vand.u32 4294901760, %v6841_v52 }
 0xa73   :  { %13700 = vmatpush3.msra.mxu0 %v16678_v5  ;;  %v16860_v52 = vand.u32 4294901760, %v16805_v24 }
 0xa74   :  { %13701 = vmatprep.subr.mxu0 %v16683_v59  ;;  %v6821_v38 = vand.u32 4294901760, %v6820_v12  ;;  %v6827_v29 = vsub.f32 %v6825_v51, %v16707_v21  ;;  %v6033_v12 = vld [vmem:[%s18464_s2 + $0x190] sm:$0xff] }
 0xa75   :  { %13702 = vmatpush3.msra.mxu0 %v16683_v59 }
 0xa76   :  { %13704 = vmatmul.mubr.f32.vlgmr.msra.gmra.mxu0 %v6786_v43  ;;  %13706 = vmatprep.subr.mxu1 %v6821_v38  ;;  %v6828_v30 = vand.u32 4294901760, %v6827_v29  ;;  %v7368_v43 = vand.u32 4294901760, %v7367_v41 }
 0xa77   :  { %13717 = vmatprep.subr.mxu0 %v6818_v42  ;;  %13707 = vmatpush3.msra.mxu1 %v6821_v38  ;;  %v16839_v38 = vand.u32 4294901760, %v16797_v39 }
 0xa78   :  { %13718 = vmatpush3.msra.mxu0 %v6818_v42  ;;  %13725 = vmatprep.mubr.f32.mxu0 %v16651_v9  ;;  %v7376_v9 = vand.u32 4294901760, %v16750_v53  ;;  %v16812_v42 = vand.u32 4294901760, %v7268_v36 }
 0xa79   :  { %13708 = vmatprep.subr.mxu1 %v6828_v30  ;;  %13719 = vmatprep.subr.mxu0 %v6825_v51  ;;  %v7556_v44 = vsub.f32 %v16797_v39, %v16839_v38 }
 0xa7a   :  { %13709 = vmatpush3.msra.mxu1 %v6828_v30  ;;  %13720 = vmatpush3.msra.mxu0 %v6825_v51  ;;  %v7377_v40 = vsub.f32 %v16750_v53, %v7376_v9  ;;  %v16846_v55 = vsub.f32 %v7268_v36, %v16812_v42 }
 0xa7b   :  { %13710 = vmatprep.subr.mxu1 %v6835_v15  ;;  %13721 = vmatprep.subr.mxu0 %v6832_v58 }
 0xa7c   :  { %13711 = vmatpush3.msra.mxu1 %v6835_v15  ;;  %13722 = vmatpush3.msra.mxu0 %v6832_v58  ;;  %v16810_v58 = vsub.f32 %v7262_v45, %v16776_v62  ;;  %v7378_v30 = vand.u32 4294901760, %v7377_v40  ;;  %v7563_v45 = vsub.f32 %v16805_v24, %v16860_v52 }
 0xa7d   :  { %13712 = vmatprep.subr.mxu1 %v6842_v25  ;;  %13723 = vmatprep.subr.mxu0 %v6839_v13 }
 0xa7e   :  { %13713 = vmatpush3.msra.mxu1 %v6842_v25  ;;  %13724 = vmatpush3.msra.mxu0 %v6839_v13  ;;  %v6032_v13 = vld [vmem:[%s18464_s2 + $0x188] sm:$0xff] }
 0xa7f   :  { %13715 = vmatmul.mubr.f32.vlgmr.msra.gmra.mxu1 %v16667_v50  ;;  %13726 = vmatmul.mubr.f32.vlgmr.msra.gmra.mxu0 %v16676_v56  ;;  %v7277_v29 = vsel %vm650_vm1, %v6032_v13, 0  ;;  %v7280_v56 = vsel %vm650_vm1, %v6033_v12, 0  ;;  %v16917_v13 = vand.u32 4294901760, %v7286_v37  ;;  %v7292_v12 = vsel %vm650_vm1, %v6037_v10, 0 }
 0xa80   :  { %13728 = vmatprep.subr.mxu1 %v16686_v7  ;;  %13739 = vmatprep.subr.mxu0 %v16700_v22  ;;  %v16874_v15 = vand.u32 4294901760, %v7277_v29  ;;  %v16878_v3 = vand.u32 4294901760, %v7280_v56 }
 0xa81   :  { %13729 = vmatpush3.msra.mxu1 %v16686_v7  ;;  %13736 = vmatprep.mubr.f32.mxu1 %v6774_v6  ;;  %v16782_v6 = vsub.f32 %v7256_v14, %v16752_v28  ;;  %v7426_v14 = vand.u32 4294901760, %v16846_v55 }
 0xa82   :  { %13740 = vmatpush3.msra.mxu0 %v16700_v22  ;;  %13747 = vmatprep.mubr.f32.mxu0 %v16646_v4  ;;  %v16823_v22 = vand.u32 4294901760, %v7271_v18  ;;  %v16915_v41 = vsub.f32 %v7280_v56, %v16878_v3  ;;  %v7564_v56 = vand.u32 4294901760, %v7563_v45 }
 0xa83   :  { %13730 = vmatprep.subr.mxu1 %v16690_v8  ;;  %13741 = vmatprep.subr.mxu0 %v16707_v21  ;;  %v7386_v51 = vand.u32 4294901760, %v16782_v6 }
 0xa84   :  { %13731 = vmatpush3.msra.mxu1 %v16690_v8  ;;  %13742 = vmatpush3.msra.mxu0 %v16707_v21  ;;  %v7396_v21 = vand.u32 4294901760, %v16788_v11  ;;  %v16863_v57 = vsub.f32 %v7271_v18, %v16823_v22  ;;  %v16908_v18 = vsub.f32 %v7277_v29, %v16874_v15  ;;  %v7557_v29 = vand.u32 4294901760, %v7556_v44 }
 0xa85   :  { %13732 = vmatprep.subr.mxu1 %v16678_v5  ;;  %13743 = vmatprep.subr.mxu0 %v16703_v46  ;;  %v7387_v1 = vsub.f32 %v16782_v6, %v7386_v51 }
 0xa86   :  { %13733 = vmatpush3.msra.mxu1 %v16678_v5  ;;  %13744 = vmatpush3.msra.mxu0 %v16703_v46  ;;  %v7274_v46 = vsel %vm650_vm1, %v6031_v60, 0  ;;  %v7436_v47 = vand.u32 4294901760, %v16863_v57 }
 0xa87   :  { %13734 = vmatprep.subr.mxu1 %v16683_v59  ;;  %13745 = vmatprep.subr.mxu0 %v16710_v35  ;;  %v16848_v63 = vand.u32 4294901760, %v7274_v46  ;;  %v7388_v34 = vand.u32 4294901760, %v7387_v1 }
 0xa88   :  { %13735 = vmatpush3.msra.mxu1 %v16683_v59  ;;  %13746 = vmatpush3.msra.mxu0 %v16710_v35  ;;  %v7406_v35 = vand.u32 4294901760, %v16810_v58 }
 0xa89   :  { %13737 = vmatmul.mubr.f32.vlgmr.msra.gmra.mxu1 %v6784_v31  ;;  %13748 = vmatmul.mubr.f32.vlgmr.msra.gmra.mxu0 %v16667_v50  ;;  %v6034_v31 = vld [vmem:[%s18464_s2 + $0x198] sm:$0xff]  ;;  %v16887_v49 = vsub.f32 %v7274_v46, %v16848_v63  ;;  %v7427_v46 = vsub.f32 %v16846_v55, %v7426_v14 }
 0xa8a   :  { %13750 = vmatprep.subr.mxu1 %v16686_v7  ;;  %13761 = vmatprep.subr.mxu0 %v16762_v20  ;;  %v7283_v33 = vsel %vm650_vm1, %v6034_v31, 0  ;;  %v7407_v25 = vsub.f32 %v16810_v58, %v7406_v35 }
 0xa8b   :  { %13751 = vmatpush3.msra.mxu1 %v16686_v7  ;;  %13758 = vmatprep.mubr.f32.mxu1 %v16646_v4  ;;  %v7397_v4 = vsub.f32 %v16788_v11, %v7396_v21  ;;  %v7416_v7 = vand.u32 4294901760, %v16833_v19  ;;  %v16910_v60 = vand.u32 4294901760, %v7283_v33 }
 0xa8c   :  { %13762 = vmatpush3.msra.mxu0 %v16762_v20  ;;  %13752 = vmatprep.subr.mxu1 %v16690_v8  ;;  %v7408_v40 = vand.u32 4294901760, %v7407_v25  ;;  %v16946_v25 = vand.u32 4294901760, %v7292_v12 }
 0xa8d   :  { %13763 = vmatprep.subr.mxu0 %v16772_v48  ;;  %13753 = vmatpush3.msra.mxu1 %v16690_v8  ;;  %v6036_v8 = vld [vmem:[%s18464_s2 + $0x1a8] sm:$0xff]  ;;  %v7398_v23 = vand.u32 4294901760, %v7397_v4  ;;  %v7417_v36 = vsub.f32 %v16833_v19, %v7416_v7  ;;  %v16937_v1 = vsub.f32 %v7283_v33, %v16910_v60  ;;  %v16944_v4 = vsub.f32 %v7286_v37, %v16917_v13 }
 0xa8e   :  { %13764 = vmatpush3.msra.mxu0 %v16772_v48  ;;  %13765 = vmatprep.mubr.f32.mxu0 %v7368_v43  ;;  %v6038_v43 = vld [vmem:[%s18464_s2 + $0x1b8] sm:$0xff] }
 0xa8f   :  { %13754 = vmatprep.subr.mxu1 %v16678_v5  ;;  %13766 = vmatmul.mubr.f32.vlgmr.msra.gmra.mxu0 %v7378_v30  ;;  %v7418_v31 = vand.u32 4294901760, %v7417_v36  ;;  %v7456_v30 = vand.u32 4294901760, %v16908_v18  ;;  %v7476_v44 = vand.u32 4294901760, %v16937_v1  ;;  %v7486_v36 = vand.u32 4294901760, %v16944_v4 }
 0xa90   :  { %13817 = vmatprep.subr.mxu0 %v16797_v39  ;;  %13755 = vmatpush3.msra.mxu1 %v16678_v5  ;;  %v7289_v5 = vsel %vm650_vm1, %v6036_v8, 0  ;;  %v7428_v8 = vand.u32 4294901760, %v7427_v46 }
 0xa91   :  { %13818 = vmatpush3.msra.mxu0 %v16797_v39  ;;  %13756 = vmatprep.subr.mxu1 %v16683_v59  ;;  %v7446_v39 = vand.u32 4294901760, %v16887_v49  ;;  %v16939_v32 = vand.u32 4294901760, %v7289_v5  ;;  %v7457_v37 = vsub.f32 %v16908_v18, %v7456_v30 }
 0xa92   :  { %13819 = vmatprep.subr.mxu0 %v16805_v24  ;;  %13757 = vmatpush3.msra.mxu1 %v16683_v59  ;;  %v7437_v59 = vsub.f32 %v16863_v57, %v7436_v47 }
 0xa93   :  { %13768 = vmatprep.mubr.f32.mxu0 %v7388_v34  ;;  %13820 = vmatpush3.msra.mxu0 %v16805_v24  ;;  %v7466_v24 = vand.u32 4294901760, %v16915_v41  ;;  %v7447_v33 = vsub.f32 %v16887_v49, %v7446_v39  ;;  %v16958_v45 = vsub.f32 %v7289_v5, %v16939_v32  ;;  %v7458_v46 = vand.u32 4294901760, %v7457_v37 }
 0xa94   :  { %13759 = vmatmul.mubr.f32.vlgmr.msra.gmra.mxu1 %v16667_v50  ;;  %13769 = vmatmul.mubr.f32.gmra.mxu0 %v7398_v23  ;;  %v7295_v50 = vsel %vm650_vm1, %v6038_v43, 0  ;;  %v7438_v34 = vand.u32 4294901760, %v7437_v59  ;;  %v7477_v43 = vsub.f32 %v16937_v1, %v7476_v44  ;;  %v7487_v59 = vsub.f32 %v16944_v4, %v7486_v36 }
 0xa95   :  { %13789 = vmatprep.subr.mxu1 %v7557_v29  ;;  %13873 = vmatprep.subr.mxu0 %v16839_v38  ;;  %v16960_v10 = vand.u32 4294901760, %v7295_v50  ;;  %v7467_v23 = vsub.f32 %v16915_v41, %v7466_v24  ;;  %v7448_v5 = vand.u32 4294901760, %v7447_v33 }
 0xa96   :  { %13790 = vmatpush3.msra.mxu1 %v7557_v29  ;;  %13771 = vmatprep.mubr.f32.mxu0 %v7408_v40  ;;  %v16969_v40 = vsub.f32 %v7292_v12, %v16946_v25  ;;  %v7496_v29 = vand.u32 4294901760, %v16958_v45 }
 0xa97   :  { %13791 = vmatprep.subr.mxu1 %v7564_v56  ;;  %13793 = vmatprep.mubr.f32.mxu1 %v16726_v0  ;;  %v16980_v12 = vsub.f32 %v7295_v50, %v16960_v10 }
 0xa98   :  { %13792 = vmatpush3.msra.mxu1 %v7564_v56  ;;  %13772 = vmatmul.mubr.f32.gmra.mxu0 %v7418_v31  ;;  %v7468_v56 = vand.u32 4294901760, %v7467_v23  ;;  %v7506_v31 = vand.u32 4294901760, %v16969_v40  ;;  %v7497_v50 = vsub.f32 %v16958_v45, %v7496_v29 }
 0xa99   :  { %13794 = vmatmul.mubr.f32.vlgmr.msra.gmra.mxu1 %v16734_v26  ;;  %13845 = vmatprep.subr.mxu1 %v16762_v20  ;;  %v7516_v33 = vand.u32 4294901760, %v16980_v12 }
 0xa9a   :  { %13846 = vmatpush3.msra.mxu1 %v16762_v20  ;;  %13774 = vmatprep.mubr.f32.mxu0 %v7428_v8  ;;  %v7478_v8 = vand.u32 4294901760, %v7477_v43  ;;  %v7507_v37 = vsub.f32 %v16969_v40, %v7506_v31  ;;  %v7498_v23 = vand.u32 4294901760, %v7497_v50 }
 0xa9b   :  { %13847 = vmatprep.subr.mxu1 %v16772_v48  ;;  %13796 = vmatprep.mubr.f32.mxu1 %v16752_v28 }
 0xa9c   :  { %13848 = vmatpush3.msra.mxu1 %v16772_v48  ;;  %13775 = vmatmul.mubr.f32.gmra.mxu0 %v7438_v34  ;;  %v7488_v34 = vand.u32 4294901760, %v7487_v59 }
 0xa9d   :  { %13797 = vmatmul.mubr.f32.gmra.mxu1 %v16757_v54  ;;  %13901 = vmatprep.subr.mxu1 %v16762_v20 }
 0xa9e   :  { %13777 = vmatprep.mubr.f32.mxu0 %v7448_v5  ;;  %13799 = vmatprep.mubr.f32.mxu1 %v16776_v62  ;;  %v7517_v5 = vsub.f32 %v16980_v12, %v7516_v33 }
 0xaa0   :  { %13778 = vmatmul.mubr.f32.gmra.mxu0 %v7458_v46  ;;  %v7508_v46 = vand.u32 4294901760, %v7507_v37  ;;  %v7518_v43 = vand.u32 4294901760, %v7517_v5 }
 0xaa1   :  { %13800 = vmatmul.mubr.f32.gmra.mxu1 %v16790_v2  ;;  %13780 = vmatprep.mubr.f32.mxu0 %v7468_v56 }
 0xaa2   :  { %13802 = vmatprep.mubr.f32.mxu1 %v16812_v42 }
 0xaa4   :  { %13781 = vmatmul.mubr.f32.gmra.mxu0 %v7478_v8 }
 0xaa5   :  { %13803 = vmatmul.mubr.f32.gmra.mxu1 %v16823_v22  ;;  %13783 = vmatprep.mubr.f32.mxu0 %v7488_v34 }
 0xaa6   :  { %13805 = vmatprep.mubr.f32.mxu1 %v16848_v63 }
 0xaa8   :  { %13784 = vmatmul.mubr.f32.gmra.mxu0 %v7498_v23 }
 0xaa9   :  { %13806 = vmatmul.mubr.f32.gmra.mxu1 %v16874_v15  ;;  %13786 = vmatprep.mubr.f32.mxu0 %v7508_v46 }
 0xaaa   :  { %13808 = vmatprep.mubr.f32.mxu1 %v16878_v3 }
 0xaac   :  { %13787 = vmatmul.mubr.f32.gmra.mxu0 %v7518_v43 }
 0xaad   :  { %13809 = vmatmul.mubr.f32.gmra.mxu1 %v16910_v60  ;;  %13821 = vmatprep.mubr.f32.mxu0 %v16741_v16 }
 0xaae   :  { %13811 = vmatprep.mubr.f32.mxu1 %v16917_v13 }
 0xab0   :  { %13822 = vmatmul.mubr.f32.vlgmr.msra.gmra.mxu0 %v16750_v53  ;;  %v6060_v53 = vld [vmem:[%s18464_s2 + $0x278] sm:$0xff] }
 0xab1   :  { %13812 = vmatmul.mubr.f32.gmra.mxu1 %v16939_v32  ;;  %13874 = vmatpush3.msra.mxu0 %v16839_v38 }
 0xab2   :  { %13875 = vmatprep.subr.mxu0 %v16860_v52  ;;  %13814 = vmatprep.mubr.f32.mxu1 %v16946_v25 }
 0xab3   :  { %13876 = vmatpush3.msra.mxu0 %v16860_v52  ;;  %13824 = vmatprep.mubr.f32.mxu0 %v16782_v6 }
 0xab4   :  { %13825 = vmatmul.mubr.f32.gmra.mxu0 %v16788_v11 }
 0xab5   :  { %13815 = vmatmul.mubr.f32.gmra.mxu1 %v16960_v10  ;;  %13827 = vmatprep.mubr.f32.mxu0 %v16810_v58 }
 0xab6   :  { %13849 = vmatprep.mubr.f32.mxu1 %v7366_v27 }
 0xab8   :  { %13828 = vmatmul.mubr.f32.gmra.mxu0 %v16833_v19 }
 0xab9   :  { %13850 = vmatmul.mubr.f32.vlgmr.msra.gmra.mxu1 %v7376_v9  ;;  %13830 = vmatprep.mubr.f32.mxu0 %v16846_v55 }
 0xaba   :  { %13902 = vmatpush3.msra.mxu1 %v16762_v20  ;;  %13852 = vmatprep.mubr.f32.mxu1 %v7386_v51 }
 0xabb   :  { %13903 = vmatprep.subr.mxu1 %v16772_v48 }
 0xabc   :  { %13904 = vmatpush3.msra.mxu1 %v16772_v48  ;;  %13831 = vmatmul.mubr.f32.gmra.mxu0 %v16863_v57 }
 0xabd   :  { %13853 = vmatmul.mubr.f32.gmra.mxu1 %v7396_v21  ;;  %13833 = vmatprep.mubr.f32.mxu0 %v16887_v49 }
 0xabe   :  { %13855 = vmatprep.mubr.f32.mxu1 %v7406_v35 }
 0xac0   :  { %13834 = vmatmul.mubr.f32.gmra.mxu0 %v16908_v18 }
 0xac1   :  { %13856 = vmatmul.mubr.f32.gmra.mxu1 %v7416_v7  ;;  %13836 = vmatprep.mubr.f32.mxu0 %v16915_v41 }
 0xac2   :  { %13858 = vmatprep.mubr.f32.mxu1 %v7426_v14 }
 0xac4   :  { %13837 = vmatmul.mubr.f32.gmra.mxu0 %v16937_v1 }
 0xac5   :  { %13859 = vmatmul.mubr.f32.gmra.mxu1 %v7436_v47  ;;  %13839 = vmatprep.mubr.f32.mxu0 %v16944_v4 }
 0xac6   :  { %13861 = vmatprep.mubr.f32.mxu1 %v7446_v39 }
 0xac8   :  { %13840 = vmatmul.mubr.f32.gmra.mxu0 %v16958_v45 }
 0xac9   :  { %13862 = vmatmul.mubr.f32.gmra.mxu1 %v7456_v30  ;;  %13842 = vmatprep.mubr.f32.mxu0 %v16969_v40 }
 0xaca   :  { %13864 = vmatprep.mubr.f32.mxu1 %v7466_v24 }
 0xacc   :  { %13843 = vmatmul.mubr.f32.gmra.mxu0 %v16980_v12 }
 0xacd   :  { %13865 = vmatmul.mubr.f32.gmra.mxu1 %v7476_v44  ;;  %13877 = vmatprep.mubr.f32.mxu0 %v16726_v0 }
 0xace   :  { %13867 = vmatprep.mubr.f32.mxu1 %v7486_v36 }
 0xad0   :  { %13878 = vmatmul.mubr.f32.vlgmr.msra.gmra.mxu0 %v16734_v26 }
 0xad1   :  { %13868 = vmatmul.mubr.f32.gmra.mxu1 %v7496_v29  ;;  %13880 = vmatprep.mubr.f32.mxu0 %v16752_v28 }
 0xad2   :  { %13870 = vmatprep.mubr.f32.mxu1 %v7506_v31 }
 0xad4   :  { %13881 = vmatmul.mubr.f32.gmra.mxu0 %v16757_v54 }
 0xad5   :  { %13871 = vmatmul.mubr.f32.gmra.mxu1 %v7516_v33  ;;  %13883 = vmatprep.mubr.f32.mxu0 %v16776_v62 }
 0xad6   :  { %13905 = vmatprep.mubr.f32.mxu1 %v16726_v0 }
 0xad8   :  { %13884 = vmatmul.mubr.f32.gmra.mxu0 %v16790_v2 }
 0xad9   :  { %13906 = vmatmul.mubr.f32.vlgmr.msra.gmra.mxu1 %v16734_v26  ;;  %13886 = vmatprep.mubr.f32.mxu0 %v16812_v42 }
 0xada   :  { %13908 = vmatprep.mubr.f32.mxu1 %v16752_v28 }
 0xadc   :  { %13887 = vmatmul.mubr.f32.gmra.mxu0 %v16823_v22 }
 0xadd   :  { %13909 = vmatmul.mubr.f32.gmra.mxu1 %v16757_v54  ;;  %13889 = vmatprep.mubr.f32.mxu0 %v16848_v63  ;;  %v6059_v54 = vld [vmem:[%s18464_s2 + $0x270] sm:$0xff] }
 0xade   :  { %13911 = vmatprep.mubr.f32.mxu1 %v16776_v62 }
 0xae0   :  { %13890 = vmatmul.mubr.f32.gmra.mxu0 %v16874_v15 }
 0xae1   :  { %13912 = vmatmul.mubr.f32.gmra.mxu1 %v16790_v2  ;;  %13892 = vmatprep.mubr.f32.mxu0 %v16878_v3 }
 0xae2   :  { %13914 = vmatprep.mubr.f32.mxu1 %v16812_v42 }
 0xae4   :  { %13893 = vmatmul.mubr.f32.gmra.mxu0 %v16910_v60 }
 0xae5   :  { %13915 = vmatmul.mubr.f32.gmra.mxu1 %v16823_v22  ;;  %13895 = vmatprep.mubr.f32.mxu0 %v16917_v13 }
 0xae6   :  { %13917 = vmatprep.mubr.f32.mxu1 %v16848_v63 }
 0xae8   :  { %13896 = vmatmul.mubr.f32.gmra.mxu0 %v16939_v32 }
 0xae9   :  { %13918 = vmatmul.mubr.f32.gmra.mxu1 %v16874_v15  ;;  %13898 = vmatprep.mubr.f32.mxu0 %v16946_v25 }
 0xaea   :  { %13920 = vmatprep.mubr.f32.mxu1 %v16878_v3 }
 0xaec   :  { %13899 = vmatmul.mubr.f32.gmra.mxu0 %v16960_v10 }
 0xaed   :  { %13921 = vmatmul.mubr.f32.gmra.mxu1 %v16910_v60 }
 0xaee   :  { %13923 = vmatprep.mubr.f32.mxu1 %v16917_v13 }
 0xaf1   :  { %13924 = vmatmul.mubr.f32.gmra.mxu1 %v16939_v32 }
 0xaf2   :  { %13926 = vmatprep.mubr.f32.mxu1 %v16946_v25 }
 0xaf5   :  { %13927 = vmatmul.mubr.f32.gmra.mxu1 %v16960_v10 }
 0xb36   :  { %v13705_v0 = vpop.f32.mrf.mxu0 }
 0xb37   :  { %v6789_v20 = vadd.f32 %v13705_v0, %v6060_v53 }
 0xb38   :  { %v6778_v26 = vpop.f32.mrf.mxu0 }
 0xb39   :  { %v6779_v62 = vadd.f32 %v6778_v26, %v6059_v54 }
 0xb3f   :  { %v13727_v16 = vpop.f32.mrf.mxu0  ;;  %v13716_v28 = vpop.f32.mrf.mxu1 }
 0xb40   :  { %v6886_v9 = vadd.f32 %v13716_v28, %v6789_v20 }
 0xb41   :  { %v6965_v27 = vpop.f32.mrf.mxu0  ;;  %v6879_v48 = vpop.f32.mrf.mxu1 }
 0xb42   :  { %v6880_v2 = vadd.f32 %v6879_v48, %v6779_v62  ;;  %v6973_v42 = vadd.f32 %v13727_v16, %v6886_v9 }
 0xb44   :  { %v6966_v22 = vadd.f32 %v6965_v27, %v6880_v2 }
 0xb49   :  { %v13749_v6 = vpop.f32.mrf.mxu0  ;;  %v13738_v11 = vpop.f32.mrf.mxu1 }
 0xb4a   :  { %v7058_v21 = vadd.f32 %v13738_v11, %v6973_v42 }
 0xb4b   :  { %v7140_v58 = vpop.f32.mrf.mxu0  ;;  %v7049_v51 = vpop.f32.mrf.mxu1 }
 0xb4c   :  { %v7050_v38 = vadd.f32 %v7049_v51, %v6966_v22  ;;  %v7147_v55 = vadd.f32 %v13749_v6, %v7058_v21 }
 0xb4e   :  { %v7141_v57 = vadd.f32 %v7140_v58, %v7050_v38 }
 0xb4f   :  { %v13767_v19 = vpop.f32.mrf.mxu0 }
 0xb51   :  { %v7370_v35 = vpop.f32.mrf.mxu0 }
 0xb54   :  { %v13760_v63 = vpop.f32.mrf.mxu1  ;;  %v13770_v52 = vpop.f32.mrf.mxu0 }
 0xb55   :  { %v17102_v7 = vadd.f32 %v13760_v63, %v7147_v55 }
 0xb56   :  { %v7221_v15 = vpop.f32.mrf.mxu1  ;;  %v7390_v3 = vpop.f32.mrf.mxu0 }
 0xb57   :  { %18596 = vst [vmem:[#allocation15_spill] sm:$0xff] %v17102_v7  ;;  %v17104_v14 = vadd.f32 %v7221_v15, %v7141_v57  ;;  %7233 = vmax.xlane.f32.xlu0 %v17102_v7 }
 0xb58   :  { %v13773_v49 = vpop.f32.mrf.mxu0 }
 0xb59   :  { %18597 = vst [vmem:[#allocation17_spill] sm:$0xff] %v17104_v14  ;;  %v13795_v47 = vpop.f32.mrf.mxu1  ;;  %7231 = vmax.xlane.f32.xlu1 %v17104_v14 }
 0xb5a   :  { %v7608_v18 = vadd.f32 %v13795_v47, %v13767_v19  ;;  %v7410_v60 = vpop.f32.mrf.mxu0 }
 0xb5b   :  { %v7601_v41 = vpop.f32.mrf.mxu1 }
 0xb5c   :  { %v7602_v13 = vadd.f32 %v7601_v41, %v7370_v35  ;;  %v13776_v39 = vpop.f32.mrf.mxu0 }
 0xb5d   :  { %v13798_v30 = vpop.f32.mrf.mxu1 }
 0xb5e   :  { %v7620_v1 = vadd.f32 %v13798_v30, %v13770_v52  ;;  %v7430_v32 = vpop.f32.mrf.mxu0 }
 0xb5f   :  { %v7613_v24 = vpop.f32.mrf.mxu1 }
 0xb60   :  { %v7614_v4 = vadd.f32 %v7613_v24, %v7390_v3  ;;  %v13779_v25 = vpop.f32.mrf.mxu0 }
 0xb61   :  { %v13801_v44 = vpop.f32.mrf.mxu1 }
 0xb62   :  { %v7632_v45 = vadd.f32 %v13801_v44, %v13773_v49  ;;  %v7450_v10 = vpop.f32.mrf.mxu0 }
 0xb63   :  { %v7625_v36 = vpop.f32.mrf.mxu1 }
 0xb64   :  { %v7626_v40 = vadd.f32 %v7625_v36, %v7410_v60  ;;  %v13782_v29 = vpop.f32.mrf.mxu0 }
 0xb65   :  { %v13804_v12 = vpop.f32.mrf.mxu1 }
 0xb66   :  { %v17108_v56 = vadd.f32 %v13804_v12, %v13776_v39  ;;  %v7470_v59 = vpop.f32.mrf.mxu0 }
 0xb67   :  { %v7637_v31 = vpop.f32.mrf.mxu1 }
 0xb68   :  { %v17110_v8 = vadd.f32 %v7637_v31, %v7430_v32  ;;  %v13785_v50 = vpop.f32.mrf.mxu0 }
 0xb69   :  { %v13807_v33 = vpop.f32.mrf.mxu1 }
 0xb6a   :  { %v17112_v34 = vadd.f32 %v13807_v33, %v13779_v25  ;;  %v7490_v37 = vpop.f32.mrf.mxu0 }
 0xb6b   :  { %v7649_v23 = vpop.f32.mrf.mxu1 }
 0xb6c   :  { %v17114_v5 = vadd.f32 %v7649_v23, %v7450_v10  ;;  %v17116_v46 = vpop.f32.mrf.mxu0 }
 0xb6d   :  { %v13810_v43 = vpop.f32.mrf.mxu1 }
 0xb6e   :  { %v17118_v0 = vadd.f32 %v13810_v43, %v13782_v29  ;;  %v17120_v26 = vpop.f32.mrf.mxu0 }
 0xb6f   :  { %v7661_v16 = vpop.f32.mrf.mxu1 }
 0xb70   :  { %v17122_v53 = vadd.f32 %v7661_v16, %v7470_v59  ;;  %v13823_v28 = vpop.f32.mrf.mxu0 }
 0xb71   :  { %v13813_v54 = vpop.f32.mrf.mxu1  ;;  %v7775_v20 = vadd.f32 %v13823_v28, %v7608_v18 }
 0xb72   :  { %v17124_v27 = vadd.f32 %v13813_v54, %v13785_v50  ;;  %v7767_v48 = vpop.f32.mrf.mxu0 }
 0xb73   :  { %v7673_v62 = vpop.f32.mrf.mxu1  ;;  %v7768_v9 = vadd.f32 %v7767_v48, %v7602_v13 }
 0xb74   :  { %v17126_v6 = vadd.f32 %v7673_v62, %v7490_v37  ;;  %v13826_v11 = vpop.f32.mrf.mxu0 }
 0xb75   :  { %v13816_v2 = vpop.f32.mrf.mxu1  ;;  %v7789_v58 = vadd.f32 %v13826_v11, %v7620_v1 }
 0xb76   :  { %v7781_v42 = vpop.f32.mrf.mxu0 }
 0xb77   :  { %v17128_v51 = vpop.f32.mrf.mxu1  ;;  %v7782_v22 = vadd.f32 %v7781_v42, %v7614_v4 }
 0xb78   :  { %v13829_v21 = vpop.f32.mrf.mxu0 }
 0xb79   :  { %v7803_v19 = vadd.f32 %v13829_v21, %v7632_v45  ;;  %v13851_v38 = vpop.f32.mrf.mxu1 }
 0xb7a   :  { %v17130_v35 = vadd.f32 %v13851_v38, %v7775_v20  ;;  %v7795_v55 = vpop.f32.mrf.mxu0 }
 0xb7b   :  { %v7796_v63 = vadd.f32 %v7795_v55, %v7626_v40  ;;  %v7947_v52 = vpop.f32.mrf.mxu1 }
 0xb7c   :  { %18598 = vst [vmem:[#allocation5_spill] sm:$0xff] %v17130_v35  ;;  %v17132_v57 = vadd.f32 %v7947_v52, %v7768_v9  ;;  %v17134_v15 = vpop.f32.mrf.mxu0 }
 0xb7d   :  { %v13854_v3 = vpop.f32.mrf.mxu1 }
 0xb7e   :  { %18599 = vst [vmem:[#allocation6_spill] sm:$0xff] %v17132_v57  ;;  %v17136_v49 = vadd.f32 %v13854_v3, %v7789_v58  ;;  %v17138_v47 = vpop.f32.mrf.mxu0 }
 0xb7f   :  { %v7963_v18 = vpop.f32.mrf.mxu1 }
 0xb80   :  { %v17140_v60 = vadd.f32 %v7963_v18, %v7782_v22  ;;  %v13835_v41 = vpop.f32.mrf.mxu0 }
 0xb81   :  { %v13857_v13 = vpop.f32.mrf.mxu1 }
 0xb82   :  { %v17142_v39 = vadd.f32 %v13857_v13, %v7803_v19  ;;  %v7823_v30 = vpop.f32.mrf.mxu0 }
 0xb83   :  { %v7979_v1 = vpop.f32.mrf.mxu1 }
 0xb84   :  { %v17144_v32 = vadd.f32 %v7979_v1, %v7796_v63  ;;  %v13838_v24 = vpop.f32.mrf.mxu0  ;;  %v7692_v1 = vadd.f32 %v13816_v2, %v17116_v46 }
 0xb85   :  { %v17146_v4 = vpop.f32.mrf.mxu1  ;;  %v7845_v61 = vadd.f32 %v13838_v24, %v17118_v0  ;;  %v7817_v0 = vadd.f32 %v17134_v15, %v17108_v56 }
 0xb86   :  { %v7837_v25 = vpop.f32.mrf.mxu0 }
 0xb87   :  { %v17148_v44 = vpop.f32.mrf.mxu1 }
 0xb88   :  { %v13841_v45 = vpop.f32.mrf.mxu0 }
 0xb89   :  { %v13863_v10 = vpop.f32.mrf.mxu1  ;;  %v7859_v14 = vadd.f32 %v13841_v45, %v17124_v27 }
 0xb8a   :  { %v7851_v36 = vpop.f32.mrf.mxu0 }
 0xb8b   :  { %v17150_v40 = vpop.f32.mrf.mxu1  ;;  %v7852_v35 = vadd.f32 %v7851_v36, %v17126_v6 }
 0xb8c   :  { %v13844_v29 = vpop.f32.mrf.mxu0 }
 0xb8d   :  { %v13866_v12 = vpop.f32.mrf.mxu1  ;;  %v7873_v57 = vadd.f32 %v13844_v29, %v7692_v1 }
 0xb8e   :  { %v7865_v59 = vpop.f32.mrf.mxu0 }
 0xb8f   :  { %v8027_v31 = vpop.f32.mrf.mxu1 }
 0xb90   :  { %v17152_v50 = vpop.f32.mrf.mxu0 }
 0xb91   :  { %18600 = vst [vmem:[#allocation24_spill] sm:$0xff] %v17152_v50  ;;  %v13869_v33 = vpop.f32.mrf.mxu1  ;;  %v7838_v50 = vadd.f32 %v7837_v25, %v17122_v53  ;;  %v17198_v53 = vld [vmem:[%s18464_s2 + $0x238] sm:$0xff] }
 0xb92   :  { %v17154_v37 = vpop.f32.mrf.mxu0  ;;  %v8052_v46 = vadd.f32 %v13869_v33, %v7859_v14  ;;  %v17218_v33 = vld [vmem:[%s18464_s2 + $0x220] sm:$0xff] }
 0xb93   :  { %18601 = vst [vmem:[#allocation13_spill] sm:$0xff] %v17154_v37  ;;  %v8043_v23 = vpop.f32.mrf.mxu1  ;;  %v7831_v37 = vadd.f32 %v13835_v41, %v17112_v34  ;;  %v8028_v24 = vadd.f32 %v8027_v31, %v7838_v50 }
 0xb94   :  { %v17156_v43 = vpop.f32.mrf.mxu0  ;;  %v8044_v45 = vadd.f32 %v8043_v23, %v7852_v35  ;;  %v7810_v35 = vadd.f32 %v17138_v47, %v17110_v8  ;;  %v8004_v47 = vadd.f32 %v17146_v4, %v7817_v0 }
 0xb95   :  { %v13872_v16 = vpop.f32.mrf.mxu1  ;;  %v8020_v34 = vadd.f32 %v13863_v10, %v7831_v37  ;;  %v17211_v10 = vld [vmem:[%s18464_s2 + $0x230] sm:$0xff]  ;;  %v17223_v37 = vld [vmem:[%s18464_s2 + $0x248] sm:$0xff] }
 0xb96   :  { %v17158_v28 = vpop.f32.mrf.mxu0  ;;  %v8068_v41 = vadd.f32 %v13872_v16, %v7873_v57  ;;  %v17206_v57 = vld [vmem:[%s18464_s2 + $0x228] sm:$0xff]  ;;  %v17228_v16 = vld [vmem:[%s18464_s2 + $0x218] sm:$0xff] }
 0xb97   :  { %18602 = vst [vmem:[#allocation22_spill] sm:$0xff] %v17158_v28  ;;  %v8059_v54 = vpop.f32.mrf.mxu1 }
 0xb98   :  { %v17160_v20 = vpop.f32.mrf.mxu0 }
 0xb99   :  { %v17162_v48 = vpop.f32.mrf.mxu1 }
 0xb9a   :  { %18603 = vst [vmem:[#allocation21_spill] sm:$0xff] %v17162_v48  ;;  %v17164_v62 = vpop.f32.mrf.mxu0  ;;  %v7686_v48 = vadd.f32 %v17128_v51, %v17120_v26  ;;  %v7824_v26 = vadd.f32 %v7823_v30, %v17114_v5 }
 0xb9b   :  { %v17166_v9 = vpop.f32.mrf.mxu1 }
 0xb9c   :  { %18604 = vst [vmem:[#allocation8_spill] sm:$0xff] %v17166_v9  ;;  %v17168_v11 = vpop.f32.mrf.mxu0  ;;  %v7866_v51 = vadd.f32 %v7865_v59, %v7686_v48  ;;  %v8012_v36 = vadd.f32 %v17150_v40, %v7824_v26  ;;  %v7996_v48 = vadd.f32 %v17148_v44, %v7810_v35 }
 0xb9d   :  { %v17170_v58 = vpop.f32.mrf.mxu1 }
 0xb9e   :  { %18605 = vst [vmem:[#allocation12_spill] sm:$0xff] %v17170_v58  ;;  %v17172_v42 = vpop.f32.mrf.mxu0  ;;  %v8036_v58 = vadd.f32 %v13866_v12, %v7845_v61  ;;  %v8060_v5 = vadd.f32 %v8059_v54, %v7866_v51 }
 0xb9f   :  { %v17174_v22 = vpop.f32.mrf.mxu1 }
 0xba0   :  { %18606 = vst [vmem:[#allocation18_spill] sm:$0xff] %v17174_v22  ;;  %v13891_v21 = vpop.f32.mrf.mxu0 }
 0xba1   :  { %v17176_v19 = vpop.f32.mrf.mxu1  ;;  %v8199_v30 = vadd.f32 %v13891_v21, %v8020_v34  ;;  %v17239_v21 = vld [vmem:[%s18464_s2 + $0x240] sm:$0xff] }
 0xba2   :  { %v8192_v38 = vpop.f32.mrf.mxu0  ;;  %v17275_v34 = vld [vmem:[%s18464_s2 + $0x200] sm:$0xff] }
 0xba3   :  { %v17178_v55 = vpop.f32.mrf.mxu1  ;;  %v8193_v40 = vadd.f32 %v8192_v38, %v8012_v36  ;;  %18610 = vst [vmem:[#allocation10_spill] sm:$0xff] %v17275_v34 }
 0xba4   :  { %18607 = vst [vmem:[#allocation9_spill] sm:$0xff] %v17178_v55  ;;  %v13894_v63 = vpop.f32.mrf.mxu0 }
 0xba5   :  { %v17180_v52 = vpop.f32.mrf.mxu1  ;;  %v8211_v55 = vadd.f32 %v13894_v63, %v8036_v58  ;;  %v8187_v58 = vadd.f32 %v17168_v11, %v8004_v47 }
 0xba6   :  { %v8204_v3 = vpop.f32.mrf.mxu0 }
 0xba7   :  { %v17182_v18 = vpop.f32.mrf.mxu1  ;;  %v8205_v14 = vadd.f32 %v8204_v3, %v8028_v24  ;;  %v8350_v11 = vadd.f32 %v17180_v52, %v8187_v58  ;;  %v8175_v52 = vadd.f32 %v17160_v20, %v17142_v39  ;;  %v8169_v39 = vadd.f32 %v17164_v62, %v17144_v32  ;;  %v18618_v58 = vld [vmem:[#allocation24_spill] sm:$0xff] }
 0xba8   :  { %v13897_v13 = vpop.f32.mrf.mxu0 }
 0xba9   :  { %v13919_v17 = vpop.f32.mrf.mxu1  ;;  %v8223_v28 = vadd.f32 %v13897_v13, %v8052_v46  ;;  %v17256_v46 = vld [vmem:[%s18464_s2 + $0x208] sm:$0xff] }
 0xbaa   :  { %v8216_v7 = vpop.f32.mrf.mxu0  ;;  %v8362_v31 = vadd.f32 %v13919_v17, %v8199_v30  ;;  %18609 = vst [vmem:[#allocation14_spill] sm:$0xff] %v17256_v46  ;;  %v8408_v20 = vmul.f32 %v8350_v11, %v17256_v46  ;;  %v17323_v30 = vld [vmem:[%s18464_s2 + $0x1f0] sm:$0xff]  ;;  %v18632_v46 = vld [vmem:[#allocation15_spill] sm:$0xff] }
 0xbab   :  { %v8355_v9 = vpop.f32.mrf.mxu1  ;;  %v8217_v6 = vadd.f32 %v8216_v7, %v8044_v45  ;;  %18614 = vst [vmem:[#allocation16_spill] sm:$0xff] %v17323_v30 }
 0xbac   :  { %v13900_v2 = vpop.f32.mrf.mxu0  ;;  %v8410_v1 = vmul.f32 %v8362_v31, %v17228_v16 }
 0xbad   :  { %v13922_v22 = vpop.f32.mrf.mxu1  ;;  %v8235_v29 = vadd.f32 %v13900_v2, %v8068_v41 }
 0xbae   :  { %v8374_v25 = vadd.f32 %v13922_v22, %v8211_v55  ;;  %v8228_v56 = vpop.f32.mrf.mxu0  ;;  %v8356_v22 = vadd.f32 %v8355_v9, %v8193_v40  ;;  %v17244_v55 = vld [vmem:[%s18464_s2 + $0x210] sm:$0xff]  ;;  %v8181_v9 = vadd.f32 %v17172_v42, %v7996_v48  ;;  %v8163_v42 = vadd.f32 %v17156_v43, %v17136_v49 }
 0xbaf   :  { %v8367_v27 = vpop.f32.mrf.mxu1  ;;  %v8229_v50 = vadd.f32 %v8228_v56, %v8060_v5  ;;  %18608 = vst [vmem:[#allocation7_spill] sm:$0xff] %v17244_v55  ;;  %v8338_v43 = vadd.f32 %v17176_v19, %v8175_v52  ;;  %v18612_v19 = vld [vmem:[#allocation22_spill] sm:$0xff]  ;;  %v17339_v40 = vand.u32 4294901760, %v8408_v20  ;;  %v18617_v48 = vld [vmem:[#allocation5_spill] sm:$0xff] }
 0xbb0   :  { %v8368_v12 = vadd.f32 %v8367_v27, %v8205_v14  ;;  %v8412_v4 = vmul.f32 %v8374_v25, %v17206_v57  ;;  %v8344_v45 = vadd.f32 %v17182_v18, %v8181_v9  ;;  %v8409_v26 = vmul.f32 %v8356_v22, %v17244_v55  ;;  %v17298_v14 = vld [vmem:[%s18464_s2 + $0x1f8] sm:$0xff]  ;;  %v17368_v9 = vld [vmem:[%s18464_s2 + $0x1e0] sm:$0xff]  ;;  %v18633_v55 = vld [vmem:[#allocation17_spill] sm:$0xff] }
 0xbb1   :  { %v13925_v61 = vpop.f32.mrf.mxu1  ;;  %v17292_v18 = vand.u32 4294901760, %v8410_v1  ;;  %18611 = vst [vmem:[#allocation23_spill] sm:$0xff] %v17298_v14  ;;  %v8157_v56 = vadd.f32 %v18612_v19, %v17140_v60  ;;  %v8406_v47 = vmul.f32 %v8338_v43, %v17298_v14  ;;  %v8151_v22 = vadd.f32 %v18618_v58, %v18617_v48  ;;  %18620 = vst [vmem:[#allocation22_spill] sm:$0xff] %v17368_v9  ;;  %v18621_v52 = vld [vmem:[#allocation6_spill] sm:$0xff]  ;;  %v18623_v43 = vld [vmem:[#allocation21_spill] sm:$0xff] }
 0xbb2   :  { %v8386_v15 = vadd.f32 %v13925_v61, %v8223_v28  ;;  %v8411_v63 = vmul.f32 %v8368_v12, %v17218_v33  ;;  %v17258_v2 = vand.u32 4294901760, %v8412_v4  ;;  %v8407_v36 = vmul.f32 %v8344_v45, %v17275_v34  ;;  %v18622_v45 = vld [vmem:[#allocation13_spill] sm:$0xff] }
 0xbb3   :  { %v8379_v7 = vpop.f32.mrf.mxu1  ;;  %v17317_v5 = vand.u32 4294901760, %v8409_v26  ;;  %v17342_v31 = vsub.f32 %v8410_v1, %v17292_v18  ;;  %v8314_v19 = vadd.f32 %v18623_v43, %v8151_v22 }
 0xbb4   :  { %v8414_v59 = vmul.f32 %v8386_v15, %v17198_v53  ;;  %v8380_v8 = vadd.f32 %v8379_v7, %v8217_v6  ;;  %v17277_v51 = vand.u32 4294901760, %v8411_v63  ;;  %v17301_v6 = vsub.f32 %v8412_v4, %v17258_v2  ;;  %v18613_v15 = vld [vmem:[#allocation9_spill] sm:$0xff] }
 0xbb5   :  { %v13928_v23 = vpop.f32.mrf.mxu1  ;;  %v8332_v35 = vadd.f32 %v18613_v15, %v8169_v39  ;;  %v17371_v11 = vsub.f32 %v8409_v26, %v17317_v5  ;;  %v8145_v39 = vadd.f32 %v18622_v45, %v18621_v52  ;;  %v17383_v15 = vand.u32 4294901760, %v8406_v47  ;;  %v17389_v26 = vld [vmem:[%s18464_s2 + $0x1d8] sm:$0xff] }
 0xbb6   :  { %v17231_v17 = vand.u32 4294901760, %v8414_v59  ;;  %v8413_v28 = vmul.f32 %v8380_v8, %v17211_v10  ;;  %v8398_v54 = vadd.f32 %v13928_v23, %v8235_v29  ;;  %v17326_v7 = vsub.f32 %v8411_v63, %v17277_v51  ;;  %18624 = vst [vmem:[#allocation9_spill] sm:$0xff] %v17389_v26 }
 0xbb7   :  { %v8391_v38 = vpop.f32.mrf.mxu1 }
 0xbb8   :  { %v17247_v3 = vand.u32 4294901760, %v8413_v28  ;;  %v8416_v44 = vmul.f32 %v8398_v54, %v17223_v37  ;;  %v8392_v13 = vadd.f32 %v8391_v38, %v8229_v50  ;;  %v17261_v0 = vsub.f32 %v8414_v59, %v17231_v17  ;;  %v18615_v59 = vld [vmem:[#allocation12_spill] sm:$0xff]  ;;  %v18619_v38 = vld [vmem:[#allocation18_spill] sm:$0xff] }
 0xbb9   :  { %v8326_v8 = vadd.f32 %v18615_v59, %v8163_v42  ;;  %v17348_v50 = vld [vmem:[%s18464_s2 + $0x1e8] sm:$0xff]  ;;  %v17356_v54 = vand.u32 4294901760, %v17301_v6  ;;  %v8320_v63 = vadd.f32 %v18619_v38, %v8157_v56  ;;  %v17377_v42 = vand.u32 4294901760, %v17326_v7 }
 0xbba   :  { %v17263_v27 = vand.u32 4294901760, %v8416_v44  ;;  %v8415_v24 = vmul.f32 %v8392_v13, %v17239_v21  ;;  %v17280_v41 = vsub.f32 %v8413_v28, %v17247_v3  ;;  %v17311_v62 = vand.u32 4294901760, %v17261_v0  ;;  %18616 = vst [vmem:[#allocation20_spill] sm:$0xff] %v17348_v50 }
 0xbbb   :  { %v17362_v13 = vand.u32 4294901760, %v8407_v36  ;;  %v8404_v56 = vmul.f32 %v8326_v8, %v17348_v50  ;;  %v8550_v59 = vsub.f32 %v17301_v6, %v17356_v54  ;;  %v17398_v8 = vand.u32 4294901760, %v17342_v31 }
 0xbbc   :  { %v17283_v61 = vsub.f32 %v8416_v44, %v17263_v27  ;;  %v17285_v49 = vand.u32 4294901760, %v8415_v24  ;;  %13929 = vmatprep.subr.mxu0 %v17263_v27  ;;  %v17335_v12 = vand.u32 4294901760, %v17280_v41  ;;  %v8536_v28 = vsub.f32 %v17261_v0, %v17311_v62 }
 0xbbd   :  { %13930 = vmatpush3.msra.mxu0 %v17263_v27  ;;  %v8405_v44 = vmul.f32 %v8332_v35, %v17323_v30  ;;  %v17392_v35 = vsub.f32 %v8408_v20, %v17339_v40  ;;  %v8403_v48 = vmul.f32 %v8320_v63, %v17368_v9  ;;  %v17408_v20 = vld [vmem:[%s18464_s2 + $0x1d0] sm:$0xff]  ;;  %v8557_v38 = vsub.f32 %v17326_v7, %v17377_v42 }
 0xbbe   :  { %v17304_v25 = vsub.f32 %v8415_v24, %v17285_v49  ;;  %13931 = vmatprep.subr.mxu0 %v17285_v49  ;;  %v17308_v32 = vand.u32 4294901760, %v17283_v61  ;;  %v8543_v24 = vsub.f32 %v17280_v41, %v17335_v12  ;;  %18626 = vst [vmem:[#allocation12_spill] sm:$0xff] %v17408_v20  ;;  %v17417_v63 = vand.u32 4294901760, %v17371_v11 }
 0xbbf   :  { %13932 = vmatpush3.msra.mxu0 %v17285_v49  ;;  %v17402_v58 = vand.u32 4294901760, %v8405_v44  ;;  %v17420_v52 = vand.u32 4294901760, %v8404_v56  ;;  %v8564_v45 = vsub.f32 %v17342_v31, %v17398_v8 }
 0xbc0   :  { %13933 = vmatprep.subr.mxu0 %v17231_v17  ;;  %v8522_v60 = vsub.f32 %v17283_v61, %v17308_v32  ;;  %v17332_v29 = vand.u32 4294901760, %v17304_v25  ;;  %v8544_v22 = vand.u32 4294901760, %v8543_v24  ;;  %v8551_v24 = vand.u32 4294901760, %v8550_v59 }
 0xbc1   :  { %13934 = vmatpush3.msra.mxu0 %v17231_v17  ;;  %v8571_v59 = vsub.f32 %v17371_v11, %v17417_v63 }
 0xbc2   :  { %13935 = vmatprep.subr.mxu0 %v17247_v3  ;;  %v8523_v23 = vand.u32 4294901760, %v8522_v60  ;;  %v8529_v4 = vsub.f32 %v17304_v25, %v17332_v29  ;;  %v8537_v60 = vand.u32 4294901760, %v8536_v28  ;;  %v17411_v28 = vsub.f32 %v8407_v36, %v17362_v13 }
 0xbc3   :  { %13936 = vmatpush3.msra.mxu0 %v17247_v3  ;;  %v17424_v36 = vsub.f32 %v8406_v47, %v17383_v15  ;;  %v17437_v47 = vsub.f32 %v8405_v44, %v17402_v58  ;;  %v8565_v44 = vand.u32 4294901760, %v8564_v45 }
 0xbc4   :  { %13937 = vmatprep.subr.mxu0 %v17258_v2  ;;  %13964 = vmatprep.subr.mxu1 %v8523_v23  ;;  %v8530_v1 = vand.u32 4294901760, %v8529_v4  ;;  %v18625_v4 = vld [vmem:[#allocation8_spill] sm:$0xff] }
 0xbc5   :  { %13938 = vmatpush3.msra.mxu0 %v17258_v2  ;;  %13965 = vmatpush3.msra.mxu1 %v8523_v23  ;;  %v8308_v23 = vadd.f32 %v18625_v4, %v8145_v39  ;;  %v17430_v39 = vand.u32 4294901760, %v17392_v35  ;;  %v17443_v4 = vand.u32 4294901760, %v17411_v28  ;;  %v17467_v9 = vand.u32 4294901760, %v17437_v47 }
 0xbc6   :  { %13939 = vmatprep.subr.mxu0 %v17277_v51  ;;  %13966 = vmatprep.subr.mxu1 %v8530_v1 }
 0xbc7   :  { %13940 = vmatpush3.msra.mxu0 %v17277_v51  ;;  %13967 = vmatpush3.msra.mxu1 %v8530_v1  ;;  %v8402_v1 = vmul.f32 %v8314_v19, %v17389_v26  ;;  %v8401_v43 = vmul.f32 %v8308_v23, %v17408_v20  ;;  %v17433_v19 = vand.u32 4294901760, %v8403_v48  ;;  %v17449_v23 = vsub.f32 %v8404_v56, %v17420_v52 }
 0xbc8   :  { %13941 = vmatprep.subr.mxu0 %v17292_v18  ;;  %13968 = vmatprep.subr.mxu1 %v8537_v60  ;;  %v8572_v56 = vand.u32 4294901760, %v8571_v59  ;;  %v8585_v45 = vsub.f32 %v17411_v28, %v17443_v4  ;;  %18628 = vst [vmem:[#allocation24_spill] sm:$0xff] %v17467_v9 }
 0xbc9   :  { %13942 = vmatpush3.msra.mxu0 %v17292_v18  ;;  %13969 = vmatpush3.msra.mxu1 %v8537_v60  ;;  %v8558_v60 = vand.u32 4294901760, %v8557_v38  ;;  %v17445_v26 = vand.u32 4294901760, %v8402_v1  ;;  %v17455_v38 = vand.u32 4294901760, %v17424_v36  ;;  %v17457_v20 = vand.u32 4294901760, %v8401_v43 }
 0xbca   :  { %13943 = vmatprep.subr.mxu0 %v17317_v5  ;;  %13970 = vmatprep.subr.mxu1 %v8544_v22  ;;  %v17477_v59 = vand.u32 4294901760, %v17449_v23 }
 0xbcb   :  { %13944 = vmatpush3.msra.mxu0 %v17317_v5  ;;  %13971 = vmatpush3.msra.mxu1 %v8544_v22  ;;  %v8578_v22 = vsub.f32 %v17392_v35, %v17430_v39  ;;  %18627 = vst [vmem:[#allocation5_spill] sm:$0xff] %v17455_v38  ;;  %v17471_v50 = vsub.f32 %v8402_v1, %v17445_v26  ;;  %v8586_v1 = vand.u32 4294901760, %v8585_v45 }
 0xbcc   :  { %13945 = vmatprep.subr.mxu0 %v17339_v40  ;;  %13972 = vmatprep.subr.mxu1 %v8551_v24  ;;  %18629 = vst [vmem:[#allocation18_spill] sm:$0xff] %v17477_v59  ;;  %v17481_v30 = vsub.f32 %v8401_v43, %v17457_v20  ;;  %v8606_v43 = vsub.f32 %v17449_v23, %v17477_v59 }
 0xbcd   :  { %13946 = vmatpush3.msra.mxu0 %v17339_v40  ;;  %13973 = vmatpush3.msra.mxu1 %v8551_v24  ;;  %v17461_v24 = vsub.f32 %v8403_v48, %v17433_v19  ;;  %v8579_v48 = vand.u32 4294901760, %v8578_v22  ;;  %v17494_v14 = vand.u32 4294901760, %v17471_v50 }
 0xbce   :  { %13947 = vmatprep.subr.mxu0 %v17362_v13  ;;  %13974 = vmatprep.subr.mxu1 %v8558_v60  ;;  %v17501_v34 = vand.u32 4294901760, %v17481_v30 }
 0xbcf   :  { %13948 = vmatpush3.msra.mxu0 %v17362_v13  ;;  %13975 = vmatpush3.msra.mxu1 %v8558_v60  ;;  %v8592_v60 = vsub.f32 %v17424_v36, %v17455_v38  ;;  %v17487_v22 = vand.u32 4294901760, %v17461_v24  ;;  %18631 = vst [vmem:[#allocation13_spill] sm:$0xff] %v17494_v14 }
 0xbd0   :  { %13949 = vmatprep.subr.mxu0 %v17383_v15  ;;  %13976 = vmatprep.subr.mxu1 %v8565_v44 }
 0xbd1   :  { %13950 = vmatpush3.msra.mxu0 %v17383_v15  ;;  %13977 = vmatpush3.msra.mxu1 %v8565_v44  ;;  %v8599_v44 = vsub.f32 %v17437_v47, %v17467_v9  ;;  %18630 = vst [vmem:[#allocation6_spill] sm:$0xff] %v17487_v22 }
 0xbd2   :  { %13951 = vmatprep.subr.mxu0 %v17402_v58  ;;  %13978 = vmatprep.subr.mxu1 %v8572_v56 }
 0xbd3   :  { %13952 = vmatpush3.msra.mxu0 %v17402_v58  ;;  %13979 = vmatpush3.msra.mxu1 %v8572_v56  ;;  %v8593_v56 = vand.u32 4294901760, %v8592_v60  ;;  %v8600_v45 = vand.u32 4294901760, %v8599_v44  ;;  %v8607_v60 = vand.u32 4294901760, %v8606_v43 }
 0xbd4   :  { %13953 = vmatprep.subr.mxu0 %v17420_v52  ;;  %13980 = vmatprep.subr.mxu1 %v8579_v48 }
 0xbd5   :  { %13954 = vmatpush3.msra.mxu0 %v17420_v52  ;;  %13981 = vmatpush3.msra.mxu1 %v8579_v48  ;;  %v8613_v48 = vsub.f32 %v17461_v24, %v17487_v22  ;;  %v8627_v22 = vsub.f32 %v17481_v30, %v17501_v34 }
 0xbd6   :  { %13955 = vmatprep.subr.mxu0 %v17433_v19  ;;  %13982 = vmatprep.subr.mxu1 %v8586_v1 }
 0xbd7   :  { %13956 = vmatpush3.msra.mxu0 %v17433_v19  ;;  %13983 = vmatpush3.msra.mxu1 %v8586_v1  ;;  %v8620_v1 = vsub.f32 %v17471_v50, %v17494_v14  ;;  %v8614_v44 = vand.u32 4294901760, %v8613_v48  ;;  %v8628_v43 = vand.u32 4294901760, %v8627_v22 }
 0xbd8   :  { %13957 = vmatprep.subr.mxu0 %v17445_v26  ;;  %13984 = vmatprep.subr.mxu1 %v8593_v56 }
 0xbd9   :  { %13958 = vmatpush3.msra.mxu0 %v17445_v26  ;;  %13985 = vmatpush3.msra.mxu1 %v8593_v56  ;;  %v8621_v56 = vand.u32 4294901760, %v8620_v1 }
 0xbda   :  { %13959 = vmatprep.subr.mxu0 %v17457_v20  ;;  %13986 = vmatprep.subr.mxu1 %v8600_v45 }
 0xbdb   :  { %13960 = vmatpush3.msra.mxu0 %v17457_v20  ;;  %13987 = vmatpush3.msra.mxu1 %v8600_v45 }
 0xbdc   :  { %13988 = vmatprep.subr.mxu1 %v8607_v60  ;;  %13999 = vmatprep.subr.mxu0 %v17283_v61 }
 0xbdd   :  { %13989 = vmatpush3.msra.mxu1 %v8607_v60 }
 0xbde   :  { %13990 = vmatprep.subr.mxu1 %v8614_v44 }
 0xbdf   :  { %13991 = vmatpush3.msra.mxu1 %v8614_v44 }
 0xbe0   :  { %13992 = vmatprep.subr.mxu1 %v8621_v56  ;;  %v7234_v59 = vpop.xlane.xlu0 %7233 }
 0xbe1   :  { %v7236_v9 = vsub.f32 %v18632_v46, %v7234_v59  ;;  %13993 = vmatpush3.msra.mxu1 %v8621_v56 }
 0xbe2   :  { %13994 = vmatprep.subr.mxu1 %v8628_v43  ;;  %v7232_v14 = vpop.xlane.xlu1 %7231 }
 0xbe3   :  { %v7239_v45 = vmul.f32 1.442695, %v7236_v9  ;;  %13995 = vmatpush3.msra.mxu1 %v8628_v43  ;;  %v7235_v38 = vsub.f32 %v18633_v55, %v7232_v14 }
 0xbe4   :  { %14034 = vmatprep.subr.mxu1 %v17263_v27 }
 0xbe5   :  { %14613 = vpow2.f32 %v7239_v45  ;;  %v7237_v48 = vmul.f32 1.442695, %v7235_v38 }
 0xbe7   :  { %14615 = vpow2.f32 %v7237_v48 }
 0xbf2   :  { %v14614_v60 = vpop.eup %14613 }
 0xbf3   :  { %v17514_v1 = vand.u32 4294901760, %v14614_v60 }
 0xbf4   :  { %v14616_v44 = vpop.eup %14615 }
 0xbf5   :  { %v17517_v22 = vsub.f32 %v14614_v60, %v17514_v1  ;;  %v17519_v46 = vand.u32 4294901760, %v14616_v44  ;;  %v18644_v60 = vld [vmem:[#allocation20_spill] sm:$0xff] }
 0xbf7   :  { %13996 = vmatprep.mubr.f32.mxu1 %v17519_v46  ;;  %v17523_v9 = vsub.f32 %v14616_v44, %v17519_v46  ;;  %v17526_v55 = vand.u32 4294901760, %v17517_v22  ;;  %v17787_v44 = vand.u32 4294901760, %v18644_v60 }
 0xbf8   :  { %13997 = vmatmul.mubr.f32.vlgmr.msra.gmra.mxu1 %v17514_v1 }
 0xbf9   :  { %14035 = vmatpush3.msra.mxu1 %v17263_v27  ;;  %v17531_v14 = vand.u32 4294901760, %v17523_v9  ;;  %v8511_v38 = vsub.f32 %v17517_v22, %v17526_v55 }
 0xbfa   :  { %14036 = vmatprep.subr.mxu1 %v17285_v49 }
 0xbfb   :  { %14037 = vmatpush3.msra.mxu1 %v17285_v49  ;;  %14066 = vmatprep.mubr.f32.mxu1 %v17531_v14  ;;  %v8501_v59 = vsub.f32 %v17523_v9, %v17531_v14  ;;  %v17545_v43 = vand.u32 4294901760, %v8511_v38 }
 0xbfc   :  { %14038 = vmatprep.subr.mxu1 %v17231_v17 }
 0xbfd   :  { %14039 = vmatpush3.msra.mxu1 %v17231_v17  ;;  %v17542_v56 = vand.u32 4294901760, %v8501_v59 }
 0xbfe   :  { %14040 = vmatprep.subr.mxu1 %v17247_v3 }
 0xbff   :  { %14041 = vmatpush3.msra.mxu1 %v17247_v3  ;;  %13961 = vmatprep.mubr.f32.mxu0 %v17542_v56 }
 0xc00   :  { %14042 = vmatprep.subr.mxu1 %v17258_v2  ;;  %13962 = vmatmul.mubr.f32.vlgmr.msra.gmra.mxu0 %v17545_v43 }
 0xc01   :  { %14000 = vmatpush3.msra.mxu0 %v17283_v61  ;;  %14043 = vmatpush3.msra.mxu1 %v17258_v2 }
 0xc02   :  { %14001 = vmatprep.subr.mxu0 %v17304_v25  ;;  %14031 = vmatprep.mubr.f32.mxu0 %v17523_v9 }
 0xc03   :  { %14044 = vmatprep.subr.mxu1 %v17277_v51  ;;  %14002 = vmatpush3.msra.mxu0 %v17304_v25  ;;  %v17705_v25 = vand.u32 4294901760, %v17228_v16 }
 0xc04   :  { %14045 = vmatpush3.msra.mxu1 %v17277_v51  ;;  %14003 = vmatprep.subr.mxu0 %v17261_v0 }
 0xc05   :  { %14046 = vmatprep.subr.mxu1 %v17292_v18  ;;  %14004 = vmatpush3.msra.mxu0 %v17261_v0  ;;  %v17648_v0 = vand.u32 4294901760, %v17198_v53 }
 0xc06   :  { %14047 = vmatpush3.msra.mxu1 %v17292_v18  ;;  %14005 = vmatprep.subr.mxu0 %v17280_v41 }
 0xc07   :  { %14048 = vmatprep.subr.mxu1 %v17317_v5  ;;  %14006 = vmatpush3.msra.mxu0 %v17280_v41  ;;  %v17669_v41 = vand.u32 4294901760, %v17206_v57  ;;  %v17673_v61 = vsub.f32 %v17198_v53, %v17648_v0  ;;  %v17689_v53 = vand.u32 4294901760, %v17218_v33 }
 0xc08   :  { %14049 = vmatpush3.msra.mxu1 %v17317_v5  ;;  %14007 = vmatprep.subr.mxu0 %v17301_v6 }
 0xc09   :  { %14050 = vmatprep.subr.mxu1 %v17339_v40  ;;  %14008 = vmatpush3.msra.mxu0 %v17301_v6  ;;  %v17702_v6 = vand.u32 4294901760, %v17673_v61 }
 0xc0a   :  { %14051 = vmatpush3.msra.mxu1 %v17339_v40  ;;  %14009 = vmatprep.subr.mxu0 %v17326_v7 }
 0xc0b   :  { %14052 = vmatprep.subr.mxu1 %v17362_v13  ;;  %14010 = vmatpush3.msra.mxu0 %v17326_v7  ;;  %v17721_v7 = vsub.f32 %v17218_v33, %v17689_v53  ;;  %v17737_v33 = vsub.f32 %v17228_v16, %v17705_v25 }
 0xc0c   :  { %14053 = vmatpush3.msra.mxu1 %v17362_v13  ;;  %14011 = vmatprep.subr.mxu0 %v17342_v31 }
 0xc0d   :  { %14054 = vmatprep.subr.mxu1 %v17383_v15  ;;  %14012 = vmatpush3.msra.mxu0 %v17342_v31  ;;  %v17754_v16 = vand.u32 4294901760, %v17721_v7 }
 0xc0e   :  { %14055 = vmatpush3.msra.mxu1 %v17383_v15  ;;  %14013 = vmatprep.subr.mxu0 %v17371_v11 }
 0xc0f   :  { %14056 = vmatprep.subr.mxu1 %v17402_v58  ;;  %14014 = vmatpush3.msra.mxu0 %v17371_v11 }
 0xc10   :  { %14057 = vmatpush3.msra.mxu1 %v17402_v58  ;;  %14015 = vmatprep.subr.mxu0 %v17392_v35 }
 0xc11   :  { %14058 = vmatprep.subr.mxu1 %v17420_v52  ;;  %14016 = vmatpush3.msra.mxu0 %v17392_v35 }
 0xc12   :  { %14059 = vmatpush3.msra.mxu1 %v17420_v52  ;;  %14017 = vmatprep.subr.mxu0 %v17411_v28 }
 0xc13   :  { %14060 = vmatprep.subr.mxu1 %v17433_v19  ;;  %14018 = vmatpush3.msra.mxu0 %v17411_v28 }
 0xc14   :  { %14061 = vmatpush3.msra.mxu1 %v17433_v19  ;;  %14019 = vmatprep.subr.mxu0 %v17424_v36 }
 0xc15   :  { %14062 = vmatprep.subr.mxu1 %v17445_v26  ;;  %14020 = vmatpush3.msra.mxu0 %v17424_v36  ;;  %v17769_v36 = vand.u32 4294901760, %v17737_v33 }
 0xc16   :  { %14063 = vmatpush3.msra.mxu1 %v17445_v26  ;;  %14021 = vmatprep.subr.mxu0 %v17437_v47 }
 0xc17   :  { %14064 = vmatprep.subr.mxu1 %v17457_v20  ;;  %14022 = vmatpush3.msra.mxu0 %v17437_v47  ;;  %v9248_v59 = vsub.f32 %v17737_v33, %v17769_v36 }
 0xc18   :  { %14065 = vmatpush3.msra.mxu1 %v17457_v20  ;;  %14023 = vmatprep.subr.mxu0 %v17449_v23 }
 0xc19   :  { %14067 = vmatmul.mubr.f32.vlgmr.msra.gmra.mxu1 %v17526_v55  ;;  %14104 = vmatprep.subr.mxu1 %v17263_v27 }
 0xc1a   :  { %14024 = vmatpush3.msra.mxu0 %v17449_v23  ;;  %14105 = vmatpush3.msra.mxu1 %v17263_v27  ;;  %v17655_v27 = vand.u32 4294901760, %v17211_v10  ;;  %v18643_v23 = vld [vmem:[#allocation13_spill] sm:$0xff] }
 0xc1b   :  { %14136 = vmatprep.mubr.f32.mxu1 %v17519_v46  ;;  %14025 = vmatprep.subr.mxu0 %v17461_v24 }
 0xc1c   :  { %14106 = vmatprep.subr.mxu1 %v17285_v49  ;;  %14026 = vmatpush3.msra.mxu0 %v17461_v24  ;;  %v9241_v24 = vsub.f32 %v17721_v7, %v17754_v16 }
 0xc1d   :  { %14107 = vmatpush3.msra.mxu1 %v17285_v49  ;;  %14027 = vmatprep.subr.mxu0 %v17471_v50 }
 0xc1e   :  { %14108 = vmatprep.subr.mxu1 %v17231_v17  ;;  %14028 = vmatpush3.msra.mxu0 %v17471_v50  ;;  %v18637_v50 = vld [vmem:[#allocation14_spill] sm:$0xff] }
 0xc1f   :  { %14109 = vmatpush3.msra.mxu1 %v17231_v17  ;;  %14029 = vmatprep.subr.mxu0 %v17481_v30  ;;  %v17628_v17 = vand.u32 4294901760, %v17223_v37 }
 0xc20   :  { %14110 = vmatprep.subr.mxu1 %v17247_v3  ;;  %14030 = vmatpush3.msra.mxu0 %v17481_v30 }
 0xc21   :  { %14111 = vmatpush3.msra.mxu1 %v17247_v3  ;;  %14032 = vmatmul.mubr.f32.vlgmr.msra.gmra.mxu0 %v17517_v22  ;;  %v17637_v3 = vand.u32 4294901760, %v17239_v21 }
 0xc22   :  { %14069 = vmatprep.subr.mxu0 %v17308_v32  ;;  %14112 = vmatprep.subr.mxu1 %v17258_v2 }
 0xc23   :  { %14070 = vmatpush3.msra.mxu0 %v17308_v32  ;;  %14101 = vmatprep.mubr.f32.mxu0 %v17519_v46  ;;  %v18634_v32 = vld [vmem:[#allocation5_spill] sm:$0xff] }
 0xc24   :  { %14113 = vmatpush3.msra.mxu1 %v17258_v2  ;;  %14071 = vmatprep.subr.mxu0 %v17332_v29  ;;  %v17643_v2 = vsub.f32 %v17223_v37, %v17628_v17  ;;  %v17659_v37 = vsub.f32 %v17239_v21, %v17637_v3  ;;  %v17681_v21 = vsub.f32 %v17211_v10, %v17655_v27 }
 0xc25   :  { %14114 = vmatprep.subr.mxu1 %v17277_v51  ;;  %14072 = vmatpush3.msra.mxu0 %v17332_v29  ;;  %v17697_v10 = vsub.f32 %v17206_v57, %v17669_v41 }
 0xc26   :  { %14115 = vmatpush3.msra.mxu1 %v17277_v51  ;;  %14073 = vmatprep.subr.mxu0 %v17311_v62  ;;  %v17666_v51 = vand.u32 4294901760, %v17643_v2  ;;  %v17686_v49 = vand.u32 4294901760, %v17659_v37 }
 0xc27   :  { %14116 = vmatprep.subr.mxu1 %v17292_v18  ;;  %14074 = vmatpush3.msra.mxu0 %v17311_v62  ;;  %v17714_v62 = vand.u32 4294901760, %v17681_v21  ;;  %v17730_v31 = vand.u32 4294901760, %v17697_v10 }
 0xc28   :  { %14117 = vmatpush3.msra.mxu1 %v17292_v18  ;;  %14075 = vmatprep.subr.mxu0 %v17335_v12  ;;  %v9206_v18 = vsub.f32 %v17643_v2, %v17666_v51  ;;  %v9213_v57 = vsub.f32 %v17659_v37, %v17686_v49 }
 0xc29   :  { %14118 = vmatprep.subr.mxu1 %v17317_v5  ;;  %14076 = vmatpush3.msra.mxu0 %v17335_v12  ;;  %v18636_v12 = vld [vmem:[#allocation24_spill] sm:$0xff] }
 0xc2a   :  { %14119 = vmatpush3.msra.mxu1 %v17317_v5  ;;  %14077 = vmatprep.subr.mxu0 %v17356_v54  ;;  %v18635_v5 = vld [vmem:[#allocation7_spill] sm:$0xff]  ;;  %v9207_v29 = vand.u32 4294901760, %v9206_v18  ;;  %v9214_v11 = vand.u32 4294901760, %v9213_v57 }
 0xc2b   :  { %14120 = vmatprep.subr.mxu1 %v17339_v40  ;;  %14078 = vmatpush3.msra.mxu0 %v17356_v54  ;;  %v17717_v30 = vand.u32 4294901760, %v18635_v5  ;;  %v17733_v54 = vand.u32 4294901760, %v18637_v50 }
 0xc2c   :  { %14121 = vmatpush3.msra.mxu1 %v17339_v40  ;;  %14079 = vmatprep.subr.mxu0 %v17377_v42  ;;  %v9220_v40 = vsub.f32 %v17673_v61, %v17702_v6 }
 0xc2d   :  { %14122 = vmatprep.subr.mxu1 %v17362_v13  ;;  %14080 = vmatpush3.msra.mxu0 %v17377_v42  ;;  %v9227_v42 = vsub.f32 %v17681_v21, %v17714_v62  ;;  %v17750_v35 = vsub.f32 %v18635_v5, %v17717_v30 }
 0xc2e   :  { %14123 = vmatpush3.msra.mxu1 %v17362_v13  ;;  %14081 = vmatprep.subr.mxu0 %v17398_v8  ;;  %v18638_v13 = vld [vmem:[#allocation18_spill] sm:$0xff] }
 0xc2f   :  { %14124 = vmatprep.subr.mxu1 %v17383_v15  ;;  %14082 = vmatpush3.msra.mxu0 %v17398_v8  ;;  %v9221_v8 = vand.u32 4294901760, %v9220_v40  ;;  %v17783_v45 = vand.u32 4294901760, %v17750_v35 }
 0xc30   :  { %14125 = vmatpush3.msra.mxu1 %v17383_v15  ;;  %14083 = vmatprep.subr.mxu0 %v17417_v63  ;;  %v18639_v15 = vld [vmem:[#allocation10_spill] sm:$0xff] }
 0xc31   :  { %14126 = vmatprep.subr.mxu1 %v17402_v58  ;;  %14084 = vmatpush3.msra.mxu0 %v17417_v63  ;;  %v17764_v63 = vsub.f32 %v18637_v50, %v17733_v54  ;;  %v18646_v50 = vld [vmem:[#allocation9_spill] sm:$0xff] }
 0xc32   :  { %14127 = vmatpush3.msra.mxu1 %v17402_v58  ;;  %14085 = vmatprep.subr.mxu0 %v17430_v39  ;;  %v9234_v58 = vsub.f32 %v17697_v10, %v17730_v31 }
 0xc33   :  { %14128 = vmatprep.subr.mxu1 %v17420_v52  ;;  %14086 = vmatpush3.msra.mxu0 %v17430_v39  ;;  %v9228_v39 = vand.u32 4294901760, %v9227_v42  ;;  %v17797_v18 = vand.u32 4294901760, %v17764_v63 }
 0xc34   :  { %14129 = vmatpush3.msra.mxu1 %v17420_v52  ;;  %14087 = vmatprep.subr.mxu0 %v17443_v4  ;;  %v18641_v52 = vld [vmem:[#allocation6_spill] sm:$0xff]  ;;  %v9235_v48 = vand.u32 4294901760, %v9234_v58 }
 0xc35   :  { %14130 = vmatprep.subr.mxu1 %v17433_v19  ;;  %14088 = vmatpush3.msra.mxu0 %v17443_v4  ;;  %v9262_v42 = vsub.f32 %v17764_v63, %v17797_v18 }
 0xc36   :  { %14131 = vmatpush3.msra.mxu1 %v17433_v19  ;;  %14089 = vmatprep.subr.mxu0 %v18634_v32  ;;  %v18642_v19 = vld [vmem:[#allocation16_spill] sm:$0xff] }
 0xc37   :  { %14132 = vmatprep.subr.mxu1 %v17445_v26  ;;  %14090 = vmatpush3.msra.mxu0 %v18634_v32  ;;  %v17773_v47 = vand.u32 4294901760, %v18642_v19  ;;  %v18645_v32 = vld [vmem:[#allocation22_spill] sm:$0xff] }
 0xc38   :  { %14133 = vmatpush3.msra.mxu1 %v17445_v26  ;;  %14091 = vmatprep.subr.mxu0 %v18636_v12  ;;  %v17746_v26 = vand.u32 4294901760, %v18639_v15  ;;  %v17800_v57 = vand.u32 4294901760, %v18645_v32 }
 0xc39   :  { %14134 = vmatprep.subr.mxu1 %v17457_v20  ;;  %14092 = vmatpush3.msra.mxu0 %v18636_v12  ;;  %v17805_v5 = vsub.f32 %v18642_v19, %v17773_v47  ;;  %v9255_v12 = vsub.f32 %v17750_v35, %v17783_v45 }
 0xc3a   :  { %14135 = vmatpush3.msra.mxu1 %v17457_v20  ;;  %14093 = vmatprep.subr.mxu0 %v18638_v13  ;;  %v18640_v20 = vld [vmem:[#allocation23_spill] sm:$0xff]  ;;  %v17777_v4 = vsub.f32 %v18639_v15, %v17746_v26 }
 0xc3b   :  { %14137 = vmatmul.mubr.f32.vlgmr.msra.gmra.mxu1 %v17514_v1  ;;  %14174 = vmatprep.subr.mxu1 %v9207_v29  ;;  %v17760_v28 = vand.u32 4294901760, %v18640_v20 }
 0xc3c   :  { %14094 = vmatpush3.msra.mxu0 %v18638_v13  ;;  %14175 = vmatpush3.msra.mxu1 %v9207_v29  ;;  %v9242_v29 = vand.u32 4294901760, %v9241_v24  ;;  %v17811_v40 = vand.u32 4294901760, %v17777_v4  ;;  %v17814_v13 = vand.u32 4294901760, %v18646_v50 }
 0xc3d   :  { %14206 = vmatprep.mubr.f32.mxu1 %v17519_v46  ;;  %14095 = vmatprep.subr.mxu0 %v18641_v52  ;;  %v17791_v38 = vsub.f32 %v18640_v20, %v17760_v28  ;;  %v17834_v20 = vsub.f32 %v18645_v32, %v17800_v57 }
 0xc3e   :  { %14176 = vmatprep.subr.mxu1 %v9214_v11  ;;  %14096 = vmatpush3.msra.mxu0 %v18641_v52  ;;  %v9269_v52 = vsub.f32 %v17777_v4, %v17811_v40  ;;  %v17845_v19 = vsub.f32 %v18646_v50, %v17814_v13 }
 0xc3f   :  { %14177 = vmatpush3.msra.mxu1 %v9214_v11  ;;  %14097 = vmatprep.subr.mxu0 %v18643_v23  ;;  %v9249_v11 = vand.u32 4294901760, %v9248_v59  ;;  %v17826_v15 = vand.u32 4294901760, %v17791_v38 }
 0xc40   :  { %14178 = vmatprep.subr.mxu1 %v9221_v8  ;;  %14098 = vmatpush3.msra.mxu0 %v18643_v23  ;;  %v9263_v23 = vand.u32 4294901760, %v9262_v42  ;;  %v9270_v59 = vand.u32 4294901760, %v9269_v52 }
 0xc41   :  { %14179 = vmatpush3.msra.mxu1 %v9221_v8  ;;  %14099 = vmatprep.subr.mxu0 %v17501_v34  ;;  %v18647_v8 = vld [vmem:[#allocation12_spill] sm:$0xff]  ;;  %v9276_v24 = vsub.f32 %v17791_v38, %v17826_v15 }
 0xc42   :  { %14180 = vmatprep.subr.mxu1 %v9228_v39  ;;  %14100 = vmatpush3.msra.mxu0 %v17501_v34  ;;  %v17819_v34 = vsub.f32 %v18644_v60, %v17787_v44  ;;  %v17829_v58 = vand.u32 4294901760, %v18647_v8 }
 0xc43   :  { %14181 = vmatpush3.msra.mxu1 %v9228_v39  ;;  %14102 = vmatmul.mubr.f32.vlgmr.msra.gmra.mxu0 %v17514_v1  ;;  %v17840_v39 = vand.u32 4294901760, %v17805_v5 }
 0xc44   :  { %14139 = vmatprep.subr.mxu0 %v17628_v17  ;;  %14182 = vmatprep.subr.mxu1 %v9235_v48  ;;  %v17856_v60 = vsub.f32 %v18647_v8, %v17829_v58 }
 0xc45   :  { %14140 = vmatpush3.msra.mxu0 %v17628_v17  ;;  %14171 = vmatprep.mubr.f32.mxu0 %v17542_v56  ;;  %v9256_v56 = vand.u32 4294901760, %v9255_v12  ;;  %v9283_v32 = vsub.f32 %v17805_v5, %v17840_v39  ;;  %v9277_v12 = vand.u32 4294901760, %v9276_v24 }
 0xc46   :  { %14183 = vmatpush3.msra.mxu1 %v9235_v48  ;;  %14141 = vmatprep.subr.mxu0 %v17637_v3  ;;  %v17851_v48 = vand.u32 4294901760, %v17819_v34 }
 0xc47   :  { %14184 = vmatprep.subr.mxu1 %v9242_v29  ;;  %14142 = vmatpush3.msra.mxu0 %v17637_v3  ;;  %v9284_v42 = vand.u32 4294901760, %v9283_v32 }
 0xc48   :  { %14185 = vmatpush3.msra.mxu1 %v9242_v29  ;;  %14143 = vmatprep.subr.mxu0 %v17648_v0  ;;  %v17862_v29 = vand.u32 4294901760, %v17834_v20  ;;  %v9290_v50 = vsub.f32 %v17819_v34, %v17851_v48 }
 0xc49   :  { %14186 = vmatprep.subr.mxu1 %v9249_v11  ;;  %14144 = vmatpush3.msra.mxu0 %v17648_v0 }
 0xc4a   :  { %14187 = vmatpush3.msra.mxu1 %v9249_v11  ;;  %14145 = vmatprep.subr.mxu0 %v17655_v27  ;;  %v17869_v11 = vand.u32 4294901760, %v17845_v19  ;;  %v9297_v8 = vsub.f32 %v17834_v20, %v17862_v29  ;;  %v9291_v52 = vand.u32 4294901760, %v9290_v50 }
 0xc4b   :  { %14188 = vmatprep.subr.mxu1 %v9256_v56  ;;  %14146 = vmatpush3.msra.mxu0 %v17655_v27 }
 0xc4c   :  { %14189 = vmatpush3.msra.mxu1 %v9256_v56  ;;  %14147 = vmatprep.subr.mxu0 %v17669_v41  ;;  %v17876_v56 = vand.u32 4294901760, %v17856_v60  ;;  %v9298_v24 = vand.u32 4294901760, %v9297_v8 }
 0xc4d   :  { %14190 = vmatprep.subr.mxu1 %v9263_v23  ;;  %14148 = vmatpush3.msra.mxu0 %v17669_v41 }
 0xc4e   :  { %14191 = vmatpush3.msra.mxu1 %v9263_v23  ;;  %14149 = vmatprep.subr.mxu0 %v17689_v53  ;;  %v9304_v23 = vsub.f32 %v17845_v19, %v17869_v11  ;;  %v9311_v32 = vsub.f32 %v17856_v60, %v17876_v56 }
 0xc4f   :  { %14192 = vmatprep.subr.mxu1 %v9270_v59  ;;  %14150 = vmatpush3.msra.mxu0 %v17689_v53 }
 0xc50   :  { %14193 = vmatpush3.msra.mxu1 %v9270_v59  ;;  %14151 = vmatprep.subr.mxu0 %v17705_v25  ;;  %v9305_v59 = vand.u32 4294901760, %v9304_v23 }
 0xc51   :  { %14194 = vmatprep.subr.mxu1 %v9277_v12  ;;  %14152 = vmatpush3.msra.mxu0 %v17705_v25 }
 0xc52   :  { %14195 = vmatpush3.msra.mxu1 %v9277_v12  ;;  %14153 = vmatprep.subr.mxu0 %v17717_v30  ;;  %v9312_v12 = vand.u32 4294901760, %v9311_v32 }
 0xc53   :  { %14196 = vmatprep.subr.mxu1 %v9284_v42  ;;  %14154 = vmatpush3.msra.mxu0 %v17717_v30 }
 0xc54   :  { %14197 = vmatpush3.msra.mxu1 %v9284_v42  ;;  %14155 = vmatprep.subr.mxu0 %v17733_v54 }
 0xc55   :  { %14198 = vmatprep.subr.mxu1 %v9291_v52  ;;  %14156 = vmatpush3.msra.mxu0 %v17733_v54 }
 0xc56   :  { %14199 = vmatpush3.msra.mxu1 %v9291_v52  ;;  %14157 = vmatprep.subr.mxu0 %v17746_v26 }
 0xc57   :  { %14200 = vmatprep.subr.mxu1 %v9298_v24  ;;  %14158 = vmatpush3.msra.mxu0 %v17746_v26 }
 0xc58   :  { %14201 = vmatpush3.msra.mxu1 %v9298_v24  ;;  %14159 = vmatprep.subr.mxu0 %v17760_v28 }
 0xc59   :  { %14202 = vmatprep.subr.mxu1 %v9305_v59  ;;  %14160 = vmatpush3.msra.mxu0 %v17760_v28 }
 0xc5a   :  { %14203 = vmatpush3.msra.mxu1 %v9305_v59  ;;  %14161 = vmatprep.subr.mxu0 %v17773_v47 }
 0xc5b   :  { %14204 = vmatprep.subr.mxu1 %v9312_v12  ;;  %14162 = vmatpush3.msra.mxu0 %v17773_v47 }
 0xc5c   :  { %14205 = vmatpush3.msra.mxu1 %v9312_v12  ;;  %14163 = vmatprep.subr.mxu0 %v17787_v44 }
 0xc5d   :  { %14207 = vmatmul.mubr.f32.vlgmr.msra.gmra.mxu1 %v17514_v1  ;;  %14244 = vmatprep.subr.mxu1 %v17628_v17 }
 0xc5e   :  { %14164 = vmatpush3.msra.mxu0 %v17787_v44  ;;  %14245 = vmatpush3.msra.mxu1 %v17628_v17 }
 0xc5f   :  { %14276 = vmatprep.mubr.f32.mxu1 %v17531_v14  ;;  %14165 = vmatprep.subr.mxu0 %v17800_v57 }
 0xc60   :  { %14246 = vmatprep.subr.mxu1 %v17637_v3  ;;  %14166 = vmatpush3.msra.mxu0 %v17800_v57 }
 0xc61   :  { %14247 = vmatpush3.msra.mxu1 %v17637_v3  ;;  %14167 = vmatprep.subr.mxu0 %v17814_v13 }
 0xc62   :  { %14248 = vmatprep.subr.mxu1 %v17648_v0  ;;  %14168 = vmatpush3.msra.mxu0 %v17814_v13 }
 0xc63   :  { %14249 = vmatpush3.msra.mxu1 %v17648_v0  ;;  %14169 = vmatprep.subr.mxu0 %v17829_v58 }
 0xc64   :  { %14250 = vmatprep.subr.mxu1 %v17655_v27  ;;  %14170 = vmatpush3.msra.mxu0 %v17829_v58 }
 0xc65   :  { %14251 = vmatpush3.msra.mxu1 %v17655_v27  ;;  %14172 = vmatmul.mubr.f32.vlgmr.msra.gmra.mxu0 %v17545_v43 }
 0xc66   :  { %14209 = vmatprep.subr.mxu0 %v17643_v2  ;;  %14252 = vmatprep.subr.mxu1 %v17669_v41 }
 0xc67   :  { %14210 = vmatpush3.msra.mxu0 %v17643_v2  ;;  %14241 = vmatprep.mubr.f32.mxu0 %v17523_v9  ;;  %v6017_v9 = vld [vmem:[%s18463_s1 + $0xa8] sm:$0xff] }
 0xc68   :  { %14253 = vmatpush3.msra.mxu1 %v17669_v41  ;;  %14211 = vmatprep.subr.mxu0 %v17659_v37  ;;  %v18053_v43 = vand.u32 4294901760, %v6017_v9 }
 0xc69   :  { %14254 = vmatprep.subr.mxu1 %v17689_v53  ;;  %14212 = vmatpush3.msra.mxu0 %v17659_v37 }
 0xc6a   :  { %14255 = vmatpush3.msra.mxu1 %v17689_v53  ;;  %14213 = vmatprep.subr.mxu0 %v17673_v61 }
 0xc6b   :  { %14256 = vmatprep.subr.mxu1 %v17705_v25  ;;  %14214 = vmatpush3.msra.mxu0 %v17673_v61 }
 0xc6c   :  { %14257 = vmatpush3.msra.mxu1 %v17705_v25  ;;  %14215 = vmatprep.subr.mxu0 %v17681_v21 }
 0xc6d   :  { %14258 = vmatprep.subr.mxu1 %v17717_v30  ;;  %14216 = vmatpush3.msra.mxu0 %v17681_v21 }
 0xc6e   :  { %14259 = vmatpush3.msra.mxu1 %v17717_v30  ;;  %14217 = vmatprep.subr.mxu0 %v17697_v10 }
 0xc6f   :  { %14260 = vmatprep.subr.mxu1 %v17733_v54  ;;  %14218 = vmatpush3.msra.mxu0 %v17697_v10 }
 0xc70   :  { %14261 = vmatpush3.msra.mxu1 %v17733_v54  ;;  %14219 = vmatprep.subr.mxu0 %v17721_v7 }
 0xc71   :  { %14262 = vmatprep.subr.mxu1 %v17746_v26  ;;  %14220 = vmatpush3.msra.mxu0 %v17721_v7 }
 0xc72   :  { %14263 = vmatpush3.msra.mxu1 %v17746_v26  ;;  %14221 = vmatprep.subr.mxu0 %v17737_v33 }
 0xc73   :  { %14264 = vmatprep.subr.mxu1 %v17760_v28  ;;  %14222 = vmatpush3.msra.mxu0 %v17737_v33 }
 0xc74   :  { %14265 = vmatpush3.msra.mxu1 %v17760_v28  ;;  %14223 = vmatprep.subr.mxu0 %v17750_v35 }
 0xc75   :  { %14266 = vmatprep.subr.mxu1 %v17773_v47  ;;  %14224 = vmatpush3.msra.mxu0 %v17750_v35 }
 0xc76   :  { %14267 = vmatpush3.msra.mxu1 %v17773_v47  ;;  %14225 = vmatprep.subr.mxu0 %v17764_v63 }
 0xc77   :  { %14268 = vmatprep.subr.mxu1 %v17787_v44  ;;  %14226 = vmatpush3.msra.mxu0 %v17764_v63 }
 0xc78   :  { %14269 = vmatpush3.msra.mxu1 %v17787_v44  ;;  %14227 = vmatprep.subr.mxu0 %v17777_v4 }
 0xc79   :  { %14270 = vmatprep.subr.mxu1 %v17800_v57  ;;  %14228 = vmatpush3.msra.mxu0 %v17777_v4 }
 0xc7a   :  { %14271 = vmatpush3.msra.mxu1 %v17800_v57  ;;  %14229 = vmatprep.subr.mxu0 %v17791_v38 }
 0xc7b   :  { %14272 = vmatprep.subr.mxu1 %v17814_v13  ;;  %14230 = vmatpush3.msra.mxu0 %v17791_v38 }
 0xc7c   :  { %14273 = vmatpush3.msra.mxu1 %v17814_v13  ;;  %14231 = vmatprep.subr.mxu0 %v17805_v5 }
 0xc7d   :  { %14274 = vmatprep.subr.mxu1 %v17829_v58  ;;  %14232 = vmatpush3.msra.mxu0 %v17805_v5 }
 0xc7e   :  { %14275 = vmatpush3.msra.mxu1 %v17829_v58  ;;  %14233 = vmatprep.subr.mxu0 %v17819_v34 }
 0xc7f   :  { %14277 = vmatmul.mubr.f32.vlgmr.msra.gmra.mxu1 %v17526_v55  ;;  %14314 = vmatprep.subr.mxu1 %v17628_v17 }
 0xc80   :  { %14234 = vmatpush3.msra.mxu0 %v17819_v34  ;;  %14315 = vmatpush3.msra.mxu1 %v17628_v17 }
 0xc81   :  { %14346 = vmatprep.mubr.f32.mxu1 %v17519_v46  ;;  %14235 = vmatprep.subr.mxu0 %v17834_v20 }
 0xc82   :  { %14316 = vmatprep.subr.mxu1 %v17637_v3  ;;  %14236 = vmatpush3.msra.mxu0 %v17834_v20 }
 0xc83   :  { %14317 = vmatpush3.msra.mxu1 %v17637_v3  ;;  %14237 = vmatprep.subr.mxu0 %v17845_v19 }
 0xc84   :  { %14318 = vmatprep.subr.mxu1 %v17648_v0  ;;  %14238 = vmatpush3.msra.mxu0 %v17845_v19 }
 0xc85   :  { %14319 = vmatpush3.msra.mxu1 %v17648_v0  ;;  %14239 = vmatprep.subr.mxu0 %v17856_v60  ;;  %v18067_v0 = vsub.f32 %v6017_v9, %v18053_v43 }
 0xc86   :  { %14320 = vmatprep.subr.mxu1 %v17655_v27  ;;  %14240 = vmatpush3.msra.mxu0 %v17856_v60 }
 0xc87   :  { %14321 = vmatpush3.msra.mxu1 %v17655_v27  ;;  %14242 = vmatmul.mubr.f32.vlgmr.msra.gmra.mxu0 %v17517_v22  ;;  %v6019_v22 = vld [vmem:[%s18463_s1 + $0xb8] sm:$0xff] }
 0xc88   :  { %14279 = vmatprep.subr.mxu0 %v17666_v51  ;;  %14322 = vmatprep.subr.mxu1 %v17669_v41  ;;  %v18049_v55 = vand.u32 4294901760, %v6019_v22 }
 0xc89   :  { %14280 = vmatpush3.msra.mxu0 %v17666_v51  ;;  %14311 = vmatprep.mubr.f32.mxu0 %v17519_v46  ;;  %v6018_v46 = vld [vmem:[%s18463_s1 + $0xb0] sm:$0xff] }
 0xc8a   :  { %14323 = vmatpush3.msra.mxu1 %v17669_v41  ;;  %14281 = vmatprep.subr.mxu0 %v17686_v49  ;;  %v18051_v14 = vand.u32 4294901760, %v6018_v46  ;;  %v18061_v3 = vsub.f32 %v6019_v22, %v18049_v55  ;;  %v18081_v41 = vand.u32 4294901760, %v18067_v0 }
 0xc8b   :  { %14324 = vmatprep.subr.mxu1 %v17689_v53  ;;  %14282 = vmatpush3.msra.mxu0 %v17686_v49 }
 0xc8c   :  { %14325 = vmatpush3.msra.mxu1 %v17689_v53  ;;  %14283 = vmatprep.subr.mxu0 %v17702_v6  ;;  %v18064_v2 = vsub.f32 %v6018_v46, %v18051_v14  ;;  %v18075_v37 = vand.u32 4294901760, %v18061_v3  ;;  %v9932_v53 = vsub.f32 %v18067_v0, %v18081_v41 }
 0xc8d   :  { %14326 = vmatprep.subr.mxu1 %v17705_v25  ;;  %14284 = vmatpush3.msra.mxu0 %v17702_v6 }
 0xc8e   :  { %14327 = vmatpush3.msra.mxu1 %v17705_v25  ;;  %14285 = vmatprep.subr.mxu0 %v17714_v62  ;;  %v18078_v51 = vand.u32 4294901760, %v18064_v2  ;;  %v9918_v21 = vsub.f32 %v18061_v3, %v18075_v37 }
 0xc8f   :  { %14328 = vmatprep.subr.mxu1 %v17717_v30  ;;  %14286 = vmatpush3.msra.mxu0 %v17714_v62  ;;  %v9933_v62 = vand.u32 4294901760, %v9932_v53 }
 0xc90   :  { %14329 = vmatpush3.msra.mxu1 %v17717_v30  ;;  %14287 = vmatprep.subr.mxu0 %v17730_v31  ;;  %v9925_v49 = vsub.f32 %v18064_v2, %v18078_v51  ;;  %v9919_v10 = vand.u32 4294901760, %v9918_v21 }
 0xc91   :  { %14330 = vmatprep.subr.mxu1 %v17733_v54  ;;  %14288 = vmatpush3.msra.mxu0 %v17730_v31 }
 0xc92   :  { %14331 = vmatpush3.msra.mxu1 %v17733_v54  ;;  %14289 = vmatprep.subr.mxu0 %v17754_v16  ;;  %v9926_v6 = vand.u32 4294901760, %v9925_v49 }
 0xc93   :  { %14332 = vmatprep.subr.mxu1 %v17746_v26  ;;  %14290 = vmatpush3.msra.mxu0 %v17754_v16 }
 0xc94   :  { %14333 = vmatpush3.msra.mxu1 %v17746_v26  ;;  %14291 = vmatprep.subr.mxu0 %v17769_v36 }
 0xc95   :  { %14334 = vmatprep.subr.mxu1 %v17760_v28  ;;  %14292 = vmatpush3.msra.mxu0 %v17769_v36 }
 0xc96   :  { %14335 = vmatpush3.msra.mxu1 %v17760_v28  ;;  %14293 = vmatprep.subr.mxu0 %v17783_v45 }
 0xc97   :  { %14336 = vmatprep.subr.mxu1 %v17773_v47  ;;  %14294 = vmatpush3.msra.mxu0 %v17783_v45 }
 0xc98   :  { %14337 = vmatpush3.msra.mxu1 %v17773_v47  ;;  %14295 = vmatprep.subr.mxu0 %v17797_v18 }
 0xc99   :  { %14338 = vmatprep.subr.mxu1 %v17787_v44  ;;  %14296 = vmatpush3.msra.mxu0 %v17797_v18 }
 0xc9a   :  { %14339 = vmatpush3.msra.mxu1 %v17787_v44  ;;  %14297 = vmatprep.subr.mxu0 %v17811_v40 }
 0xc9b   :  { %14340 = vmatprep.subr.mxu1 %v17800_v57  ;;  %14298 = vmatpush3.msra.mxu0 %v17811_v40 }
 0xc9c   :  { %14341 = vmatpush3.msra.mxu1 %v17800_v57  ;;  %14299 = vmatprep.subr.mxu0 %v17826_v15 }
 0xc9d   :  { %14342 = vmatprep.subr.mxu1 %v17814_v13  ;;  %14300 = vmatpush3.msra.mxu0 %v17826_v15 }
 0xc9e   :  { %14343 = vmatpush3.msra.mxu1 %v17814_v13  ;;  %14301 = vmatprep.subr.mxu0 %v17840_v39 }
 0xc9f   :  { %14344 = vmatprep.subr.mxu1 %v17829_v58  ;;  %14302 = vmatpush3.msra.mxu0 %v17840_v39 }
 0xca0   :  { %14345 = vmatpush3.msra.mxu1 %v17829_v58  ;;  %14303 = vmatprep.subr.mxu0 %v17851_v48 }
 0xca1   :  { %14347 = vmatmul.mubr.f32.vlgmr.msra.gmra.mxu1 %v17514_v1  ;;  %14304 = vmatpush3.msra.mxu0 %v17851_v48 }
 0xca2   :  { %14305 = vmatprep.subr.mxu0 %v17862_v29  ;;  %14360 = vmatprep.subr.mxu1 %v9919_v10 }
 0xca3   :  { %14306 = vmatpush3.msra.mxu0 %v17862_v29  ;;  %14361 = vmatpush3.msra.mxu1 %v9919_v10 }
 0xca4   :  { %14307 = vmatprep.subr.mxu0 %v17869_v11  ;;  %14362 = vmatprep.subr.mxu1 %v9926_v6 }
 0xca5   :  { %14308 = vmatpush3.msra.mxu0 %v17869_v11  ;;  %14363 = vmatpush3.msra.mxu1 %v9926_v6 }
 0xca6   :  { %14309 = vmatprep.subr.mxu0 %v17876_v56  ;;  %14364 = vmatprep.subr.mxu1 %v9933_v62 }
 0xca7   :  { %14310 = vmatpush3.msra.mxu0 %v17876_v56  ;;  %14365 = vmatpush3.msra.mxu1 %v9933_v62 }
 0xca8   :  { %14312 = vmatmul.mubr.f32.vlgmr.msra.gmra.mxu0 %v17514_v1  ;;  %v6016_v1 = vld [vmem:[%s18463_s1 + $0xa0] sm:$0xff]  ;;  %14349 = vmatprep.subr.mxu0 %v18049_v55 }
 0xca9   :  { %v18058_v17 = vand.u32 4294901760, %v6016_v1  ;;  %14350 = vmatpush3.msra.mxu0 %v18049_v55 }
 0xcaa   :  { %14351 = vmatprep.subr.mxu0 %v18051_v14 }
 0xcab   :  { %v18071_v27 = vsub.f32 %v6016_v1, %v18058_v17  ;;  %14352 = vmatpush3.msra.mxu0 %v18051_v14 }
 0xcac   :  { %14353 = vmatprep.subr.mxu0 %v18053_v43 }
 0xcad   :  { %v18085_v61 = vand.u32 4294901760, %v18071_v27  ;;  %14354 = vmatpush3.msra.mxu0 %v18053_v43 }
 0xcae   :  { %14355 = vmatprep.subr.mxu0 %v18058_v17 }
 0xcaf   :  { %v9939_v25 = vsub.f32 %v18071_v27, %v18085_v61  ;;  %14356 = vmatpush3.msra.mxu0 %v18058_v17 }
 0xcb0   :  { %14371 = vmatprep.subr.mxu0 %v18061_v3 }
 0xcb1   :  { %v9940_v30 = vand.u32 4294901760, %v9939_v25 }
 0xcb3   :  { %14366 = vmatprep.subr.mxu1 %v9940_v30 }
 0xcb4   :  { %14367 = vmatpush3.msra.mxu1 %v9940_v30 }
 0xcb5   :  { %14382 = vmatprep.subr.mxu1 %v18049_v55 }
 0xcb8   :  { %v13998_v31 = vpop.f32.mrf.mxu1 }
 0xcba   :  { %v8665_v26 = vpop.f32.mrf.mxu1 }
 0xcc0   :  { %v13963_v7 = vpop.f32.mrf.mxu0 }
 0xcc1   :  { %v8672_v23 = vadd.f32 %v13998_v31, %v13963_v7 }
 0xcc2   :  { %v8504_v54 = vpop.f32.mrf.mxu0 }
 0xcc3   :  { %v8666_v32 = vadd.f32 %v8665_v26, %v8504_v54 }
 0xcd9   :  { %v14068_v35 = vpop.f32.mrf.mxu1 }
 0xcdb   :  { %v8871_v63 = vpop.f32.mrf.mxu1 }
 0xce1   :  { %v14033_v33 = vpop.f32.mrf.mxu0 }
 0xce2   :  { %v8783_v59 = vadd.f32 %v14033_v33, %v8672_v23 }
 0xce3   :  { %v8775_v16 = vpop.f32.mrf.mxu0 }
 0xce4   :  { %v8776_v12 = vadd.f32 %v8775_v16, %v8666_v32  ;;  %v8880_v22 = vadd.f32 %v14068_v35, %v8783_v59 }
 0xce6   :  { %v8872_v9 = vadd.f32 %v8871_v63, %v8776_v12  ;;  %v10374_v12 = vld [vmem:[%s18463_s1 + $0xe0] sm:$0xff] }
 0xcfb   :  { %v14138_v36 = vpop.f32.mrf.mxu1 }
 0xcfd   :  { %v9091_v45 = vpop.f32.mrf.mxu1 }
 0xd03   :  { %v14103_v28 = vpop.f32.mrf.mxu0 }
 0xd04   :  { %v9005_v46 = vadd.f32 %v14103_v28, %v8880_v22  ;;  %v18146_v22 = vand.u32 4294901760, %v10374_v12 }
 0xd05   :  { %v8998_v47 = vpop.f32.mrf.mxu0 }
 0xd06   :  { %v8999_v1 = vadd.f32 %v8998_v47, %v8872_v9  ;;  %v9098_v21 = vadd.f32 %v14138_v36, %v9005_v46  ;;  %v10373_v46 = vld [vmem:[%s18463_s1 + $0xd8] sm:$0xff]  ;;  %v18152_v9 = vsub.f32 %v10374_v12, %v18146_v22 }
 0xd08   :  { %v9092_v53 = vadd.f32 %v9091_v45, %v8999_v1  ;;  %v18154_v1 = vand.u32 4294901760, %v10373_v46 }
 0xd1d   :  { %v14208_v44 = vpop.f32.mrf.mxu1 }
 0xd1f   :  { %v9349_v57 = vpop.f32.mrf.mxu1 }
 0xd25   :  { %v14173_v4 = vpop.f32.mrf.mxu0 }
 0xd26   :  { %v9356_v5 = vadd.f32 %v14208_v44, %v14173_v4 }
 0xd27   :  { %v9188_v38 = vpop.f32.mrf.mxu0 }
 0xd28   :  { %v9350_v34 = vadd.f32 %v9349_v57, %v9188_v38 }
 0xd3f   :  { %v14278_v40 = vpop.f32.mrf.mxu1 }
 0xd41   :  { %v9555_v20 = vpop.f32.mrf.mxu1 }
 0xd47   :  { %v14243_v18 = vpop.f32.mrf.mxu0 }
 0xd48   :  { %v9467_v15 = vadd.f32 %v14243_v18, %v9356_v5 }
 0xd49   :  { %v9459_v13 = vpop.f32.mrf.mxu0 }
 0xd4a   :  { %v9460_v58 = vadd.f32 %v9459_v13, %v9350_v34  ;;  %v9564_v39 = vadd.f32 %v14278_v40, %v9467_v15 }
 0xd4c   :  { %v9556_v29 = vadd.f32 %v9555_v20, %v9460_v58  ;;  %v18648_v20 = vld [vmem:[#allocation19_spill] sm:$0xff] }
 0xd61   :  { %v14348_v19 = vpop.f32.mrf.mxu1 }
 0xd63   :  { %v9775_v8 = vpop.f32.mrf.mxu1 }
 0xd68   :  { %v14313_v48 = vpop.f32.mrf.mxu0 }
 0xd69   :  { %v9689_v60 = vadd.f32 %v14313_v48, %v9564_v39  ;;  %v18649_v48 = vld [vmem:[#allocation11_spill] sm:$0xff] }
 0xd6a   :  { %v9682_v50 = vpop.f32.mrf.mxu0 }
 0xd6b   :  { %v9782_v11 = vadd.f32 %v14348_v19, %v9689_v60  ;;  %v9683_v42 = vadd.f32 %v9682_v50, %v9556_v29 }
 0xd6d   :  { %v9786_v56 = vmax.f32 %v9782_v11, 1.1754944e-38  ;;  %v9776_v52 = vadd.f32 %v9775_v8, %v9683_v42 }
 0xd6f   :  { %14617 = vrcp.f32 %v9786_v56  ;;  %v9785_v24 = vmax.f32 %v9776_v52, 1.1754944e-38 }
 0xd71   :  { %14619 = vrcp.f32 %v9785_v24 }
 0xd7c   :  { %v14618_v49 = vpop.eup %14617 }
 0xd7d   :  { %v9790_v10 = vmul.f32 %v14618_v49, %v9098_v21  ;;  %v10372_v21 = vld [vmem:[%s18463_s1 + $0xd0] sm:$0xff]  ;;  %v18162_v49 = vand.u32 4294901760, %v18152_v9 }
 0xd7e   :  { %v14620_v6 = vpop.eup %14619 }
 0xd7f   :  { %v9788_v25 = vmul.f32 %v14620_v6, %v9092_v53  ;;  %v9799_v62 = vsel %vm28_vm0, %v9790_v10, 0  ;;  %v18165_v53 = vsub.f32 %v10373_v46, %v18154_v1  ;;  %v18167_v10 = vand.u32 4294901760, %v10372_v21  ;;  %v10371_v6 = vld [vmem:[%s18463_s1 + $0xc8] sm:$0xff] }
 0xd80   :  { %v9880_v30 = vand.u32 4294901760, %v9799_v62  ;;  %v10919_v46 = vld [vmem:[%s18463_s1 + $0x108] sm:$0xff] }
 0xd81   :  { %v9796_v7 = vsel %vm28_vm0, %v9788_v25, 0  ;;  %v10503_v25 = vsub.f32 %v18152_v9, %v18162_v49 }
 0xd82   :  { %v9870_v31 = vand.u32 4294901760, %v9796_v7  ;;  %v9881_v54 = vsub.f32 %v9799_v62, %v9880_v30  ;;  %v18177_v62 = vand.u32 4294901760, %v18165_v53 }
 0xd84   :  { %14368 = vmatprep.mubr.f32.mxu1 %v9870_v31  ;;  %v9871_v33 = vsub.f32 %v9796_v7, %v9870_v31  ;;  %v9882_v26 = vand.u32 4294901760, %v9881_v54  ;;  %v18182_v7 = vand.u32 4294901760, %v10371_v6 }
 0xd85   :  { %14369 = vmatmul.mubr.f32.vlgmr.msra.gmra.mxu1 %v9880_v30 }
 0xd86   :  { %14383 = vmatpush3.msra.mxu1 %v18049_v55  ;;  %v9872_v35 = vand.u32 4294901760, %v9871_v33  ;;  %v9883_v28 = vsub.f32 %v9881_v54, %v9882_v26 }
 0xd87   :  { %14384 = vmatprep.subr.mxu1 %v18051_v14 }
 0xd88   :  { %14385 = vmatpush3.msra.mxu1 %v18051_v14  ;;  %14390 = vmatprep.mubr.f32.mxu1 %v9872_v35  ;;  %v9873_v16 = vsub.f32 %v9871_v33, %v9872_v35  ;;  %v9884_v36 = vand.u32 4294901760, %v9883_v28 }
 0xd89   :  { %14386 = vmatprep.subr.mxu1 %v18053_v43 }
 0xd8a   :  { %14387 = vmatpush3.msra.mxu1 %v18053_v43  ;;  %v9874_v63 = vand.u32 4294901760, %v9873_v16 }
 0xd8b   :  { %14388 = vmatprep.subr.mxu1 %v18058_v17 }
 0xd8c   :  { %14389 = vmatpush3.msra.mxu1 %v18058_v17  ;;  %14357 = vmatprep.mubr.f32.mxu0 %v9874_v63 }
 0xd8d   :  { %14391 = vmatmul.mubr.f32.vlgmr.msra.gmra.mxu1 %v9882_v26  ;;  %14404 = vmatprep.subr.mxu1 %v18049_v55  ;;  %v18192_v26 = vsub.f32 %v10371_v6, %v18182_v7 }
 0xd8e   :  { %14358 = vmatmul.mubr.f32.vlgmr.msra.gmra.mxu0 %v9884_v36  ;;  %14405 = vmatpush3.msra.mxu1 %v18049_v55 }
 0xd8f   :  { %14372 = vmatpush3.msra.mxu0 %v18061_v3  ;;  %14412 = vmatprep.mubr.f32.mxu1 %v9870_v31  ;;  %v18199_v28 = vand.u32 4294901760, %v18192_v26 }
 0xd90   :  { %14373 = vmatprep.subr.mxu0 %v18064_v2  ;;  %14379 = vmatprep.mubr.f32.mxu0 %v9871_v33 }
 0xd91   :  { %14406 = vmatprep.subr.mxu1 %v18051_v14  ;;  %14374 = vmatpush3.msra.mxu0 %v18064_v2  ;;  %v10524_v36 = vsub.f32 %v18192_v26, %v18199_v28 }
 0xd92   :  { %14407 = vmatpush3.msra.mxu1 %v18051_v14  ;;  %14375 = vmatprep.subr.mxu0 %v18067_v0  ;;  %v11582_v14 = vld [vmem:[%s18463_s1 + $0xc0] ss:$0 sm:$0xff] }
 0xd93   :  { %14408 = vmatprep.subr.mxu1 %v18053_v43  ;;  %14376 = vmatpush3.msra.mxu0 %v18067_v0 }
 0xd94   :  { %14409 = vmatpush3.msra.mxu1 %v18053_v43  ;;  %14377 = vmatprep.subr.mxu0 %v18071_v27 }
 0xd95   :  { %14410 = vmatprep.subr.mxu1 %v18058_v17  ;;  %14378 = vmatpush3.msra.mxu0 %v18071_v27 }
 0xd96   :  { %14411 = vmatpush3.msra.mxu1 %v18058_v17  ;;  %14380 = vmatmul.mubr.f32.vlgmr.msra.gmra.mxu0 %v9881_v54  ;;  %v10510_v54 = vsub.f32 %v18165_v53, %v18177_v62 }
 0xd97   :  { %14393 = vmatprep.subr.mxu0 %v18075_v37  ;;  %14413 = vmatmul.mubr.f32.vlgmr.msra.gmra.mxu1 %v9880_v30 }
 0xd98   :  { %14394 = vmatpush3.msra.mxu0 %v18075_v37  ;;  %14401 = vmatprep.mubr.f32.mxu0 %v9870_v31  ;;  %v10504_v31 = vand.u32 4294901760, %v10503_v25  ;;  %v10511_v35 = vand.u32 4294901760, %v10510_v54 }
 0xd99   :  { %14395 = vmatprep.subr.mxu0 %v18078_v51 }
 0xd9a   :  { %14396 = vmatpush3.msra.mxu0 %v18078_v51  ;;  %14426 = vmatprep.subr.mxu1 %v10504_v31 }
 0xd9b   :  { %14397 = vmatprep.subr.mxu0 %v18081_v41  ;;  %14427 = vmatpush3.msra.mxu1 %v10504_v31  ;;  %v10917_v31 = vld [vmem:[%s18463_s1 + $0xf8] sm:$0xff] }
 0xd9c   :  { %14398 = vmatpush3.msra.mxu0 %v18081_v41  ;;  %14428 = vmatprep.subr.mxu1 %v10511_v35 }
 0xd9d   :  { %14399 = vmatprep.subr.mxu0 %v18085_v61  ;;  %14429 = vmatpush3.msra.mxu1 %v10511_v35  ;;  %v18329_v35 = vand.u32 4294901760, %v10917_v31 }
 0xd9e   :  { %14400 = vmatpush3.msra.mxu0 %v18085_v61 }
 0xd9f   :  { %14402 = vmatmul.mubr.f32.vlgmr.msra.gmra.mxu0 %v9880_v30  ;;  %14415 = vmatprep.subr.mxu0 %v18146_v22  ;;  %v18180_v30 = vsub.f32 %v10372_v21, %v18167_v10 }
 0xda0   :  { %14416 = vmatpush3.msra.mxu0 %v18146_v22 }
 0xda1   :  { %14417 = vmatprep.subr.mxu0 %v18154_v1  ;;  %v18189_v33 = vand.u32 4294901760, %v18180_v30 }
 0xda2   :  { %14418 = vmatpush3.msra.mxu0 %v18154_v1 }
 0xda3   :  { %14419 = vmatprep.subr.mxu0 %v18167_v10  ;;  %v10517_v16 = vsub.f32 %v18180_v30, %v18189_v33 }
 0xda4   :  { %14420 = vmatpush3.msra.mxu0 %v18167_v10 }
 0xda5   :  { %14421 = vmatprep.subr.mxu0 %v18182_v7  ;;  %v10518_v63 = vand.u32 4294901760, %v10517_v16 }
 0xda6   :  { %14422 = vmatpush3.msra.mxu0 %v18182_v7 }
 0xda7   :  { %14437 = vmatprep.subr.mxu0 %v18152_v9  ;;  %14430 = vmatprep.subr.mxu1 %v10518_v63 }
 0xda8   :  { %14431 = vmatpush3.msra.mxu1 %v10518_v63 }
 0xe45   :  { %v14370_v43 = vpop.f32.mrf.mxu1 }
 0xe47   :  { %v9977_v27 = vpop.f32.mrf.mxu1 }
 0xe4d   :  { %v14392_v51 = vpop.f32.mrf.mxu1 }
 0xe4e   :  { %v14359_v55 = vpop.f32.mrf.mxu0 }
 0xe4f   :  { %v9887_v3 = vadd.f32 %v14359_v55, %v11582_v14  ;;  %v10147_v44 = vpop.f32.mrf.mxu1  ;;  %v10525_v55 = vand.u32 4294901760, %v10524_v36 }
 0xe50   :  { %v9876_v17 = vpop.f32.mrf.mxu0 }
 0xe51   :  { %v9877_v2 = vadd.f32 %v11582_v14, %v9876_v17  ;;  %v9984_v37 = vadd.f32 %v14370_v43, %v9887_v3  ;;  %14432 = vmatprep.subr.mxu1 %v10525_v55 }
 0xe52   :  { %14433 = vmatpush3.msra.mxu1 %v10525_v55  ;;  %v18343_v55 = vsub.f32 %v10917_v31, %v18329_v35 }
 0xe53   :  { %v9978_v4 = vadd.f32 %v9977_v27, %v9877_v2  ;;  %14448 = vmatprep.subr.mxu1 %v18146_v22 }
 0xe56   :  { %v14381_v0 = vpop.f32.mrf.mxu0 }
 0xe57   :  { %v10071_v41 = vadd.f32 %v14381_v0, %v9984_v37  ;;  %v14414_v38 = vpop.f32.mrf.mxu1  ;;  %v11583_v37 = vld [vmem:[%s18463_s1 + $0x148] ss:$0 sm:$0xff] }
 0xe58   :  { %v10063_v47 = vpop.f32.mrf.mxu0 }
 0xe59   :  { %v10064_v45 = vadd.f32 %v10063_v47, %v9978_v4  ;;  %v10156_v61 = vadd.f32 %v14392_v51, %v10071_v41  ;;  %v10319_v34 = vpop.f32.mrf.mxu1  ;;  %v11584_v47 = vld [vmem:[%s18463_s1 + $0x150] ss:$0 sm:$0xff] }
 0xe5b   :  { %v10148_v5 = vadd.f32 %v10147_v44, %v10064_v45 }
 0xe5f   :  { %v14403_v18 = vpop.f32.mrf.mxu0 }
 0xe60   :  { %v10245_v57 = vadd.f32 %v14403_v18, %v10156_v61 }
 0xe61   :  { %v10238_v40 = vpop.f32.mrf.mxu0 }
 0xe62   :  { %v10239_v13 = vadd.f32 %v10238_v40, %v10148_v5  ;;  %v10326_v15 = vadd.f32 %v14414_v38, %v10245_v57 }
 0xe64   :  { %v10320_v58 = vadd.f32 %v10319_v34, %v10239_v13  ;;  %v10330_v60 = vadd.f32 %v10326_v15, %v18649_v48 }
 0xe66   :  { %v10329_v39 = vadd.f32 %v10320_v58, %v18648_v20  ;;  %v10336_v29 = vsel %vm28_vm0, %v10330_v60, 0.0 }
 0xe68   :  { %v10333_v19 = vsel %vm28_vm0, %v10329_v39, 0.0 }
 0xe69   :  { %10334 = vadd.xlane.f32.xlu1 %v10333_v19 }
 0xe6d   :  { %10337 = vadd.xlane.f32.xlu1 %v10336_v29 }
 0xef2   :  { %v10335_v50 = vpop.xlane.xlu1 %10334 }
 0xef3   :  { %v10339_v11 = vmul.f32 0.03125, %v10335_v50  ;;  %v10922_v50 = vld [vmem:[%s18463_s1 + $0x120] sm:$0xff] }
 0xef5   :  { %v10341_v42 = vsub.f32 %v10329_v39, %v10339_v11 }
 0xef6   :  { %v10338_v8 = vpop.xlane.xlu1 %10337 }
 0xef7   :  { %v10340_v56 = vmul.f32 0.03125, %v10338_v8  ;;  %v10343_v52 = vmul.f32 %v10341_v42, %v10341_v42  ;;  %v10921_v8 = vld [vmem:[%s18463_s1 + $0x118] sm:$0xff] }
 0xef9   :  { %v10342_v23 = vsub.f32 %v10330_v60, %v10340_v56  ;;  %v10345_v24 = vsel %vm28_vm0, %v10343_v52, 0.0  ;;  %v10923_v60 = vld [vmem:[%s18463_s1 + $0x128] sm:$0xff] }
 0xefa   :  { %10346 = vadd.xlane.f32.xlu1 %v10345_v24  ;;  %v18252_v29 = vand.u32 4294901760, %v10923_v60  ;;  %v10920_v24 = vld [vmem:[%s18463_s1 + $0x110] sm:$0xff] }
 0xefb   :  { %v10344_v32 = vmul.f32 %v10342_v23, %v10342_v23 }
 0xefc   :  { %v18258_v11 = vsub.f32 %v10923_v60, %v18252_v29 }
 0xefd   :  { %v10348_v59 = vsel %vm28_vm0, %v10344_v32, 0.0 }
 0xefe   :  { %10349 = vadd.xlane.f32.xlu1 %v10348_v59  ;;  %v18268_v56 = vand.u32 4294901760, %v18258_v11 }
 0xf00   :  { %v11049_v32 = vsub.f32 %v18258_v11, %v18268_v56 }
 0xf83   :  { %v10347_v14 = vpop.xlane.xlu1 %10346 }
 0xf84   :  { %v10351_v43 = vmul.f32 0.03125, %v10347_v14 }
 0xf86   :  { %v10353_v17 = vadd.f32 1e-05, %v10351_v43 }
 0xf87   :  { %v10350_v3 = vpop.xlane.xlu1 %10349 }
 0xf88   :  { %14621 = vrsqrt.f32 %v10353_v17  ;;  %v10352_v2 = vmul.f32 0.03125, %v10350_v3  ;;  %v18354_v3 = vand.u32 4294901760, %v18343_v55 }
 0xf8a   :  { %v10354_v0 = vadd.f32 1e-05, %v10352_v2 }
 0xf8c   :  { %14623 = vrsqrt.f32 %v10354_v0 }
 0xf95   :  { %v14622_v27 = vpop.eup %14621 }
 0xf96   :  { %v10357_v51 = vmul.f32 %v14622_v27, %v10341_v42  ;;  %v18260_v42 = vand.u32 4294901760, %v10922_v50 }
 0xf98   :  { %v10363_v41 = vmul.f32 %v11583_v37, %v10357_v51  ;;  %v18271_v52 = vsub.f32 %v10922_v50, %v18260_v42 }
 0xf99   :  { %v14624_v4 = vpop.eup %14623 }
 0xf9a   :  { %v10358_v45 = vmul.f32 %v14624_v4, %v10342_v23  ;;  %v18211_v44 = vadd.f32 %v11584_v47, %v10363_v41  ;;  %v18273_v23 = vand.u32 4294901760, %v10921_v8  ;;  %v18283_v59 = vand.u32 4294901760, %v18271_v52 }
 0xf9c   :  { %v10364_v61 = vmul.f32 %v11583_v37, %v10358_v45  ;;  %v10381_v38 = vsel %vm28_vm0, %v18211_v44, 0  ;;  %v18286_v12 = vsub.f32 %v10921_v8, %v18273_v23  ;;  %v11091_v37 = vsub.f32 %v18343_v55, %v18354_v3 }
 0xf9d   :  { %v10455_v18 = vand.u32 4294901760, %v10381_v38 }
 0xf9e   :  { %v18215_v57 = vadd.f32 %v11584_v47, %v10364_v61  ;;  %v18298_v21 = vand.u32 4294901760, %v18286_v12  ;;  %v11092_v47 = vand.u32 4294901760, %v11091_v37  ;;  %v11585_v61 = vld [vmem:[%s18463_s1 + $0xe8] ss:$0 sm:$0xff] }
 0xf9f   :  { %14434 = vmatprep.mubr.f32.mxu1 %v10455_v18  ;;  %v10456_v5 = vsub.f32 %v10381_v38, %v10455_v18 }
 0xfa0   :  { %v10384_v40 = vsel %vm28_vm0, %v18215_v57, 0  ;;  %v11063_v25 = vsub.f32 %v18286_v12, %v18298_v21 }
 0xfa1   :  { %v10465_v13 = vand.u32 4294901760, %v10384_v40  ;;  %v10457_v34 = vand.u32 4294901760, %v10456_v5 }
 0xfa2   :  { %v11064_v54 = vand.u32 4294901760, %v11063_v25 }
 0xfa3   :  { %v10466_v15 = vsub.f32 %v10384_v40, %v10465_v13  ;;  %14435 = vmatmul.mubr.f32.vlgmr.msra.gmra.mxu1 %v10465_v13  ;;  %v10458_v58 = vsub.f32 %v10456_v5, %v10457_v34 }
 0xfa4   :  { %14449 = vmatpush3.msra.mxu1 %v18146_v22  ;;  %14456 = vmatprep.mubr.f32.mxu1 %v10457_v34 }
 0xfa5   :  { %14450 = vmatprep.subr.mxu1 %v18154_v1  ;;  %v10459_v20 = vand.u32 4294901760, %v10458_v58  ;;  %v10467_v39 = vand.u32 4294901760, %v10466_v15 }
 0xfa6   :  { %14451 = vmatpush3.msra.mxu1 %v18154_v1 }
 0xfa7   :  { %14452 = vmatprep.subr.mxu1 %v18167_v10  ;;  %14423 = vmatprep.mubr.f32.mxu0 %v10459_v20  ;;  %v10468_v19 = vsub.f32 %v10466_v15, %v10467_v39 }
 0xfa8   :  { %14453 = vmatpush3.msra.mxu1 %v18167_v10 }
 0xfa9   :  { %14454 = vmatprep.subr.mxu1 %v18182_v7  ;;  %v10469_v48 = vand.u32 4294901760, %v10468_v19 }
 0xfaa   :  { %14455 = vmatpush3.msra.mxu1 %v18182_v7 }
 0xfab   :  { %14457 = vmatmul.mubr.f32.vlgmr.msra.gmra.mxu1 %v10467_v39  ;;  %14470 = vmatprep.subr.mxu1 %v18146_v22 }
 0xfac   :  { %14424 = vmatmul.mubr.f32.vlgmr.msra.gmra.mxu0 %v10469_v48  ;;  %14471 = vmatpush3.msra.mxu1 %v18146_v22  ;;  %v18288_v22 = vand.u32 4294901760, %v10920_v24 }
 0xfad   :  { %14438 = vmatpush3.msra.mxu0 %v18152_v9  ;;  %14478 = vmatprep.mubr.f32.mxu1 %v10455_v18  ;;  %v11050_v9 = vand.u32 4294901760, %v11049_v32 }
 0xfae   :  { %14439 = vmatprep.subr.mxu0 %v18165_v53  ;;  %14445 = vmatprep.mubr.f32.mxu0 %v10456_v5 }
 0xfaf   :  { %14472 = vmatprep.subr.mxu1 %v18154_v1  ;;  %14440 = vmatpush3.msra.mxu0 %v18165_v53  ;;  %v18304_v53 = vand.u32 4294901760, %v10919_v46 }
 0xfb0   :  { %14473 = vmatpush3.msra.mxu1 %v18154_v1  ;;  %14441 = vmatprep.subr.mxu0 %v18180_v30  ;;  %v11056_v1 = vsub.f32 %v18271_v52, %v18283_v59 }
 0xfb1   :  { %14474 = vmatprep.subr.mxu1 %v18167_v10  ;;  %14442 = vmatpush3.msra.mxu0 %v18180_v30 }
 0xfb2   :  { %14475 = vmatpush3.msra.mxu1 %v18167_v10  ;;  %14443 = vmatprep.subr.mxu0 %v18192_v26  ;;  %v10918_v10 = vld [vmem:[%s18463_s1 + $0x100] sm:$0xff]  ;;  %v11057_v6 = vand.u32 4294901760, %v11056_v1 }
 0xfb3   :  { %14476 = vmatprep.subr.mxu1 %v18182_v7  ;;  %14444 = vmatpush3.msra.mxu0 %v18192_v26  ;;  %v18315_v30 = vand.u32 4294901760, %v10918_v10 }
 0xfb4   :  { %14477 = vmatpush3.msra.mxu1 %v18182_v7  ;;  %14446 = vmatmul.mubr.f32.vlgmr.msra.gmra.mxu0 %v10466_v15  ;;  %v18318_v7 = vsub.f32 %v10919_v46, %v18304_v53 }
 0xfb5   :  { %14459 = vmatprep.subr.mxu0 %v18162_v49  ;;  %14479 = vmatmul.mubr.f32.vlgmr.msra.gmra.mxu1 %v10465_v13  ;;  %v18327_v26 = vsub.f32 %v10918_v10, %v18315_v30 }
 0xfb6   :  { %14460 = vmatpush3.msra.mxu0 %v18162_v49  ;;  %14467 = vmatprep.mubr.f32.mxu0 %v10455_v18  ;;  %v18301_v49 = vsub.f32 %v10920_v24, %v18288_v22  ;;  %v18333_v16 = vand.u32 4294901760, %v18318_v7 }
 0xfb7   :  { %14461 = vmatprep.subr.mxu0 %v18177_v62  ;;  %14500 = vmatprep.subr.mxu1 %v11050_v9  ;;  %v18340_v36 = vand.u32 4294901760, %v18327_v26 }
 0xfb8   :  { %14462 = vmatpush3.msra.mxu0 %v18177_v62  ;;  %v18313_v62 = vand.u32 4294901760, %v18301_v49  ;;  %14501 = vmatpush3.msra.mxu1 %v11050_v9  ;;  %v11077_v43 = vsub.f32 %v18318_v7, %v18333_v16 }
 0xfb9   :  { %14463 = vmatprep.subr.mxu0 %v18189_v33  ;;  %14502 = vmatprep.subr.mxu1 %v11057_v6  ;;  %v11084_v17 = vsub.f32 %v18327_v26, %v18340_v36 }
 0xfba   :  { %14464 = vmatpush3.msra.mxu0 %v18189_v33  ;;  %v11070_v33 = vsub.f32 %v18301_v49, %v18313_v62  ;;  %14503 = vmatpush3.msra.mxu1 %v11057_v6  ;;  %v11078_v0 = vand.u32 4294901760, %v11077_v43 }
 0xfbb   :  { %14465 = vmatprep.subr.mxu0 %v18199_v28  ;;  %14504 = vmatprep.subr.mxu1 %v11064_v54  ;;  %v11085_v27 = vand.u32 4294901760, %v11084_v17 }
 0xfbc   :  { %14466 = vmatpush3.msra.mxu0 %v18199_v28  ;;  %v10916_v28 = vld [vmem:[%s18463_s1 + $0xf0] sm:$0xff]  ;;  %v11071_v63 = vand.u32 4294901760, %v11070_v33  ;;  %14505 = vmatpush3.msra.mxu1 %v11064_v54 }
 0xfbd   :  { %14468 = vmatmul.mubr.f32.vlgmr.msra.gmra.mxu0 %v10465_v13  ;;  %14481 = vmatprep.subr.mxu0 %v18252_v29  ;;  %v18345_v14 = vand.u32 4294901760, %v10916_v28 }
 0xfbe   :  { %14482 = vmatpush3.msra.mxu0 %v18252_v29  ;;  %14506 = vmatprep.subr.mxu1 %v11071_v63 }
 0xfbf   :  { %14483 = vmatprep.subr.mxu0 %v18260_v42  ;;  %v18357_v2 = vsub.f32 %v10916_v28, %v18345_v14  ;;  %14507 = vmatpush3.msra.mxu1 %v11071_v63 }
 0xfc0   :  { %14484 = vmatpush3.msra.mxu0 %v18260_v42  ;;  %14508 = vmatprep.subr.mxu1 %v11078_v0 }
 0xfc1   :  { %14485 = vmatprep.subr.mxu0 %v18273_v23  ;;  %v18364_v51 = vand.u32 4294901760, %v18357_v2  ;;  %14509 = vmatpush3.msra.mxu1 %v11078_v0 }
 0xfc2   :  { %14486 = vmatpush3.msra.mxu0 %v18273_v23  ;;  %14510 = vmatprep.subr.mxu1 %v11085_v27 }
 0xfc3   :  { %14487 = vmatprep.subr.mxu0 %v18288_v22  ;;  %v11098_v41 = vsub.f32 %v18357_v2, %v18364_v51  ;;  %14511 = vmatpush3.msra.mxu1 %v11085_v27 }
 0xfc4   :  { %14488 = vmatpush3.msra.mxu0 %v18288_v22  ;;  %14512 = vmatprep.subr.mxu1 %v11092_v47 }
 0xfc5   :  { %14489 = vmatprep.subr.mxu0 %v18304_v53  ;;  %v11099_v4 = vand.u32 4294901760, %v11098_v41  ;;  %14513 = vmatpush3.msra.mxu1 %v11092_v47 }
 0xfc6   :  { %14490 = vmatpush3.msra.mxu0 %v18304_v53 }
 0xfc7   :  { %14491 = vmatprep.subr.mxu0 %v18315_v30  ;;  %14514 = vmatprep.subr.mxu1 %v11099_v4 }
 0xfc8   :  { %14492 = vmatpush3.msra.mxu0 %v18315_v30  ;;  %14515 = vmatpush3.msra.mxu1 %v11099_v4 }
 0xfc9   :  { %14493 = vmatprep.subr.mxu0 %v18329_v35  ;;  %14538 = vmatprep.subr.mxu1 %v18252_v29 }
 0xfca   :  { %14494 = vmatpush3.msra.mxu0 %v18329_v35 }
 0xfcb   :  { %14495 = vmatprep.subr.mxu0 %v18345_v14 }
 0xfcc   :  { %14496 = vmatpush3.msra.mxu0 %v18345_v14 }
 0xfcd   :  { %14519 = vmatprep.subr.mxu0 %v18258_v11 }
0x1063   :  { %v14436_v38 = vpop.f32.mrf.mxu1 }
0x1065   :  { %v10562_v34 = vpop.f32.mrf.mxu1 }
0x106b   :  { %v14458_v58 = vpop.f32.mrf.mxu1 }
0x106c   :  { %v14425_v45 = vpop.f32.mrf.mxu0 }
0x106d   :  { %v10472_v5 = vadd.f32 %v14425_v45, %v11585_v61  ;;  %v10732_v60 = vpop.f32.mrf.mxu1 }
0x106e   :  { %v10461_v18 = vpop.f32.mrf.mxu0 }
0x106f   :  { %v10462_v40 = vadd.f32 %v11585_v61, %v10461_v18  ;;  %v10569_v15 = vadd.f32 %v14436_v38, %v10472_v5 }
0x1071   :  { %v10563_v19 = vadd.f32 %v10562_v34, %v10462_v40 }
0x1074   :  { %v14447_v13 = vpop.f32.mrf.mxu0 }
0x1075   :  { %v10656_v39 = vadd.f32 %v14447_v13, %v10569_v15  ;;  %v14480_v8 = vpop.f32.mrf.mxu1 }
0x1076   :  { %v10648_v20 = vpop.f32.mrf.mxu0 }
0x1077   :  { %v10649_v48 = vadd.f32 %v10648_v20, %v10563_v19  ;;  %v10741_v50 = vadd.f32 %v14458_v58, %v10656_v39  ;;  %v10904_v6 = vpop.f32.mrf.mxu1 }
0x1079   :  { %v10733_v46 = vadd.f32 %v10732_v60, %v10649_v48 }
0x107d   :  { %v14469_v24 = vpop.f32.mrf.mxu0 }
0x107e   :  { %v10830_v32 = vadd.f32 %v14469_v24, %v10741_v50 }
0x107f   :  { %v10823_v9 = vpop.f32.mrf.mxu0 }
0x1080   :  { %v10911_v1 = vadd.f32 %v14480_v8, %v10830_v32  ;;  %v10824_v10 = vadd.f32 %v10823_v9, %v10733_v46 }
0x1082   :  { %v10915_v25 = vmax.f32 %v10911_v1, 0.0  ;;  %v10905_v31 = vadd.f32 %v10904_v6, %v10824_v10  ;;  %v11587_v1 = vld [vmem:[%s18463_s1 + $0x158] ss:$0 sm:$0xff]  ;;  %v11588_v6 = vld [vmem:[%s18463_s1 + $0x160] ss:$0 sm:$0xff] }
0x1084   :  { %v10934_v54 = vsel %vm10929_vm2, %v10915_v25, 0  ;;  %v10914_v33 = vmax.f32 %v10905_v31, 0.0 }
0x1085   :  { %v18374_v28 = vand.u32 4294901760, %v10934_v54 }
0x1086   :  { %v10931_v63 = vsel %vm10929_vm2, %v10914_v33, 0 }
0x1087   :  { %v11020_v43 = vsub.f32 %v10934_v54, %v18374_v28  ;;  %v11009_v17 = vand.u32 4294901760, %v10931_v63 }
0x1089   :  { %v11021_v0 = vand.u32 4294901760, %v11020_v43  ;;  %v11010_v27 = vsub.f32 %v10931_v63, %v11009_v17  ;;  %14516 = vmatprep.mubr.f32.mxu1 %v11009_v17 }
0x108a   :  { %14517 = vmatmul.mubr.f32.vlgmr.msra.gmra.mxu1 %v18374_v28 }
0x108b   :  { %14539 = vmatpush3.msra.mxu1 %v18252_v29  ;;  %v11011_v37 = vand.u32 4294901760, %v11010_v27  ;;  %v11022_v47 = vsub.f32 %v11020_v43, %v11021_v0 }
0x108c   :  { %14540 = vmatprep.subr.mxu1 %v18260_v42 }
0x108d   :  { %14541 = vmatpush3.msra.mxu1 %v18260_v42  ;;  %14554 = vmatprep.mubr.f32.mxu1 %v11011_v37  ;;  %v11012_v41 = vsub.f32 %v11010_v27, %v11011_v37  ;;  %v11023_v45 = vand.u32 4294901760, %v11022_v47 }
0x108e   :  { %14542 = vmatprep.subr.mxu1 %v18273_v23 }
0x108f   :  { %14543 = vmatpush3.msra.mxu1 %v18273_v23  ;;  %v11013_v4 = vand.u32 4294901760, %v11012_v41 }
0x1090   :  { %14544 = vmatprep.subr.mxu1 %v18288_v22 }
0x1091   :  { %14545 = vmatpush3.msra.mxu1 %v18288_v22  ;;  %14497 = vmatprep.mubr.f32.mxu0 %v11013_v4 }
0x1092   :  { %14546 = vmatprep.subr.mxu1 %v18304_v53  ;;  %14498 = vmatmul.mubr.f32.vlgmr.msra.gmra.mxu0 %v11023_v45 }
0x1093   :  { %14520 = vmatpush3.msra.mxu0 %v18258_v11  ;;  %14547 = vmatpush3.msra.mxu1 %v18304_v53  ;;  %v11586_v11 = vld [vmem:[%s18463_s1 + $0x130] ss:$0 sm:$0xff] }
0x1094   :  { %14521 = vmatprep.subr.mxu0 %v18271_v52  ;;  %14535 = vmatprep.mubr.f32.mxu0 %v11010_v27 }
0x1095   :  { %14548 = vmatprep.subr.mxu1 %v18315_v30  ;;  %14522 = vmatpush3.msra.mxu0 %v18271_v52 }
0x1096   :  { %14549 = vmatpush3.msra.mxu1 %v18315_v30  ;;  %14523 = vmatprep.subr.mxu0 %v18286_v12 }
0x1097   :  { %14550 = vmatprep.subr.mxu1 %v18329_v35  ;;  %14524 = vmatpush3.msra.mxu0 %v18286_v12 }
0x1098   :  { %14551 = vmatpush3.msra.mxu1 %v18329_v35  ;;  %14525 = vmatprep.subr.mxu0 %v18301_v49 }
0x1099   :  { %14552 = vmatprep.subr.mxu1 %v18345_v14  ;;  %14526 = vmatpush3.msra.mxu0 %v18301_v49 }
0x109a   :  { %14553 = vmatpush3.msra.mxu1 %v18345_v14  ;;  %14527 = vmatprep.subr.mxu0 %v18318_v7 }
0x109b   :  { %14555 = vmatmul.mubr.f32.vlgmr.msra.gmra.mxu1 %v11021_v0  ;;  %14576 = vmatprep.subr.mxu1 %v18252_v29 }
0x109c   :  { %14528 = vmatpush3.msra.mxu0 %v18318_v7  ;;  %14577 = vmatpush3.msra.mxu1 %v18252_v29 }
0x109d   :  { %14592 = vmatprep.mubr.f32.mxu1 %v11009_v17  ;;  %14529 = vmatprep.subr.mxu0 %v18327_v26 }
0x109e   :  { %14578 = vmatprep.subr.mxu1 %v18260_v42  ;;  %14530 = vmatpush3.msra.mxu0 %v18327_v26 }
0x109f   :  { %14579 = vmatpush3.msra.mxu1 %v18260_v42  ;;  %14531 = vmatprep.subr.mxu0 %v18343_v55 }
0x10a0   :  { %14580 = vmatprep.subr.mxu1 %v18273_v23  ;;  %14532 = vmatpush3.msra.mxu0 %v18343_v55 }
0x10a1   :  { %14581 = vmatpush3.msra.mxu1 %v18273_v23  ;;  %14533 = vmatprep.subr.mxu0 %v18357_v2 }
0x10a2   :  { %14582 = vmatprep.subr.mxu1 %v18288_v22  ;;  %14534 = vmatpush3.msra.mxu0 %v18357_v2 }
0x10a3   :  { %14583 = vmatpush3.msra.mxu1 %v18288_v22  ;;  %14536 = vmatmul.mubr.f32.vlgmr.msra.gmra.mxu0 %v11020_v43 }
0x10a4   :  { %14557 = vmatprep.subr.mxu0 %v18268_v56  ;;  %14584 = vmatprep.subr.mxu1 %v18304_v53 }
0x10a5   :  { %14558 = vmatpush3.msra.mxu0 %v18268_v56  ;;  %14573 = vmatprep.mubr.f32.mxu0 %v11009_v17 }
0x10a6   :  { %14585 = vmatpush3.msra.mxu1 %v18304_v53  ;;  %14559 = vmatprep.subr.mxu0 %v18283_v59 }
0x10a7   :  { %14586 = vmatprep.subr.mxu1 %v18315_v30  ;;  %14560 = vmatpush3.msra.mxu0 %v18283_v59 }
0x10a8   :  { %14587 = vmatpush3.msra.mxu1 %v18315_v30  ;;  %14561 = vmatprep.subr.mxu0 %v18298_v21 }
0x10a9   :  { %14588 = vmatprep.subr.mxu1 %v18329_v35  ;;  %14562 = vmatpush3.msra.mxu0 %v18298_v21 }
0x10aa   :  { %14589 = vmatpush3.msra.mxu1 %v18329_v35  ;;  %14563 = vmatprep.subr.mxu0 %v18313_v62 }
0x10ab   :  { %14590 = vmatprep.subr.mxu1 %v18345_v14  ;;  %14564 = vmatpush3.msra.mxu0 %v18313_v62 }
0x10ac   :  { %14591 = vmatpush3.msra.mxu1 %v18345_v14  ;;  %14565 = vmatprep.subr.mxu0 %v18333_v16 }
0x10ad   :  { %14593 = vmatmul.mubr.f32.vlgmr.msra.gmra.mxu1 %v18374_v28  ;;  %14566 = vmatpush3.msra.mxu0 %v18333_v16 }
0x10ae   :  { %14567 = vmatprep.subr.mxu0 %v18340_v36 }
0x10af   :  { %14568 = vmatpush3.msra.mxu0 %v18340_v36 }
0x10b0   :  { %14569 = vmatprep.subr.mxu0 %v18354_v3 }
0x10b1   :  { %14570 = vmatpush3.msra.mxu0 %v18354_v3 }
0x10b2   :  { %14571 = vmatprep.subr.mxu0 %v18364_v51 }
0x10b3   :  { %14572 = vmatpush3.msra.mxu0 %v18364_v51 }
0x10b4   :  { %14574 = vmatmul.mubr.f32.vlgmr.msra.gmra.mxu0 %v18374_v28 }
0x114a   :  { %v14518_v42 = vpop.f32.mrf.mxu1 }
0x114c   :  { %v11136_v12 = vpop.f32.mrf.mxu1 }
0x1152   :  { %v14499_v29 = vpop.f32.mrf.mxu0 }
0x1153   :  { %v11026_v52 = vadd.f32 %v14499_v29, %v11586_v11 }
0x1154   :  { %v11015_v56 = vpop.f32.mrf.mxu0 }
0x1155   :  { %v11016_v59 = vadd.f32 %v11586_v11, %v11015_v56  ;;  %v11143_v22 = vadd.f32 %v14518_v42, %v11026_v52 }
0x1157   :  { %v11137_v62 = vadd.f32 %v11136_v12, %v11016_v59 }
0x115b   :  { %v14556_v21 = vpop.f32.mrf.mxu1 }
0x115d   :  { %v11318_v7 = vpop.f32.mrf.mxu1 }
0x1163   :  { %v14537_v23 = vpop.f32.mrf.mxu0 }
0x1164   :  { %v11238_v53 = vadd.f32 %v14537_v23, %v11143_v22 }
0x1165   :  { %v11230_v49 = vpop.f32.mrf.mxu0 }
0x1166   :  { %v11231_v30 = vadd.f32 %v11230_v49, %v11137_v62  ;;  %v11327_v26 = vadd.f32 %v14556_v21, %v11238_v53 }
0x1168   :  { %v11319_v55 = vadd.f32 %v11318_v7, %v11231_v30 }
0x116d   :  { %v14594_v35 = vpop.f32.mrf.mxu1 }
0x116f   :  { %v11506_v2 = vpop.f32.mrf.mxu1 }
0x1174   :  { %v14575_v16 = vpop.f32.mrf.mxu0 }
0x1175   :  { %v11428_v36 = vadd.f32 %v14575_v16, %v11327_v26 }
0x1176   :  { %v11421_v14 = vpop.f32.mrf.mxu0 }
0x1177   :  { %v11422_v3 = vadd.f32 %v11421_v14, %v11319_v55  ;;  %v11513_v51 = vadd.f32 %v14594_v35, %v11428_v36 }
0x1179   :  { %v11507_v61 = vadd.f32 %v11506_v2, %v11422_v3  ;;  %v11517_v5 = vadd.f32 %v11513_v51, %v18215_v57 }
0x117b   :  { %v11516_v38 = vadd.f32 %v11507_v61, %v18211_v44  ;;  %v11523_v40 = vsel %vm28_vm0, %v11517_v5, 0.0 }
0x117d   :  { %v11520_v18 = vsel %vm28_vm0, %v11516_v38, 0.0 }
0x117e   :  { %11521 = vadd.xlane.f32.xlu1 %v11520_v18 }
0x1182   :  { %11524 = vadd.xlane.f32.xlu1 %v11523_v40 }
0x1207   :  { %v11522_v13 = vpop.xlane.xlu1 %11521 }
0x1208   :  { %v11526_v34 = vmul.f32 0.03125, %v11522_v13 }
0x120a   :  { %v11528_v15 = vsub.f32 %v11516_v38, %v11526_v34 }
0x120b   :  { %v11525_v58 = vpop.xlane.xlu1 %11524 }
0x120c   :  { %v11527_v20 = vmul.f32 0.03125, %v11525_v58  ;;  %v11530_v39 = vmul.f32 %v11528_v15, %v11528_v15 }
0x120e   :  { %v11529_v19 = vsub.f32 %v11517_v5, %v11527_v20  ;;  %v11532_v48 = vsel %vm28_vm0, %v11530_v39, 0.0 }
0x120f   :  { %11533 = vadd.xlane.f32.xlu0 %v11532_v48 }
0x1210   :  { %v11531_v60 = vmul.f32 %v11529_v19, %v11529_v19 }
0x1212   :  { %v11535_v44 = vsel %vm28_vm0, %v11531_v60, 0.0 }
0x1213   :  { %11536 = vadd.xlane.f32.xlu1 %v11535_v44 }
0x1298   :  { %v11534_v50 = vpop.xlane.xlu0 %11533 }
0x1299   :  { %v11538_v57 = vmul.f32 0.03125, %v11534_v50 }
0x129b   :  { %v11540_v8 = vadd.f32 1e-05, %v11538_v57 }
0x129c   :  { %v11537_v24 = vpop.xlane.xlu1 %11536 }
0x129d   :  { %14625 = vrsqrt.f32 %v11540_v8  ;;  %v11539_v32 = vmul.f32 0.03125, %v11537_v24 }
0x129f   :  { %v11541_v46 = vadd.f32 1e-05, %v11539_v32 }
0x12a1   :  { %14627 = vrsqrt.f32 %v11541_v46 }
0x12aa   :  { %v14626_v9 = vpop.eup %14625 }
0x12ab   :  { %v11544_v10 = vmul.f32 %v14626_v9, %v11528_v15 }
0x12ad   :  { %v11550_v25 = vmul.f32 %v11587_v1, %v11544_v10 }
0x12ae   :  { %v14628_v31 = vpop.eup %14627 }
0x12af   :  { %v11545_v54 = vmul.f32 %v14628_v31, %v11529_v19  ;;  %v11556_v33 = vadd.f32 %v11588_v6, %v11550_v25 }
0x12b1   :  { %v11551_v28 = vmul.f32 %v11587_v1, %v11545_v54  ;;  %11558 = vst.msk [vmem:[#allocation2] sm:$0xff] %vm28_vm0, %v11556_v33 }
0x12b3   :  { %v11557_v63 = vadd.f32 %v11588_v6, %v11551_v28 }
0x12b5   :  { %11559 = vst.msk [vmem:[#allocation2 + $0x8] sm:$0xff] %vm28_vm0, %v11557_v63 }
0x12b6   :  { %14642 = shalt.err (!%p14639_p4)
}
0x12b7   :  { %s14656_s1 = smov 128   ;;  %s14657_s6 = smov 8  }
0x12b8   :  { %11571 = dma.vmem_to_hbm [thread:$0]  %s11566_s4, 256, %s18465_s3, [#allocation3], %s14656_s1, %s14656_s1, %s14657_s6  }
0x12b9   :  { %14651 = dma.done.wait [#allocation3], 256  }
0x12ba   :  { %14652 = vsyncadd [#allocation3], 4294967040 }
0x12bb   :  { %11575 = vsyncpa [#allocation3], 1 }

</bundles_post_ra>
